<compile_context>
chip_gen: v5e
topology: v5e:2x2
jax: 0.10.0
libtpu: 0.0.40
codegen_flags: <defaults>
</compile_context>

<pallas_src>
import jax
import jax.numpy as jnp
from jax.experimental import pallas as pl
from jax.experimental.pallas import tpu as pltpu


def _round_up(n: int, m: int) -> int:
    return ((n + m - 1) // m) * m


def label_attention_kernel(x_ref, w1_ref, w2_ref, w3_ref, b3_ref, out_ref, h_ref):
    tb, s, d = x_ref.shape
    tc = out_ref.shape[-1]

    # Flatten (TB, S, D) -> (TB*S, D): S and D stay on the (sublane, lane) axes.
    x2d = x_ref[...].reshape(tb * s, d)

    # h = tanh(x @ W1^T) is independent of the label tile: compute it once per
    # batch tile (first label step) into the persistent VMEM scratch.
    @pl.when(pl.program_id(1) == 0)
    def _():
        h_ref[...] = jnp.tanh(
            jnp.dot(x2d, w1_ref[...], preferred_element_type=jnp.float32)
        ).astype(h_ref.dtype)

    # att = h @ W2^T  (this label tile)                    -> [TB*S, tc]
    att = jnp.dot(h_ref[...], w2_ref[...],
                  preferred_element_type=jnp.float32).reshape(tb, s, tc)
    # v[b, s, c] = x[b, s, :] . w3[c, :]  (third_linear pre-bias), a clean
    # row-major MXU matmul instead of a transposed [C, D] contraction.
    v = jnp.dot(x2d, w3_ref[...],
                preferred_element_type=jnp.float32).reshape(tb, s, tc)

    # Unnormalized softmax over the sequence axis, per batch element (f32).
    att_max = jnp.max(att, axis=1, keepdims=True)           # [TB, 1, tc]
    att_exp = jnp.exp(att - att_max)                         # [TB, S, tc]
    denom = jnp.sum(att_exp, axis=1)                         # [TB, tc]
    num = jnp.sum(att_exp * v, axis=1)                       # [TB, tc]

    # Exact reciprocal applied only to the small [TB, tc] sums.
    out = num * pl.reciprocal(denom, approx=False) + b3_ref[...]
    out_ref[...] = out.astype(out_ref.dtype)


def _tpu_vmem_capacity_bytes(default_bytes: int = 64 * 1024 * 1024) -> int:
    """Physical VMEM per core; conservative 64 MiB (v7x) fallback."""
    try:
        info = pltpu.get_tpu_info()
        cap = int(getattr(info, "vmem_capacity_bytes", 0) or 0)
        if cap > 0:
            return cap
    except Exception:
        pass
    return default_bytes


def _pick_tiles(batch, seq, d_pad, p_pad, c_pad, itemsize, budget_bytes):
    """Pick (batch_tile, class_tile) with an honest per-step VMEM footprint."""

    def footprint(tb, tc, n_c_tiles):
        wbuf = 1 if n_c_tiles == 1 else 2             # streamed label-tile weights
        return (
            2 * tb * seq * d_pad * itemsize           # x block (double-buffered)
            + d_pad * p_pad * itemsize                # w1_t (single-buffered, constant)
            + wbuf * (p_pad + d_pad + 1) * tc * itemsize   # w2_t, w3_t, b3
            + tb * seq * p_pad * itemsize             # h scratch
            + 3 * tb * seq * tc * 4                   # att, exp(att), v (f32)
            + 2 * tb * tc * itemsize                  # out block (double-buffered)
        )

    tb_cands = [t for t in range(1, batch + 1)
                if batch % t == 0 and (t % 8 == 0 or t == batch)]
    tc_cands = [t for t in range(128, c_pad + 1, 128) if c_pad % t == 0]

    best, best_key = None, None
    for tc in tc_cands:
        n_c = c_pad // tc
        for tb in tb_cands:
            if footprint(tb, tc, n_c) > budget_bytes:
                continue
            rows_ok = (tb * seq >= 512) or (tb == batch)   # fill the MXU M-dim
            n_b = batch // tb
            even_grid = n_b >= 2 and n_b % 2 == 0          # keep both v7x TCs busy
            key = (rows_ok, tc == c_pad, even_grid, tb, tc)
            if best_key is None or key > best_key:
                best_key, best = key, (tb, tc)
    if best is None:
        best = (tb_cands[0], tc_cands[0])   # minimal-footprint fallback
    return best


def label_attention(x, w1_t, w2_t, w3_t, b3, *,
                    batch_tile=None, class_tile=None, vmem_budget_bytes=None):
    """x: [B,S,D], w1_t: [D,P], w2_t: [P,C], w3_t: [D,C], b3: [1,C] -> [B,C]."""
    B, S, D = x.shape
    P = w1_t.shape[1]
    C = w2_t.shape[1]
    assert w1_t.shape == (D, P), w1_t.shape
    assert w2_t.shape == (P, C), w2_t.shape
    assert w3_t.shape == (D, C), w3_t.shape
    assert b3.shape == (1, C), b3.shape

    # Pad the MXU contraction dims (D, P) and the label/lane dim (C) to
    # multiples of 128: full MXU passes and lane-dense loads/stores. Zero
    # padding is exact for this op; extra label columns are sliced off below.
    Dp, Pp, Cp = _round_up(D, 128), _round_up(P, 128), _round_up(C, 128)
    if Dp != D:
        x = jnp.pad(x, ((0, 0), (0, 0), (0, Dp - D)))
        w1_t = jnp.pad(w1_t, ((0, Dp - D), (0, 0)))
        w3_t = jnp.pad(w3_t, ((0, Dp - D), (0, 0)))
    if Pp != P:
        w1_t = jnp.pad(w1_t, ((0, 0), (0, Pp - P)))
        w2_t = jnp.pad(w2_t, ((0, Pp - P), (0, 0)))
    if Cp != C:
        w2_t = jnp.pad(w2_t, ((0, 0), (0, Cp - C)))
        w3_t = jnp.pad(w3_t, ((0, 0), (0, Cp - C)))
        b3 = jnp.pad(b3, ((0, 0), (0, Cp - C)))

    itemsize = x.dtype.itemsize
    vmem_cap = _tpu_vmem_capacity_bytes()
    budget = (vmem_budget_bytes if vmem_budget_bytes is not None
              else int(vmem_cap * 0.7))
    tb, tc = _pick_tiles(B, S, Dp, Pp, Cp, itemsize, budget)
    if batch_tile is not None:
        tb = batch_tile
    if class_tile is not None:
        tc = class_tile
    assert B % tb == 0 and (tb % 8 == 0 or tb == B), (B, tb)
    assert Cp % tc == 0 and tc % 128 == 0, (Cp, tc)
    n_c = Cp // tc

    # Constant-index blocks never need a prefetch buffer -> single-buffer them.
    # Label-tile weight blocks stream only when the label axis is tiled.
    const_mode = pl.Buffered(1)
    label_mode = pl.Buffered(1) if n_c == 1 else None

    grid_spec = pltpu.PrefetchScalarGridSpec(
        num_scalar_prefetch=0,
        grid=(B // tb, n_c),                                   # label axis innermost
        in_specs=[
            pl.BlockSpec((tb, S, Dp), lambda b, c: (b, 0, 0)),              # x
            pl.BlockSpec((Dp, Pp), lambda b, c: (0, 0),
                         pipeline_mode=const_mode),                         # w1_t
            pl.BlockSpec((Pp, tc), lambda b, c: (0, c),
                         pipeline_mode=label_mode),                         # w2_t
            pl.BlockSpec((Dp, tc), lambda b, c: (0, c),
                         pipeline_mode=label_mode),                         # w3_t
            pl.BlockSpec((1, tc), lambda b, c: (0, c),
                         pipeline_mode=label_mode),                         # b3
        ],
        out_specs=pl.BlockSpec((tb, tc), lambda b, c: (b, c)),  # lane-dense writeback
        scratch_shapes=[pltpu.VMEM((tb * S, Pp), x.dtype)],     # h cache
    )

    # Advisory cost estimate so XLA can schedule around the custom call.
    flops = 2 * B * S * (Dp * Pp + Pp * Cp + Dp * Cp)
    transcendentals = B * S * (Pp + Cp)
    bytes_accessed = ((x.size + w1_t.size + w2_t.size + w3_t.size + b3.size)
                      * itemsize + B * Cp * itemsize)

    out = pl.pallas_call(
        label_attention_kernel,
        out_shape=jax.ShapeDtypeStruct((B, Cp), x.dtype),
        grid_spec=grid_spec,
        compiler_params=pltpu.CompilerParams(
            # Batch tiles are independent (megacore-shardable); the label axis
            # is sequential per batch tile because it reuses the h scratch.
            dimension_semantics=("parallel", "arbitrary"),
            vmem_limit_bytes=int(vmem_cap * 0.9),
        ),
        cost_estimate=pl.CostEstimate(
            flops=flops,
            transcendentals=transcendentals,
            bytes_accessed=bytes_accessed,
        ),
    )(x, w1_t, w2_t, w3_t, b3)

    return out[:, :C] if Cp != C else out


def label_attention_ref(x, w1_t, w2_t, w3_t, b3):
    """Pure-JAX reference mirroring the PyTorch forward exactly."""
    h = jnp.tanh(jnp.einsum('bsd,dp->bsp', x, w1_t))
    att = jax.nn.softmax(jnp.einsum('bsp,pc->bsc', h, w2_t), axis=1)   # over seq
    weighted = jnp.einsum('bsc,bsd->bcd', att, x)                       # [B, C, D]
    return jnp.sum(w3_t.T[None, :, :] * weighted, axis=2) + b3


if __name__ == "__main__":
    # Small shapes consistent with the module's forward contract.  D/P/C are
    # deliberately NOT multiples of 128 so the wrapper's padding path is
    # exercised; C=200 also exercises the output-slice path.
    B, S, D, P, C = 16, 16, 32, 48, 200

    key = jax.random.PRNGKey(0)
    kx, k1, k2, k3, kb = jax.random.split(key, 5)

    x = jax.random.normal(kx, (B, S, D), dtype=jnp.float32)

    # N(0, 0.03) weights matching _init_weights; the bias (PyTorch default
    # uniform init) is drawn from the same small normal purely for a
    # reproducible synthetic parameter set.
    std = 0.03
    w1 = std * jax.random.normal(k1, (P, D), dtype=jnp.float32)   # first_linear.weight
    w2 = std * jax.random.normal(k2, (C, P), dtype=jnp.float32)   # second_linear.weight
    w3 = std * jax.random.normal(k3, (C, D), dtype=jnp.float32)   # third_linear.weight
    b3 = std * jax.random.normal(kb, (1, C), dtype=jnp.float32)   # third_linear.bias

    w1_t, w2_t, w3_t = w1.T, w2.T, w3.T
    ref = label_attention_ref(x, w1_t, w2_t, w3_t, b3)

    # 1) Auto-picked tiles (single label tile on these small shapes).
    out = jax.block_until_ready(label_attention(x, w1_t, w2_t, w3_t, b3))
    assert out.shape == (B, C), out.shape
    assert jnp.allclose(out, ref, atol=1e-4, rtol=1e-4), (
        f"max abs diff {jnp.max(jnp.abs(out - ref))}")

    # 2) Forced multi-tile grid (2 batch tiles x 2 label tiles) to exercise the
    #    label grid axis and the per-batch-tile h-scratch reuse.
    out2 = jax.block_until_ready(
        label_attention(x, w1_t, w2_t, w3_t, b3, batch_tile=8, class_tile=128))
    assert jnp.allclose(out2, ref, atol=1e-4, rtol=1e-4), (
        f"max abs diff {jnp.max(jnp.abs(out2 - ref))}")

    print("KERNEL_OK")
</pallas_src>

<mosaic_0001>
module attributes {stable_mosaic.version = 11 : i64} {
  func.func @label_attention_kernel(%arg0: i32, %arg1: i32, %arg2: memref<16x16x128xf32, #tpu.memory_space<vmem>>, %arg3: memref<128x128xf32, #tpu.memory_space<vmem>>, %arg4: memref<128x256xf32, #tpu.memory_space<vmem>>, %arg5: memref<128x256xf32, #tpu.memory_space<vmem>>, %arg6: memref<1x256xf32, #tpu.memory_space<vmem>>, %arg7: memref<16x256xf32, #tpu.memory_space<vmem>>, %arg8: memref<256x128xf32, #tpu.memory_space<vmem>>) attributes {dimension_semantics = [#tpu.dimension_semantics<parallel>, #tpu.dimension_semantics<arbitrary>], iteration_bounds = array<i64: 1, 1>, scalar_prefetch = 0 : i64, scratch_operands = 1 : i64, tpu.core_type = #tpu.core_type<tc>, window_params = [{transform_indices = @transform_0, window_bounds = array<i64: 16, 16, 128>}, {pipeline_mode = #tpu.pipeline_mode<synchronous>, transform_indices = @transform_1, window_bounds = array<i64: 128, 128>}, {pipeline_mode = #tpu.pipeline_mode<synchronous>, transform_indices = @transform_2, window_bounds = array<i64: 128, 256>}, {pipeline_mode = #tpu.pipeline_mode<synchronous>, transform_indices = @transform_3, window_bounds = array<i64: 128, 256>}, {pipeline_mode = #tpu.pipeline_mode<synchronous>, transform_indices = @transform_4, window_bounds = array<i64: 1, 256>}, {transform_indices = @transform_5, window_bounds = array<i64: 16, 256>}]} {
    %c0 = arith.constant 0 : index
    %c0_0 = arith.constant 0 : index
    %c0_1 = arith.constant 0 : index
    %0 = vector.load %arg2[%c0, %c0_0, %c0_1] : memref<16x16x128xf32, #tpu.memory_space<vmem>>, vector<16x16x128xf32>
    %1 = vector.shape_cast %0 : vector<16x16x128xf32> to vector<256x128xf32>
    %c0_i32 = arith.constant 0 : i32
    %2 = arith.cmpi eq, %arg1, %c0_i32 : i32
    %3 = arith.extui %2 : i1 to i32
    %c0_i32_2 = arith.constant 0 : i32
    %4 = arith.cmpi ne, %3, %c0_i32_2 : i32
    scf.if %4 {
      %c0_17 = arith.constant 0 : index
      %c0_18 = arith.constant 0 : index
      %26 = vector.load %arg3[%c0_17, %c0_18] : memref<128x128xf32, #tpu.memory_space<vmem>>, vector<128x128xf32>
      %cst_19 = arith.constant dense<0.000000e+00> : vector<256x128xf32>
      %27 = tpu.matmul %1, %26, %cst_19 {dimension_numbers = #tpu.dot_dimension_numbers<[1], [0], [0], [1], [0, 0, 1, 1], [], []>} : vector<256x128xf32>, vector<128x128xf32>, vector<256x128xf32> -> vector<256x128xf32>
      %28 = math.tanh %27 : vector<256x128xf32>
      %c0_20 = arith.constant 0 : index
      %c0_21 = arith.constant 0 : index
      %29 = vector.load %arg8[%c0_20, %c0_21] : memref<256x128xf32, #tpu.memory_space<vmem>>, vector<256x128xf32>
      tpu.vector_store %arg8[%c0_20, %c0_21], %28 {strides = array<i32>} : memref<256x128xf32, #tpu.memory_space<vmem>>, vector<256x128xf32>,
    } else {
    }
    %c0_3 = arith.constant 0 : index
    %c0_4 = arith.constant 0 : index
    %5 = vector.load %arg8[%c0_3, %c0_4] : memref<256x128xf32, #tpu.memory_space<vmem>>, vector<256x128xf32>
    %c0_5 = arith.constant 0 : index
    %c0_6 = arith.constant 0 : index
    %6 = vector.load %arg4[%c0_5, %c0_6] : memref<128x256xf32, #tpu.memory_space<vmem>>, vector<128x256xf32>
    %cst = arith.constant dense<0.000000e+00> : vector<256x256xf32>
    %7 = tpu.matmul %5, %6, %cst {dimension_numbers = #tpu.dot_dimension_numbers<[1], [0], [0], [1], [0, 0, 1, 1], [], []>} : vector<256x128xf32>, vector<128x256xf32>, vector<256x256xf32> -> vector<256x256xf32>
    %8 = vector.shape_cast %7 : vector<256x256xf32> to vector<16x16x256xf32>
    %c0_7 = arith.constant 0 : index
    %c0_8 = arith.constant 0 : index
    %9 = vector.load %arg5[%c0_7, %c0_8] : memref<128x256xf32, #tpu.memory_space<vmem>>, vector<128x256xf32>
    %cst_9 = arith.constant dense<0.000000e+00> : vector<256x256xf32>
    %10 = tpu.matmul %1, %9, %cst_9 {dimension_numbers = #tpu.dot_dimension_numbers<[1], [0], [0], [1], [0, 0, 1, 1], [], []>} : vector<256x128xf32>, vector<128x256xf32>, vector<256x256xf32> -> vector<256x256xf32>
    %11 = vector.shape_cast %10 : vector<256x256xf32> to vector<16x16x256xf32>
    %cst_10 = arith.constant dense<0xFF800000> : vector<16x256xf32>
    %12 = vector.multi_reduction <maximumf>, %8, %cst_10 [1] : vector<16x16x256xf32> to vector<16x256xf32>
    %13 = vector.shape_cast %12 : vector<16x256xf32> to vector<16x1x256xf32>
    %14 = vector.broadcast %13 : vector<16x1x256xf32> to vector<16x16x256xf32>
    %15 = arith.subf %8, %14 : vector<16x16x256xf32>
    %16 = math.exp %15 : vector<16x16x256xf32>
    %cst_11 = arith.constant dense<0.000000e+00> : vector<16x256xf32>
    %17 = vector.multi_reduction <add>, %16, %cst_11 [1] : vector<16x16x256xf32> to vector<16x256xf32>
    %18 = arith.mulf %16, %11 : vector<16x16x256xf32>
    %cst_12 = arith.constant dense<0.000000e+00> : vector<16x256xf32>
    %19 = vector.multi_reduction <add>, %18, %cst_12 [1] : vector<16x16x256xf32> to vector<16x256xf32>
    %20 = tpu.reciprocal %17 : vector<16x256xf32> -> vector<16x256xf32>
    %21 = arith.mulf %19, %20 : vector<16x256xf32>
    %c0_13 = arith.constant 0 : index
    %c0_14 = arith.constant 0 : index
    %22 = vector.load %arg6[%c0_13, %c0_14] : memref<1x256xf32, #tpu.memory_space<vmem>>, vector<1x256xf32>
    %23 = vector.broadcast %22 : vector<1x256xf32> to vector<16x256xf32>
    %24 = arith.addf %21, %23 : vector<16x256xf32>
    %c0_15 = arith.constant 0 : index
    %c0_16 = arith.constant 0 : index
    %25 = vector.load %arg7[%c0_15, %c0_16] : memref<16x256xf32, #tpu.memory_space<vmem>>, vector<16x256xf32>
    tpu.vector_store %arg7[%c0_15, %c0_16], %24 {strides = array<i32>} : memref<16x256xf32, #tpu.memory_space<vmem>>, vector<16x256xf32>,
    return
  }
  func.func @transform_0(%arg0: i32, %arg1: i32) -> (i32, i32, i32) {
    %c0_i32 = arith.constant 0 : i32
    %c0_i32_0 = arith.constant 0 : i32
    %c0_i32_1 = arith.constant 0 : i32
    return %arg0, %c0_i32, %c0_i32_0 : i32, i32, i32
  }
  func.func @transform_1(%arg0: i32, %arg1: i32) -> (i32, i32) {
    %c0_i32 = arith.constant 0 : i32
    %c0_i32_0 = arith.constant 0 : i32
    %c0_i32_1 = arith.constant 0 : i32
    return %c0_i32, %c0_i32_0 : i32, i32
  }
  func.func @transform_2(%arg0: i32, %arg1: i32) -> (i32, i32) {
    %c0_i32 = arith.constant 0 : i32
    %c0_i32_0 = arith.constant 0 : i32
    return %c0_i32, %arg1 : i32, i32
  }
  func.func @transform_3(%arg0: i32, %arg1: i32) -> (i32, i32) {
    %c0_i32 = arith.constant 0 : i32
    %c0_i32_0 = arith.constant 0 : i32
    return %c0_i32, %arg1 : i32, i32
  }
  func.func @transform_4(%arg0: i32, %arg1: i32) -> (i32, i32) {
    %c0_i32 = arith.constant 0 : i32
    %c0_i32_0 = arith.constant 0 : i32
    return %c0_i32, %arg1 : i32, i32
  }
  func.func @transform_5(%arg0: i32, %arg1: i32) -> (i32, i32) {
    %c0_i32 = arith.constant 0 : i32
    return %arg0, %arg1 : i32, i32
  }
}

</mosaic_0001>

<bundles_post_ra>
// kernel: tpu_custom_call.1
= control target key start
LH: loop header
LB: loop body
LE: loop exit
PB: predicated region body
PF: predicated region fallthrough
CT: control target
= control target key end

     0   :  { %10 = vsyncpa [#allocation4], 0  ;;  %s4224_s0 = inlined_call_operand.hbm [shape: f32[16,16,128], index: 0, kind: input, shape index: {}]   ;;  %s4225_s1 = inlined_call_operand.hbm [shape: f32[128,128], index: 1, kind: input, shape index: {}]   ;;  %s4226_s2 = inlined_call_operand.hbm [shape: f32[128,256], index: 2, kind: input, shape index: {}]   ;;  %s4227_s3 = inlined_call_operand.hbm [shape: f32[128,256], index: 3, kind: input, shape index: {}]   ;;  %s4228_s4 = inlined_call_operand.vmem [shape: f32[1,256], index: 4, kind: input, shape index: {}]   ;;  %s4229_s5 = inlined_call_operand.hbm [shape: f32[16,256], index: 5, kind: output, shape index: {}]  }
   0x1   :  { %11 = vsyncpa [#allocation7], 0 }
   0x2   :  { %12 = vsyncpa [#allocation10], 0 }
   0x3   :  { %13 = vsyncpa [#allocation5], 0  ;;  %s31_s20 = sshll.u32 %s4225_s1, 4  ;;  %s2880_s21 = smov [#allocation6]   ;;  %s32_s20 = int_to_ptr.hbm [resolvable:$true] %s31_s20 }
   0x4   :  { %s33_s22 = sshll.u32 %s2880_s21, 4  ;;  %s18_s25 = sshll.u32 %s4224_s0, 4  ;;  %s34_s22 = int_to_ptr.vmem [resolvable:$true] %s33_s22  ;;  %s19_s25 = int_to_ptr.hbm [resolvable:$true] %s18_s25 }
   0x5   :  { %s2881_s26 = smov 128   ;;  %s2882_s27 = smov 8  }
   0x6   :  { %39 = dma.hbm_to_vmem [thread:$0]  %s32_s20, 2048, %s34_s22, [#allocation7], %s2881_s26, %s2881_s26, %s2882_s27  }
   0x7   :  { %s2883_s28 = smov [#allocation3]   ;;  %s44_s7 = sshll.u32 %s4226_s2, 4  ;;  %s45_s7 = int_to_ptr.hbm [resolvable:$true] %s44_s7 }
   0x8   :  { %s20_s29 = sshll.u32 %s2883_s28, 4  ;;  %s2884_s1 = smov [#allocation8]   ;;  %s21_s29 = int_to_ptr.vmem [resolvable:$true] %s20_s29 }
   0x9   :  { %26 = dma.hbm_to_vmem [thread:$0]  %s19_s25, 4096, %s21_s29, [#allocation4], %s2881_s26, %s2881_s26, %s2882_s27  }
   0xa   :  { %s46_s8 = sshll.u32 %s2884_s1, 4  ;;  %s57_s0 = sshll.u32 %s4227_s3, 4  ;;  %s47_s8 = int_to_ptr.vmem [resolvable:$true] %s46_s8  ;;  %s58_s0 = int_to_ptr.hbm [resolvable:$true] %s57_s0 }
   0xb   :  { %s2885_s11 = smov 256   ;;  %s2886_s12 = smov 16  }
   0xc   :  { %52 = dma.hbm_to_vmem [thread:$0]  %s45_s7, 4096, %s47_s8, [#allocation7], %s2885_s11, %s2885_s11, %s2886_s12  }
   0xd   :  { %s2887_s13 = smov [#allocation9]  }
   0xe   :  { %s59_s14 = sshll.u32 %s2887_s13, 4  ;;  %s60_s14 = int_to_ptr.vmem [resolvable:$true] %s59_s14 }
   0xf   :  { %65 = dma.hbm_to_vmem [thread:$0]  %s58_s0, 4096, %s60_s14, [#allocation10], %s2885_s11, %s2885_s11, %s2886_s12  }
  0x10   :  { %2872 = dma.done.wait [#allocation4], 4096  }
  0x11   :  { %2873 = vsyncadd [#allocation4], 4294963200 }
  0x12   :  { %2874 = dma.done.wait [#allocation7], 6144  }
  0x13   :  { %2875 = vsyncadd [#allocation7], 4294961152 }
  0x14   :  { %2876 = dma.done.wait [#allocation10], 4096  }
  0x15   :  { %2877 = vsyncadd [#allocation10], 4294963200  ;;  %v135_v0 = vld [vmem:[#allocation6 + $0x78] sm:$0xff]  ;;  %v134_v1 = vld [vmem:[#allocation6 + $0x70] sm:$0xff]  ;;  %vm2340_vm11 = vcmask 1041409   ;;  %s2416_s18 = sshll.u32 %s4229_s5, 4  ;;  %s2417_s18 = int_to_ptr.hbm [resolvable:$true] %s2416_s18 }
  0x16   :  { %136 = vmatpush.msra.mxu0 %v135_v0  ;;  %2431 = vmatpush.msra.mxu1 %v135_v0  ;;  %v133_v2 = vld [vmem:[#allocation6 + $0x68] sm:$0xff]  ;;  %v132_v3 = vld [vmem:[#allocation6 + $0x60] sm:$0xff]  ;;  %v131_v4 = vld [vmem:[#allocation6 + $0x58] sm:$0xff] }
  0x17   :  { %2432 = vmatpush.msra.mxu2 %v135_v0  ;;  %2433 = vmatpush.msra.mxu3 %v135_v0  ;;  %v130_v5 = vld [vmem:[#allocation6 + $0x50] sm:$0xff]  ;;  %v129_v6 = vld [vmem:[#allocation6 + $0x48] sm:$0xff]  ;;  %v128_v7 = vld [vmem:[#allocation6 + $0x40] sm:$0xff] }
  0x18   :  { %137 = vmatpush.msra.mxu0 %v134_v1  ;;  %2434 = vmatpush.msra.mxu1 %v134_v1  ;;  %v127_v8 = vld [vmem:[#allocation6 + $0x38] sm:$0xff]  ;;  %v126_v9 = vld [vmem:[#allocation6 + $0x30] sm:$0xff]  ;;  %v125_v10 = vld [vmem:[#allocation6 + $0x28] sm:$0xff] }
  0x19   :  { %2435 = vmatpush.msra.mxu2 %v134_v1  ;;  %2436 = vmatpush.msra.mxu3 %v134_v1  ;;  %v124_v11 = vld [vmem:[#allocation6 + $0x20] sm:$0xff]  ;;  %v123_v12 = vld [vmem:[#allocation6 + $0x18] sm:$0xff]  ;;  %v122_v13 = vld [vmem:[#allocation6 + $0x10] sm:$0xff] }
  0x1a   :  { %138 = vmatpush.msra.mxu0 %v133_v2  ;;  %2437 = vmatpush.msra.mxu1 %v133_v2  ;;  %v121_v14 = vld [vmem:[#allocation6 + $0x8] sm:$0xff]  ;;  %v120_v15 = vld [vmem:[#allocation6] sm:$0xff]  ;;  %v2943_v18 = vld [vmem:[#allocation3 + $0x10] sm:$0xff] }
  0x1b   :  { %2438 = vmatpush.msra.mxu2 %v133_v2  ;;  %2439 = vmatpush.msra.mxu3 %v133_v2  ;;  %v2937_v16 = vld [vmem:[#allocation3] sm:$0xff]  ;;  %v2940_v17 = vld [vmem:[#allocation3 + $0x8] sm:$0xff]  ;;  %v2946_v19 = vld [vmem:[#allocation3 + $0x18] sm:$0xff] }
  0x1c   :  { %139 = vmatpush.msra.mxu0 %v132_v3  ;;  %2440 = vmatpush.msra.mxu1 %v132_v3  ;;  %v2949_v20 = vld [vmem:[#allocation3 + $0x40] sm:$0xff]  ;;  %v376_v22 = vld [vmem:[#allocation8 + $0xf8] sm:$0xff]  ;;  %v374_v23 = vld [vmem:[#allocation8 + $0xe8] sm:$0xff] }
  0x1d   :  { %2441 = vmatpush.msra.mxu2 %v132_v3  ;;  %2442 = vmatpush.msra.mxu3 %v132_v3  ;;  %v2951_v21 = vld [vmem:[#allocation3 + $0x80] sm:$0xff]  ;;  %v375_v24 = vld [vmem:[#allocation8 + $0xf0] sm:$0xff]  ;;  %v372_v26 = vld [vmem:[#allocation8 + $0xd8] sm:$0xff] }
  0x1e   :  { %140 = vmatpush.msra.mxu0 %v131_v4  ;;  %2443 = vmatpush.msra.mxu1 %v131_v4  ;;  %v373_v25 = vld [vmem:[#allocation8 + $0xe0] sm:$0xff]  ;;  %v371_v27 = vld [vmem:[#allocation8 + $0xd0] sm:$0xff]  ;;  %v370_v29 = vld [vmem:[#allocation8 + $0xc8] sm:$0xff] }
  0x1f   :  { %2444 = vmatpush.msra.mxu2 %v131_v4  ;;  %2445 = vmatpush.msra.mxu3 %v131_v4  ;;  %v2955_v28 = vld [vmem:[#allocation3 + $0x20] sm:$0xff]  ;;  %v2959_v31 = vld [vmem:[#allocation3 + $0x48] sm:$0xff]  ;;  %v368_v33 = vld [vmem:[#allocation8 + $0xb8] sm:$0xff] }
  0x20   :  { %141 = vmatpush.msra.mxu0 %v130_v5  ;;  %2446 = vmatpush.msra.mxu1 %v130_v5  ;;  %v2957_v30 = vld [vmem:[#allocation3 + $0xc0] sm:$0xff]  ;;  %v2961_v32 = vld [vmem:[#allocation3 + $0x88] sm:$0xff]  ;;  %v367_v36 = vld [vmem:[#allocation8 + $0xb0] sm:$0xff] }
  0x21   :  { %2447 = vmatpush.msra.mxu2 %v130_v5  ;;  %2448 = vmatpush.msra.mxu3 %v130_v5  ;;  %v369_v34 = vld [vmem:[#allocation8 + $0xc0] sm:$0xff]  ;;  %v366_v35 = vld [vmem:[#allocation8 + $0xa8] sm:$0xff]  ;;  %v364_v37 = vld [vmem:[#allocation8 + $0x98] sm:$0xff] }
  0x22   :  { %142 = vmatpush.msra.mxu0 %v129_v6  ;;  %2449 = vmatpush.msra.mxu1 %v129_v6  ;;  %v365_v38 = vld [vmem:[#allocation8 + $0xa0] sm:$0xff]  ;;  %v633_v39 = vld [vmem:[#allocation9 + $0xf0] sm:$0xff]  ;;  %v2967_v40 = vld [vmem:[#allocation3 + $0xc8] sm:$0xff] }
  0x23   :  { %2450 = vmatpush.msra.mxu2 %v129_v6  ;;  %2451 = vmatpush.msra.mxu3 %v129_v6  ;;  %v2969_v41 = vld [vmem:[#allocation3 + $0x28] sm:$0xff]  ;;  %v2971_v43 = vld [vmem:[#allocation3 + $0x50] sm:$0xff]  ;;  %v360_v46 = vld [vmem:[#allocation8 + $0x78] sm:$0xff] }
  0x24   :  { %143 = vmatpush.msra.mxu0 %v128_v7  ;;  %2452 = vmatpush.msra.mxu1 %v128_v7  ;;  %v362_v42 = vld [vmem:[#allocation8 + $0x88] sm:$0xff]  ;;  %v2973_v44 = vld [vmem:[#allocation3 + $0x90] sm:$0xff]  ;;  %v361_v47 = vld [vmem:[#allocation8 + $0x80] sm:$0xff] }
  0x25   :  { %2453 = vmatpush.msra.mxu2 %v128_v7  ;;  %2454 = vmatpush.msra.mxu3 %v128_v7  ;;  %v363_v45 = vld [vmem:[#allocation8 + $0x90] sm:$0xff]  ;;  %v358_v48 = vld [vmem:[#allocation8 + $0x68] sm:$0xff]  ;;  %v631_v49 = vld [vmem:[#allocation9 + $0xe0] sm:$0xff] }
  0x26   :  { %144 = vmatpush.msra.mxu0 %v127_v8  ;;  %2455 = vmatpush.msra.mxu1 %v127_v8  ;;  %v634_v50 = vld [vmem:[#allocation9 + $0xf8] sm:$0xff]  ;;  %v359_v51 = vld [vmem:[#allocation8 + $0x70] sm:$0xff]  ;;  %v632_v55 = vld [vmem:[#allocation9 + $0xe8] sm:$0xff] }
  0x27   :  { %2456 = vmatpush.msra.mxu2 %v127_v8  ;;  %2457 = vmatpush.msra.mxu3 %v127_v8  ;;  %v356_v52 = vld [vmem:[#allocation8 + $0x58] sm:$0xff]  ;;  %v629_v53 = vld [vmem:[#allocation9 + $0xd0] sm:$0xff]  ;;  %v357_v57 = vld [vmem:[#allocation8 + $0x60] sm:$0xff] }
  0x28   :  { %145 = vmatpush.msra.mxu0 %v126_v9  ;;  %2458 = vmatpush.msra.mxu1 %v126_v9  ;;  %v110_v54 = vld [vmem:[#allocation3 + $0xd0] sm:$0xff]  ;;  %v2981_v58 = vld [vmem:[#allocation3 + $0x58] sm:$0xff]  ;;  %v354_v60 = vld [vmem:[#allocation8 + $0x48] sm:$0xff] }
  0x29   :  { %2459 = vmatpush.msra.mxu2 %v126_v9  ;;  %2460 = vmatpush.msra.mxu3 %v126_v9  ;;  %v2979_v56 = vld [vmem:[#allocation3 + $0x30] sm:$0xff]  ;;  %v2983_v59 = vld [vmem:[#allocation3 + $0x98] sm:$0xff]  ;;  %v353_v63 = vld [vmem:[#allocation8 + $0x40] sm:$0xff] }
  0x2a   :  { %146 = vmatpush.msra.mxu0 %v125_v10  ;;  %2461 = vmatpush.msra.mxu1 %v125_v10  ;;  %v355_v61 = vld [vmem:[#allocation8 + $0x50] sm:$0xff]  ;;  %v352_v62 = vld [vmem:[#allocation8 + $0x38] sm:$0xff]  ;;  %v627_v0 = vld [vmem:[#allocation9 + $0xc0] sm:$0xff] }
  0x2b   :  { %2462 = vmatpush.msra.mxu2 %v125_v10  ;;  %2463 = vmatpush.msra.mxu3 %v125_v10  ;;  %v630_v1 = vld [vmem:[#allocation9 + $0xd8] sm:$0xff]  ;;  %v350_v2 = vld [vmem:[#allocation8 + $0x28] sm:$0xff]  ;;  %v351_v3 = vld [vmem:[#allocation8 + $0x30] sm:$0xff] }
  0x2c   :  { %147 = vmatpush.msra.mxu0 %v124_v11  ;;  %2464 = vmatpush.msra.mxu1 %v124_v11  ;;  %v111_v4 = vld [vmem:[#allocation3 + $0xd8] sm:$0xff]  ;;  %v2990_v6 = vld [vmem:[#allocation3 + $0x60] sm:$0xff]  ;;  %v2997_v9 = vld [vmem:[#allocation3 + $0x68] sm:$0xff] }
  0x2d   :  { %2465 = vmatpush.msra.mxu2 %v124_v11  ;;  %2466 = vmatpush.msra.mxu3 %v124_v11  ;;  %v2988_v5 = vld [vmem:[#allocation3 + $0x38] sm:$0xff]  ;;  %v2992_v7 = vld [vmem:[#allocation3 + $0xa0] sm:$0xff]  ;;  %v2999_v10 = vld [vmem:[#allocation3 + $0xa8] sm:$0xff] }
  0x2e   :  { %148 = vmatpush.msra.mxu0 %v123_v12  ;;  %2467 = vmatpush.msra.mxu1 %v123_v12  ;;  %v112_v8 = vld [vmem:[#allocation3 + $0xe0] sm:$0xff]  ;;  %v3003_v11 = vld [vmem:[#allocation3 + $0x70] sm:$0xff] }
  0x2f   :  { %2468 = vmatpush.msra.mxu2 %v123_v12  ;;  %2469 = vmatpush.msra.mxu3 %v123_v12  ;;  %v3005_v12 = vld [vmem:[#allocation3 + $0xb0] sm:$0xff] }
  0x30   :  { %149 = vmatpush.msra.mxu0 %v122_v13  ;;  %2470 = vmatpush.msra.mxu1 %v122_v13 }
  0x31   :  { %2471 = vmatpush.msra.mxu2 %v122_v13  ;;  %2472 = vmatpush.msra.mxu3 %v122_v13  ;;  %v3009_v13 = vld [vmem:[#allocation3 + $0x78] sm:$0xff] }
  0x32   :  { %150 = vmatpush.msra.mxu0 %v121_v14  ;;  %2473 = vmatpush.msra.mxu1 %v121_v14 }
  0x33   :  { %2474 = vmatpush.msra.mxu2 %v121_v14  ;;  %2475 = vmatpush.msra.mxu3 %v121_v14  ;;  %v3012_v14 = vld [vmem:[#allocation3 + $0xb8] sm:$0xff] }
  0x34   :  { %151 = vmatpush.msra.mxu0 %v120_v15  ;;  %2476 = vmatpush.msra.mxu1 %v120_v15 }
  0x35   :  { %152 = vmatmul.f32.vlgmr.msra.gmra.mxu0 %v2937_v16  ;;  %2477 = vmatpush.msra.mxu2 %v120_v15 }
  0x36   :  { %2478 = vmatpush.msra.mxu3 %v120_v15  ;;  %176 = vmatmul.f32.vlgmr.msra.gmra.mxu1 %v2949_v20  ;;  %v348_v15 = vld [vmem:[#allocation8 + $0x18] sm:$0xff] }
  0x37   :  { %200 = vmatmul.f32.vlgmr.msra.gmra.mxu2 %v2951_v21  ;;  %377 = vmatpush.msrb.mxu1 %v375_v24  ;;  %v628_v24 = vld [vmem:[#allocation9 + $0xc8] sm:$0xff] }
  0x38   :  { %490 = vmatpush.msrb.mxu2 %v376_v22  ;;  %224 = vmatmul.f32.vlgmr.msra.gmra.mxu3 %v2957_v30  ;;  %v625_v22 = vld [vmem:[#allocation9 + $0xb0] sm:$0xff] }
  0x39   :  { %378 = vmatpush.msrb.mxu1 %v373_v25  ;;  %635 = vmatpush.msrb.mxu3 %v633_v39  ;;  %v113_v25 = vld [vmem:[#allocation3 + $0xe8] sm:$0xff]  ;;  %v617_v39 = vld [vmem:[#allocation9 + $0x70] sm:$0xff] }
  0x3a   :  { %491 = vmatpush.msrb.mxu2 %v374_v23  ;;  %748 = vmatpush.msrb.mxu0 %v634_v50  ;;  %v349_v23 = vld [vmem:[#allocation8 + $0x20] sm:$0xff]  ;;  %v609_v50 = vld [vmem:[#allocation9 + $0x30] sm:$0xff] }
  0x3b   :  { %379 = vmatpush.msrb.mxu1 %v371_v27  ;;  %636 = vmatpush.msrb.mxu3 %v631_v49  ;;  %v623_v27 = vld [vmem:[#allocation9 + $0xa0] sm:$0xff]  ;;  %v115_v49 = vld [vmem:[#allocation3 + $0xf8] sm:$0xff] }
  0x3c   :  { %492 = vmatpush.msrb.mxu2 %v372_v26  ;;  %749 = vmatpush.msrb.mxu0 %v632_v55  ;;  %v346_v26 = vld [vmem:[#allocation8 + $0x8] sm:$0xff] }
  0x3d   :  { %155 = vmatmul.f32.gmra.mxu0 %v2940_v17  ;;  %380 = vmatpush.msrb.mxu1 %v369_v34  ;;  %v345_v34 = vld [vmem:[#allocation8] sm:$0xff]  ;;  %v616_v55 = vld [vmem:[#allocation9 + $0x68] sm:$0xff] }
  0x3e   :  { %493 = vmatpush.msrb.mxu2 %v370_v29  ;;  %179 = vmatmul.f32.gmra.mxu1 %v2959_v31  ;;  %v347_v29 = vld [vmem:[#allocation8 + $0x10] sm:$0xff] }
  0x3f   :  { %203 = vmatmul.f32.gmra.mxu2 %v2961_v32  ;;  %381 = vmatpush.msrb.mxu1 %v367_v36  ;;  %v619_v36 = vld [vmem:[#allocation9 + $0x80] sm:$0xff] }
  0x40   :  { %494 = vmatpush.msrb.mxu2 %v368_v33  ;;  %227 = vmatmul.f32.gmra.mxu3 %v2967_v40  ;;  %v626_v33 = vld [vmem:[#allocation9 + $0xb8] sm:$0xff] }
  0x41   :  { %382 = vmatpush.msrb.mxu1 %v365_v38  ;;  %637 = vmatpush.msrb.mxu3 %v629_v53  ;;  %v114_v38 = vld [vmem:[#allocation3 + $0xf0] sm:$0xff] }
  0x42   :  { %495 = vmatpush.msrb.mxu2 %v366_v35  ;;  %750 = vmatpush.msrb.mxu0 %v630_v1  ;;  %v621_v35 = vld [vmem:[#allocation9 + $0x90] sm:$0xff]  ;;  %v604_v1 = vld [vmem:[#allocation9 + $0x8] sm:$0xff] }
  0x43   :  { %383 = vmatpush.msrb.mxu1 %v363_v45  ;;  %638 = vmatpush.msrb.mxu3 %v627_v0  ;;  %v615_v45 = vld [vmem:[#allocation9 + $0x60] sm:$0xff]  ;;  %v605_v53 = vld [vmem:[#allocation9 + $0x10] sm:$0xff]  ;;  %v606_v0 = vld [vmem:[#allocation9 + $0x18] sm:$0xff] }
  0x44   :  { %496 = vmatpush.msrb.mxu2 %v364_v37  ;;  %751 = vmatpush.msrb.mxu0 %v628_v24  ;;  %v624_v37 = vld [vmem:[#allocation9 + $0xa8] sm:$0xff] }
  0x45   :  { %158 = vmatmul.f32.gmra.mxu0 %v2943_v18  ;;  %384 = vmatpush.msrb.mxu1 %v361_v47  ;;  %v611_v47 = vld [vmem:[#allocation9 + $0x40] sm:$0xff] }
  0x46   :  { %497 = vmatpush.msrb.mxu2 %v362_v42  ;;  %182 = vmatmul.f32.gmra.mxu1 %v2971_v43  ;;  %v622_v42 = vld [vmem:[#allocation9 + $0x98] sm:$0xff] }
  0x47   :  { %206 = vmatmul.f32.gmra.mxu2 %v2973_v44  ;;  %385 = vmatpush.msrb.mxu1 %v359_v51  ;;  %v618_v51 = vld [vmem:[#allocation9 + $0x78] sm:$0xff] }
  0x48   :  { %498 = vmatpush.msrb.mxu2 %v360_v46  ;;  %230 = vmatmul.f32.gmra.mxu3 %v110_v54  ;;  %v613_v46 = vld [vmem:[#allocation9 + $0x50] sm:$0xff]  ;;  %v603_v54 = vld [vmem:[#allocation9] sm:$0xff] }
  0x49   :  { %386 = vmatpush.msrb.mxu1 %v357_v57  ;;  %639 = vmatpush.msrb.mxu3 %v625_v22  ;;  %v614_v57 = vld [vmem:[#allocation9 + $0x58] sm:$0xff] }
  0x4a   :  { %499 = vmatpush.msrb.mxu2 %v358_v48  ;;  %752 = vmatpush.msrb.mxu0 %v626_v33  ;;  %v620_v48 = vld [vmem:[#allocation9 + $0x88] sm:$0xff] }
  0x4b   :  { %387 = vmatpush.msrb.mxu1 %v355_v61  ;;  %640 = vmatpush.msrb.mxu3 %v623_v27  ;;  %v610_v61 = vld [vmem:[#allocation9 + $0x38] sm:$0xff] }
  0x4c   :  { %500 = vmatpush.msrb.mxu2 %v356_v52  ;;  %753 = vmatpush.msrb.mxu0 %v624_v37  ;;  %v607_v52 = vld [vmem:[#allocation9 + $0x20] sm:$0xff] }
  0x4d   :  { %161 = vmatmul.f32.gmra.mxu0 %v2946_v19  ;;  %388 = vmatpush.msrb.mxu1 %v353_v63  ;;  %v608_v63 = vld [vmem:[#allocation9 + $0x28] sm:$0xff] }
  0x4e   :  { %185 = vmatmul.f32.gmra.mxu1 %v2981_v58  ;;  %501 = vmatpush.msrb.mxu2 %v354_v60  ;;  %v612_v60 = vld [vmem:[#allocation9 + $0x48] sm:$0xff] }
  0x4f   :  { %209 = vmatmul.f32.gmra.mxu2 %v2983_v59  ;;  %389 = vmatpush.msrb.mxu1 %v351_v3 }
  0x50   :  { %502 = vmatpush.msrb.mxu2 %v352_v62  ;;  %233 = vmatmul.f32.gmra.mxu3 %v111_v4 }
  0x51   :  { %390 = vmatpush.msrb.mxu1 %v349_v23  ;;  %641 = vmatpush.msrb.mxu3 %v621_v35 }
  0x52   :  { %503 = vmatpush.msrb.mxu2 %v350_v2  ;;  %754 = vmatpush.msrb.mxu0 %v622_v42 }
  0x53   :  { %391 = vmatpush.msrb.mxu1 %v347_v29  ;;  %642 = vmatpush.msrb.mxu3 %v619_v36 }
  0x54   :  { %504 = vmatpush.msrb.mxu2 %v348_v15  ;;  %755 = vmatpush.msrb.mxu0 %v620_v48 }
  0x55   :  { %164 = vmatmul.f32.gmra.mxu0 %v2955_v28  ;;  %392 = vmatpush.msrb.mxu1 %v345_v34 }
  0x56   :  { %188 = vmatmul.f32.gmra.mxu1 %v2990_v6  ;;  %505 = vmatpush.msrb.mxu2 %v346_v26 }
  0x57   :  { %212 = vmatmul.f32.gmra.mxu2 %v2992_v7  ;;  %643 = vmatpush.msrb.mxu3 %v617_v39 }
  0x58   :  { %236 = vmatmul.f32.gmra.mxu3 %v112_v8  ;;  %756 = vmatpush.msrb.mxu0 %v618_v51 }
  0x59   :  { %644 = vmatpush.msrb.mxu3 %v615_v45 }
  0x5a   :  { %757 = vmatpush.msrb.mxu0 %v616_v55 }
  0x5b   :  { %645 = vmatpush.msrb.mxu3 %v613_v46 }
  0x5c   :  { %758 = vmatpush.msrb.mxu0 %v614_v57 }
  0x5d   :  { %167 = vmatmul.f32.gmra.mxu0 %v2969_v41  ;;  %646 = vmatpush.msrb.mxu3 %v611_v47 }
  0x5e   :  { %191 = vmatmul.f32.gmra.mxu1 %v2997_v9  ;;  %759 = vmatpush.msrb.mxu0 %v612_v60 }
  0x5f   :  { %215 = vmatmul.f32.gmra.mxu2 %v2999_v10  ;;  %647 = vmatpush.msrb.mxu3 %v609_v50 }
  0x60   :  { %239 = vmatmul.f32.gmra.mxu3 %v113_v25  ;;  %760 = vmatpush.msrb.mxu0 %v610_v61 }
  0x61   :  { %648 = vmatpush.msrb.mxu3 %v607_v52 }
  0x62   :  { %761 = vmatpush.msrb.mxu0 %v608_v63 }
  0x63   :  { %649 = vmatpush.msrb.mxu3 %v605_v53 }
  0x64   :  { %762 = vmatpush.msrb.mxu0 %v606_v0 }
  0x65   :  { %170 = vmatmul.f32.gmra.mxu0 %v2979_v56  ;;  %650 = vmatpush.msrb.mxu3 %v603_v54 }
  0x66   :  { %194 = vmatmul.f32.gmra.mxu1 %v3003_v11  ;;  %763 = vmatpush.msrb.mxu0 %v604_v1 }
  0x67   :  { %218 = vmatmul.f32.gmra.mxu2 %v3005_v12 }
  0x68   :  { %242 = vmatmul.f32.gmra.mxu3 %v114_v38 }
  0x6d   :  { %173 = vmatmul.f32.gmra.mxu0 %v2988_v5 }
  0x6e   :  { %197 = vmatmul.f32.gmra.mxu1 %v3009_v13 }
  0x6f   :  { %221 = vmatmul.f32.gmra.mxu2 %v3012_v14 }
  0x70   :  { %245 = vmatmul.f32.gmra.mxu3 %v115_v49 }
  0x75   :  { %764 = vmatmul.f32.vlgmr.msrb.gmra.mxu0 %v2937_v16 }
  0x78   :  { %651 = vmatmul.f32.vlgmr.msrb.gmra.mxu3 %v2937_v16 }
  0x7d   :  { %767 = vmatmul.f32.gmra.mxu0 %v2940_v17 }
  0x80   :  { %654 = vmatmul.f32.gmra.mxu3 %v2940_v17 }
  0x85   :  { %770 = vmatmul.f32.gmra.mxu0 %v2943_v18 }
  0x88   :  { %657 = vmatmul.f32.gmra.mxu3 %v2943_v18 }
  0x8d   :  { %773 = vmatmul.f32.gmra.mxu0 %v2946_v19 }
  0x90   :  { %660 = vmatmul.f32.gmra.mxu3 %v2946_v19 }
  0x95   :  { %776 = vmatmul.f32.gmra.mxu0 %v2955_v28 }
  0x98   :  { %663 = vmatmul.f32.gmra.mxu3 %v2955_v28 }
  0x9d   :  { %779 = vmatmul.f32.gmra.mxu0 %v2969_v41 }
  0xa0   :  { %666 = vmatmul.f32.gmra.mxu3 %v2969_v41 }
  0xa5   :  { %782 = vmatmul.f32.gmra.mxu0 %v2979_v56 }
  0xa8   :  { %669 = vmatmul.f32.gmra.mxu3 %v2979_v56 }
  0xad   :  { %785 = vmatmul.f32.gmra.mxu0 %v2988_v5 }
  0xb0   :  { %672 = vmatmul.f32.gmra.mxu3 %v2988_v5 }
  0xb2   :  { %v153_v62 = vpop.f32.mrf.mxu0 }
  0xb3   :  { %2488 = vtanh.f32 %v153_v62  ;;  %v177_v18 = vpop.f32.mrf.mxu1 }
  0xb5   :  { %788 = vmatmul.f32.gmra.mxu0 %v2949_v20 }
  0xb8   :  { %675 = vmatmul.f32.gmra.mxu3 %v2949_v20 }
  0xb9   :  { %v2489_v2 = vpop.eup %2488 }
  0xba   :  { %v156_v3 = vpop.f32.mrf.mxu0  ;;  %393 = vmatmul.f32.vlgmr.msrb.gmra.mxu1 %v2489_v2  ;;  %506 = vmatmul.f32.vlgmr.msrb.gmra.mxu2 %v2489_v2  ;;  %v3030_v29 = vpop.f32.mrf.mxu2 }
  0xbb   :  { %2490 = vtanh.f32 %v156_v3  ;;  %v180_v27 = vpop.f32.mrf.mxu1  ;;  %v3038_v35 = vpop.f32.mrf.mxu3 }
  0xbd   :  { %791 = vmatmul.f32.gmra.mxu0 %v2959_v31 }
  0xc0   :  { %678 = vmatmul.f32.gmra.mxu3 %v2959_v31 }
  0xc1   :  { %v2491_v4 = vpop.eup %2490 }
  0xc2   :  { %v159_v8 = vpop.f32.mrf.mxu0  ;;  %396 = vmatmul.f32.gmra.mxu1 %v2491_v4  ;;  %509 = vmatmul.f32.gmra.mxu2 %v2491_v4  ;;  %v3035_v56 = vpop.f32.mrf.mxu2 }
  0xc3   :  { %2492 = vtanh.f32 %v159_v8  ;;  %v183_v41 = vpop.f32.mrf.mxu1  ;;  %v3044_v38 = vpop.f32.mrf.mxu3 }
  0xc5   :  { %794 = vmatmul.f32.gmra.mxu0 %v2971_v43 }
  0xc8   :  { %681 = vmatmul.f32.gmra.mxu3 %v2971_v43 }
  0xc9   :  { %v2493_v15 = vpop.eup %2492 }
  0xca   :  { %v162_v22 = vpop.f32.mrf.mxu0  ;;  %399 = vmatmul.f32.gmra.mxu1 %v2493_v15  ;;  %512 = vmatmul.f32.gmra.mxu2 %v2493_v15  ;;  %v3041_v5 = vpop.f32.mrf.mxu2 }
  0xcb   :  { %2494 = vtanh.f32 %v162_v22  ;;  %v186_v36 = vpop.f32.mrf.mxu1  ;;  %v3051_v46 = vpop.f32.mrf.mxu3 }
  0xcd   :  { %797 = vmatmul.f32.gmra.mxu0 %v2981_v58 }
  0xd0   :  { %684 = vmatmul.f32.gmra.mxu3 %v2981_v58 }
  0xd1   :  { %v2495_v16 = vpop.eup %2494 }
  0xd2   :  { %v165_v23 = vpop.f32.mrf.mxu0  ;;  %402 = vmatmul.f32.gmra.mxu1 %v2495_v16  ;;  %515 = vmatmul.f32.gmra.mxu2 %v2495_v16  ;;  %v3048_v42 = vpop.f32.mrf.mxu2 }
  0xd3   :  { %2496 = vtanh.f32 %v165_v23  ;;  %v189_v39 = vpop.f32.mrf.mxu1  ;;  %v3057_v48 = vpop.f32.mrf.mxu3 }
  0xd5   :  { %800 = vmatmul.f32.gmra.mxu0 %v2990_v6 }
  0xd8   :  { %687 = vmatmul.f32.gmra.mxu3 %v2990_v6 }
  0xd9   :  { %v2497_v17 = vpop.eup %2496 }
  0xda   :  { %v168_v24 = vpop.f32.mrf.mxu0  ;;  %405 = vmatmul.f32.gmra.mxu1 %v2497_v17  ;;  %518 = vmatmul.f32.gmra.mxu2 %v2497_v17  ;;  %v3054_v47 = vpop.f32.mrf.mxu2 }
  0xdb   :  { %2498 = vtanh.f32 %v168_v24  ;;  %v192_v31 = vpop.f32.mrf.mxu1  ;;  %v3064_v51 = vpop.f32.mrf.mxu3 }
  0xdd   :  { %803 = vmatmul.f32.gmra.mxu0 %v2997_v9 }
  0xe0   :  { %690 = vmatmul.f32.gmra.mxu3 %v2997_v9 }
  0xe1   :  { %v2499_v25 = vpop.eup %2498 }
  0xe2   :  { %v171_v19 = vpop.f32.mrf.mxu0  ;;  %408 = vmatmul.f32.gmra.mxu1 %v2499_v25  ;;  %521 = vmatmul.f32.gmra.mxu2 %v2499_v25  ;;  %v3061_v58 = vpop.f32.mrf.mxu2 }
  0xe3   :  { %2500 = vtanh.f32 %v171_v19  ;;  %v195_v49 = vpop.f32.mrf.mxu1  ;;  %v3070_v54 = vpop.f32.mrf.mxu3 }
  0xe5   :  { %806 = vmatmul.f32.gmra.mxu0 %v3003_v11 }
  0xe8   :  { %693 = vmatmul.f32.gmra.mxu3 %v3003_v11 }
  0xe9   :  { %v2501_v26 = vpop.eup %2500 }
  0xea   :  { %v174_v28 = vpop.f32.mrf.mxu0  ;;  %411 = vmatmul.f32.gmra.mxu1 %v2501_v26  ;;  %524 = vmatmul.f32.gmra.mxu2 %v2501_v26  ;;  %v3067_v6 = vpop.f32.mrf.mxu2 }
  0xeb   :  { %2502 = vtanh.f32 %v174_v28  ;;  %v198_v52 = vpop.f32.mrf.mxu1  ;;  %v3078_v60 = vpop.f32.mrf.mxu3 }
  0xec   :  { %2504 = vtanh.f32 %v177_v18 }
  0xed   :  { %2506 = vtanh.f32 %v180_v27  ;;  %809 = vmatmul.f32.gmra.mxu0 %v3009_v13 }
  0xee   :  { %2508 = vtanh.f32 %v183_v41 }
  0xef   :  { %2510 = vtanh.f32 %v186_v36 }
  0xf0   :  { %2512 = vtanh.f32 %v189_v39  ;;  %696 = vmatmul.f32.gmra.mxu3 %v3009_v13 }
  0xf1   :  { %v2503_v33 = vpop.eup %2502  ;;  %2514 = vtanh.f32 %v192_v31 }
  0xf2   :  { %414 = vmatmul.f32.gmra.mxu1 %v2503_v33  ;;  %527 = vmatmul.f32.gmra.mxu2 %v2503_v33  ;;  %v2505_v34 = vpop.eup %2504  ;;  %2516 = vtanh.f32 %v195_v49  ;;  %v3075_v55 = vpop.f32.mrf.mxu2 }
  0xf3   :  { %v2507_v37 = vpop.eup %2506  ;;  %2518 = vtanh.f32 %v198_v52  ;;  %v3083_v0 = vpop.f32.mrf.mxu3 }
  0xf4   :  { %v2509_v20 = vpop.eup %2508  ;;  %2520 = vtanh.f32 %v3030_v29 }
  0xf5   :  { %v2511_v45 = vpop.eup %2510  ;;  %812 = vmatmul.f32.gmra.mxu0 %v2951_v21  ;;  %2522 = vtanh.f32 %v3035_v56 }
  0xf6   :  { %v2513_v43 = vpop.eup %2512  ;;  %2524 = vtanh.f32 %v3041_v5 }
  0xf7   :  { %v2515_v50 = vpop.eup %2514  ;;  %2526 = vtanh.f32 %v3048_v42 }
  0xf8   :  { %v2517_v53 = vpop.eup %2516  ;;  %699 = vmatmul.f32.gmra.mxu3 %v2951_v21  ;;  %2528 = vtanh.f32 %v3038_v35 }
  0xf9   :  { %v2519_v9 = vpop.eup %2518  ;;  %2530 = vtanh.f32 %v3054_v47 }
  0xfa   :  { %417 = vmatmul.f32.gmra.mxu1 %v2505_v34  ;;  %530 = vmatmul.f32.gmra.mxu2 %v2505_v34  ;;  %v2521_v11 = vpop.eup %2520 }
  0xfb   :  { %v2523_v63 = vpop.eup %2522  ;;  %v652_v17 = vpop.f32.mrf.mxu3 }
  0xfc   :  { %v2525_v16 = vpop.eup %2524 }
  0xfd   :  { %815 = vmatmul.f32.gmra.mxu0 %v2961_v32  ;;  %v2527_v34 = vpop.eup %2526 }
  0xfe   :  { %v3103_v39 = vpop.eup %2528 }
  0xff   :  { %v2531_v49 = vpop.eup %2530 }
 0x100   :  { %702 = vmatmul.f32.gmra.mxu3 %v2961_v32 }
 0x102   :  { %420 = vmatmul.f32.gmra.mxu1 %v2507_v37  ;;  %533 = vmatmul.f32.gmra.mxu2 %v2507_v37  ;;  %v765_v37 = vpop.f32.mrf.mxu0 }
 0x105   :  { %818 = vmatmul.f32.gmra.mxu0 %v2973_v44 }
 0x108   :  { %705 = vmatmul.f32.gmra.mxu3 %v2973_v44 }
 0x10a   :  { %423 = vmatmul.f32.gmra.mxu1 %v2509_v20  ;;  %536 = vmatmul.f32.gmra.mxu2 %v2509_v20 }
 0x10d   :  { %821 = vmatmul.f32.gmra.mxu0 %v2983_v59 }
 0x110   :  { %708 = vmatmul.f32.gmra.mxu3 %v2983_v59 }
 0x112   :  { %426 = vmatmul.f32.gmra.mxu1 %v2511_v45  ;;  %539 = vmatmul.f32.gmra.mxu2 %v2511_v45  ;;  %v655_v45 = vpop.f32.mrf.mxu3 }
 0x115   :  { %824 = vmatmul.f32.gmra.mxu0 %v2992_v7 }
 0x118   :  { %711 = vmatmul.f32.gmra.mxu3 %v2992_v7 }
 0x11a   :  { %429 = vmatmul.f32.gmra.mxu1 %v2513_v43  ;;  %542 = vmatmul.f32.gmra.mxu2 %v2513_v43 }
 0x11d   :  { %827 = vmatmul.f32.gmra.mxu0 %v2999_v10 }
 0x120   :  { %714 = vmatmul.f32.gmra.mxu3 %v2999_v10 }
 0x122   :  { %432 = vmatmul.f32.gmra.mxu1 %v2515_v50  ;;  %545 = vmatmul.f32.gmra.mxu2 %v2515_v50 }
 0x125   :  { %830 = vmatmul.f32.gmra.mxu0 %v3005_v12 }
 0x128   :  { %717 = vmatmul.f32.gmra.mxu3 %v3005_v12 }
 0x12a   :  { %435 = vmatmul.f32.gmra.mxu1 %v2517_v53  ;;  %548 = vmatmul.f32.gmra.mxu2 %v2517_v53 }
 0x12d   :  { %833 = vmatmul.f32.gmra.mxu0 %v3012_v14 }
 0x130   :  { %720 = vmatmul.f32.gmra.mxu3 %v3012_v14 }
 0x132   :  { %438 = vmatmul.f32.gmra.mxu1 %v2519_v9  ;;  %551 = vmatmul.f32.gmra.mxu2 %v2519_v9 }
 0x137   :  { %v394_v57 = vpop.f32.mrf.mxu1 }
 0x138   :  { %723 = vmatmul.f32.gmra.mxu3 %v2957_v30 }
 0x13a   :  { %441 = vmatmul.f32.gmra.mxu1 %v2521_v11  ;;  %554 = vmatmul.f32.gmra.mxu2 %v2521_v11 }
 0x13d   :  { %v507_v61 = vpop.f32.mrf.mxu2 }
 0x13f   :  { %v397_v13 = vpop.f32.mrf.mxu1 }
 0x140   :  { %v861_v62 = vmax.f32 %v394_v57, %v397_v13  ;;  %726 = vmatmul.f32.gmra.mxu3 %v2967_v40 }
 0x142   :  { %v862_v1 = vrot.slane %v861_v62, 4  ;;  %444 = vmatmul.f32.gmra.mxu1 %v2523_v63  ;;  %557 = vmatmul.f32.gmra.mxu2 %v2523_v63 }
 0x144   :  { %v863_v21 = vmax.f32 %v861_v62, %v862_v1 }
 0x145   :  { %v510_v2 = vpop.f32.mrf.mxu2 }
 0x146   :  { %v864_v3 = vrot.slane %v863_v21, 2  ;;  %v868_v4 = vmax.f32 %v507_v61, %v510_v2 }
 0x147   :  { %v3088_v8 = vpop.f32.mrf.mxu1 }
 0x148   :  { %v865_v15 = vmax.f32 %v863_v21, %v864_v3  ;;  %v869_v22 = vrot.slane %v868_v4, 4  ;;  %v768_v3 = vpop.f32.mrf.mxu0 }
 0x14a   :  { %v866_v23 = vrot.slane %v865_v15, 1  ;;  %v870_v32 = vmax.f32 %v868_v4, %v869_v22  ;;  %447 = vmatmul.f32.gmra.mxu1 %v2525_v16  ;;  %560 = vmatmul.f32.gmra.mxu2 %v2525_v16 }
 0x14c   :  { %v867_v24 = vmax.f32 %v865_v15, %v866_v23  ;;  %v871_v18 = vrot.slane %v870_v32, 2 }
 0x14d   :  { %v3092_v25 = vpop.f32.mrf.mxu2 }
 0x14e   :  { %v1085_v19 = vsub.f32 %v394_v57, %v867_v24  ;;  %v1087_v26 = vsub.f32 %v397_v13, %v867_v24  ;;  %v872_v28 = vmax.f32 %v870_v32, %v871_v18 }
 0x14f   :  { %v3096_v27 = vpop.f32.mrf.mxu1 }
 0x150   :  { %v1149_v44 = vmul.f32 1.442695, %v1085_v19  ;;  %v1153_v29 = vmul.f32 1.442695, %v1087_v26  ;;  %v873_v33 = vrot.slane %v872_v28, 1  ;;  %v875_v41 = vmax.f32 %v3088_v8, %v3096_v27  ;;  %v658_v19 = vpop.f32.mrf.mxu3 }
 0x152   :  { %2532 = vpow2.f32 %v1149_v44  ;;  %v874_v56 = vmax.f32 %v872_v28, %v873_v33  ;;  %v876_v36 = vrot.slane %v875_v41, 4  ;;  %450 = vmatmul.f32.gmra.mxu1 %v2527_v34  ;;  %563 = vmatmul.f32.gmra.mxu2 %v2527_v34 }
 0x153   :  { %2534 = vpow2.f32 %v1153_v29 }
 0x154   :  { %2536 = vtanh.f32 %v3044_v38  ;;  %v1086_v35 = vsub.f32 %v507_v61, %v874_v56  ;;  %v1088_v5 = vsub.f32 %v510_v2, %v874_v56  ;;  %v877_v20 = vmax.f32 %v875_v41, %v876_v36 }
 0x155   :  { %2538 = vtanh.f32 %v3051_v46  ;;  %v3106_v42 = vpop.f32.mrf.mxu2 }
 0x156   :  { %v1151_v59 = vmul.f32 1.442695, %v1086_v35  ;;  %v1155_v31 = vmul.f32 1.442695, %v1088_v5  ;;  %v878_v47 = vrot.slane %v877_v20, 2  ;;  %v882_v43 = vmax.f32 %v3092_v25, %v3106_v42 }
 0x157   :  { %2540 = vtanh.f32 %v3061_v58  ;;  %v3112_v38 = vpop.f32.mrf.mxu1 }
 0x158   :  { %v2533_v50 = vpop.eup %2532  ;;  %2542 = vpow2.f32 %v1151_v59  ;;  %v879_v52 = vmax.f32 %v877_v20, %v878_v47  ;;  %v883_v46 = vrot.slane %v882_v43, 4 }
 0x159   :  { %v2535_v53 = vpop.eup %2534  ;;  %2544 = vpow2.f32 %v1155_v31  ;;  %v1501_v9 = vmul.f32 %v2533_v50, %v652_v17 }
 0x15a   :  { %v3115_v57 = vpop.eup %2536  ;;  %v1277_v11 = vadd.f32 %v2535_v53, %v2533_v50  ;;  %v880_v61 = vrot.slane %v879_v52, 1  ;;  %v884_v13 = vmax.f32 %v882_v43, %v883_v46  ;;  %v1503_v62 = vmul.f32 %v2535_v53, %v655_v45  ;;  %453 = vmatmul.f32.gmra.mxu1 %v2531_v49  ;;  %566 = vmatmul.f32.gmra.mxu2 %v2531_v49  ;;  %v771_v46 = vpop.f32.mrf.mxu0 }
 0x15b   :  { %v3117_v58 = vpop.eup %2538  ;;  %2546 = vtanh.f32 %v3057_v48 }
 0x15c   :  { %v1278_v63 = vrot.slane %v1277_v11, 4  ;;  %v881_v1 = vmax.f32 %v879_v52, %v880_v61  ;;  %v885_v21 = vrot.slane %v884_v13, 2  ;;  %v1565_v2 = vadd.f32 %v1503_v62, %v1501_v9 }
 0x15d   :  { %v2541_v4 = vpop.eup %2540  ;;  %2548 = vtanh.f32 %v3067_v6  ;;  %v3121_v7 = vpop.f32.mrf.mxu2 }
 0x15e   :  { %v2543_v15 = vpop.eup %2542  ;;  %v1279_v22 = vadd.f32 %v1278_v63, %v1277_v11  ;;  %v1089_v16 = vsub.f32 %v3088_v8, %v881_v1  ;;  %v1091_v23 = vsub.f32 %v3096_v27, %v881_v1  ;;  %v886_v32 = vmax.f32 %v884_v13, %v885_v21  ;;  %v661_v1 = vpop.f32.mrf.mxu3 }
 0x15f   :  { %v2545_v48 = vpop.eup %2544  ;;  %2550 = vtanh.f32 %v3064_v51  ;;  %v1502_v17 = vmul.f32 %v2543_v15, %v765_v37  ;;  %v1566_v24 = vrot.slane %v1565_v2, 4  ;;  %v3127_v18 = vpop.f32.mrf.mxu1 }
 0x160   :  { %v1280_v6 = vrot.slane %v1279_v22, 2  ;;  %v1284_v26 = vadd.f32 %v2545_v48, %v2543_v15  ;;  %v1157_v28 = vmul.f32 1.442695, %v1089_v16  ;;  %v1161_v44 = vmul.f32 1.442695, %v1091_v23 }
 0x161   :  { %v3129_v29 = vpop.eup %2546  ;;  %v887_v8 = vrot.slane %v886_v32, 1  ;;  %v1567_v33 = vadd.f32 %v1566_v24, %v1565_v2  ;;  %v1504_v27 = vmul.f32 %v2545_v48, %v768_v3  ;;  %v889_v41 = vmax.f32 %v3112_v38, %v3127_v18  ;;  %v2269_v15 = vld [vmem:[%s4228_s4] sm:$0x3]  ;;  %s2888_s4 = smov [#allocation11]  }
 0x162   :  { %v1281_v51 = vadd.f32 %v1280_v6, %v1279_v22  ;;  %v1285_v34 = vrot.slane %v1284_v26, 4  ;;  %2552 = vpow2.f32 %v1157_v28  ;;  %456 = vmatmul.f32.gmra.mxu1 %v2541_v4  ;;  %569 = vmatmul.f32.gmra.mxu2 %v2541_v4  ;;  %v3165_v28 = vperm.slane %v2269_v15, 1  ;;  %s2414_s15 = sshll.u32 %s2888_s4, 4  ;;  %s2415_s15 = int_to_ptr.vmem [resolvable:$true] %s2414_s15 }
 0x163   :  { %v2549_v56 = vpop.eup %2548  ;;  %2554 = vpow2.f32 %v1161_v44  ;;  %v888_v36 = vmax.f32 %v886_v32, %v887_v8  ;;  %v1568_v37 = vrot.slane %v1567_v33, 2  ;;  %v1572_v35 = vadd.f32 %v1504_v27, %v1502_v17 }
 0x164   :  { %2556 = vtanh.f32 %v3075_v55  ;;  %v1282_v5 = vrot.slane %v1281_v51, 1  ;;  %v1286_v20 = vadd.f32 %v1285_v34, %v1284_v26  ;;  %v890_v45 = vrot.slane %v889_v41, 4 }
 0x165   :  { %v3135_v59 = vpop.eup %2550  ;;  %v1090_v31 = vsub.f32 %v3092_v25, %v888_v36  ;;  %v1092_v10 = vsub.f32 %v3106_v42, %v888_v36  ;;  %v1569_v47 = vadd.f32 %v1568_v37, %v1567_v33  ;;  %v1573_v43 = vrot.slane %v1572_v35, 4  ;;  %v3139_v49 = vpop.f32.mrf.mxu2 }
 0x166   :  { %2558 = vtanh.f32 %v3070_v54  ;;  %v3142_v50 = vadd.f32 %v1282_v5, %v1281_v51  ;;  %v1287_v52 = vrot.slane %v1286_v20, 2  ;;  %v896_v55 = vmax.f32 %v3121_v7, %v3139_v49 }
 0x167   :  { %v1159_v53 = vmul.f32 1.442695, %v1090_v31  ;;  %v1163_v9 = vmul.f32 1.442695, %v1092_v10  ;;  %v1574_v25 = vadd.f32 %v1573_v43, %v1572_v35  ;;  %v891_v11 = vmax.f32 %v889_v41, %v890_v45  ;;  %v3147_v42 = vpop.f32.mrf.mxu1  ;;  %v774_v45 = vpop.f32.mrf.mxu0 }
 0x168   :  { %v2553_v61 = vpop.eup %2552  ;;  %2560 = vrcp.f32 %v3142_v50  ;;  %v1288_v13 = vadd.f32 %v1287_v52, %v1286_v20  ;;  %v1570_v62 = vrot.slane %v1569_v47, 1  ;;  %v1798_v4 = vand.u32 2147483647, %v3142_v50 }
 0x169   :  { %v2555_v54 = vpop.eup %2554  ;;  %2562 = vpow2.f32 %v1159_v53  ;;  %v1575_v63 = vrot.slane %v1574_v25, 2  ;;  %v1800_v22 = vand.u32 2147483648, %v3142_v50  ;;  %v892_v23 = vrot.slane %v891_v11, 2 }
 0x16a   :  { %v2557_v21 = vpop.eup %2556  ;;  %v1289_v2 = vrot.slane %v1288_v13, 1  ;;  %v1291_v3 = vadd.f32 %v2555_v54, %v2553_v61  ;;  %2564 = vpow2.f32 %v1163_v9  ;;  %459 = vmatmul.f32.gmra.mxu1 %v2549_v56  ;;  %572 = vmatmul.f32.gmra.mxu2 %v2549_v56  ;;  %v1505_v32 = vmul.f32 %v2553_v61, %v658_v19 }
 0x16b   :  { %v3156_v16 = vadd.f32 %v1575_v63, %v1574_v25  ;;  %v897_v24 = vrot.slane %v896_v55, 4  ;;  %v1507_v6 = vmul.f32 %v2555_v54, %v661_v1  ;;  %2566 = vtanh.f32 %v3078_v60 }
 0x16c   :  { %v3158_v48 = vpop.eup %2558  ;;  %v3160_v12 = vadd.f32 %v1289_v2, %v1288_v13  ;;  %v1292_v17 = vrot.slane %v1291_v3, 4  ;;  %v3163_v26 = vperm.slane %v2269_v15, 0  ;;  %v893_v44 = vmax.f32 %v891_v11, %v892_v23 }
 0x16d   :  { %v3167_v8 = vpop.f32.mrf.mxu2  ;;  %v1571_v27 = vadd.f32 %v1570_v62, %v1569_v47  ;;  %vm1794_vm0 = vweird.f32 %v3142_v50  ;;  %vm3173_vm1 = vcmp.eq.f32.partialorder %v1798_v4, 8.507059e+37  ;;  %v1801_v34 = vor.u32 1.1754944e-38, %v1800_v22 }
 0x16e   :  { %v2561_v33 = vpop.eup %2560  ;;  %2568 = vrcp.f32 %v3160_v12  ;;  %v1293_v19 = vadd.f32 %v1292_v17, %v1291_v3  ;;  %v1577_v56 = vrot.slane %v3156_v16, 1  ;;  %v1812_v35 = vand.u32 2147483647, %v3160_v12 }
 0x16f   :  { %v2563_v41 = vpop.eup %2562  ;;  %v1790_v51 = vmul.f32 %v2561_v33, %v3142_v50  ;;  %v894_v5 = vrot.slane %v893_v44, 1  ;;  %v898_v20 = vmax.f32 %v896_v55, %v897_v24  ;;  %v3179_v31 = vpop.f32.mrf.mxu1  ;;  %vm1795_vm2 = vweird.f32 %v2561_v33 }
 0x170   :  { %v2565_v36 = vpop.eup %2564  ;;  %v1294_v37 = vrot.slane %v1293_v19, 2  ;;  %v3181_v47 = vmul.f32 %v2563_v41, %v771_v46  ;;  %v1579_v9 = vadd.f32 %v1507_v6, %v1505_v32  ;;  %vm1808_vm3 = vweird.f32 %v3160_v12  ;;  %vm1796_vm4 = vmor %vm1794_vm0, %vm1795_vm2 }
 0x171   :  { %v1298_v30 = vadd.f32 %v2565_v36, %v2563_v41  ;;  %v1791_v10 = vsub.f32 1.0, %v1790_v51  ;;  %v895_v52 = vmax.f32 %v893_v44, %v894_v5  ;;  %v899_v53 = vrot.slane %v898_v20, 2  ;;  %v3184_v25 = vpop.eup %2566 }
 0x172   :  { %v1295_v43 = vadd.f32 %v1294_v37, %v1293_v19  ;;  %462 = vmatmul.f32.gmra.mxu1 %v2557_v21  ;;  %575 = vmatmul.f32.gmra.mxu2 %v2557_v21  ;;  %v3187_v61 = vmul.f32 %v2565_v36, %v774_v45  ;;  %v3191_v46 = vmax.f32 %v3147_v42, %v3179_v31  ;;  %v1814_v3 = vand.u32 2147483648, %v3160_v12  ;;  %v664_v19 = vpop.f32.mrf.mxu3  ;;  %v2744_v36 = vld [vmem:[#allocation3 + $0xc0] sm:$0xff] }
 0x173   :  { %v1299_v11 = vrot.slane %v1298_v30, 4  ;;  %v1792_v55 = vmul.f32 %v2561_v33, %v1791_v10  ;;  %v1093_v54 = vsub.f32 %v3112_v38, %v895_v52  ;;  %v1095_v62 = vsub.f32 %v3127_v18, %v895_v52  ;;  %836 = vmatmul.f32.gmra.mxu0 %v2744_v36 }
 0x174   :  { %v2569_v13 = vpop.eup %2568  ;;  %v1296_v14 = vrot.slane %v1295_v43, 1  ;;  %v900_v63 = vmax.f32 %v898_v20, %v899_v53  ;;  %v1580_v24 = vrot.slane %v1579_v9, 4  ;;  %vm1813_vm7 = vcmp.eq.f32.partialorder %v1812_v35, 8.507059e+37 }
 0x175   :  { %v1300_v1 = vadd.f32 %v1299_v11, %v1298_v30  ;;  %v1793_v21 = vadd.f32 %v2561_v33, %v1792_v55  ;;  %v1804_v2 = vmul.f32 %v2569_v13, %v3160_v12  ;;  %v3197_v4 = vpop.f32.mrf.mxu2  ;;  %v1165_v22 = vmul.f32 1.442695, %v1093_v54 }
 0x176   :  { %v3199_v15 = vadd.f32 %v1296_v14, %v1295_v43  ;;  %v1169_v23 = vmul.f32 1.442695, %v1095_v62  ;;  %v901_v38 = vrot.slane %v900_v63, 1  ;;  %vm1809_vm5 = vweird.f32 %v2569_v13 }
 0x177   :  { %v1301_v18 = vrot.slane %v1300_v1, 2  ;;  %v1797_v32 = vsel %vm1796_vm4, %v2561_v33, %v1793_v21  ;;  %v1805_v17 = vsub.f32 1.0, %v1804_v2  ;;  %v1581_v37 = vadd.f32 %v1580_v24, %v1579_v9  ;;  %vm1810_vm6 = vmor %vm1808_vm3, %vm1809_vm5  ;;  %v3219_v30 = vpop.f32.mrf.mxu1  ;;  %v3231_v9 = vld [vmem:[#allocation3 + $0xd0] sm:$0xff]  ;;  %v2746_v2 = vld [vmem:[#allocation3 + $0xc8] sm:$0xff] }
 0x178   :  { %2570 = vrcp.f32 %v3199_v15  ;;  %v1802_v6 = vsel %vm3173_vm1, %v1801_v34, %v1797_v32  ;;  %v902_v44 = vmax.f32 %v900_v63, %v901_v38  ;;  %v1578_v34 = vadd.f32 %v1577_v56, %v3156_v16  ;;  %729 = vmatmul.f32.gmra.mxu3 %v3231_v9 }
 0x179   :  { %v1302_v41 = vadd.f32 %v1301_v18, %v1300_v1  ;;  %v2237_v50 = vmul.f32 %v1802_v6, %v1571_v27  ;;  %v1806_v51 = vmul.f32 %v2569_v13, %v1805_v17  ;;  %2572 = vpow2.f32 %v1165_v22 }
 0x17a   :  { %2574 = vpow2.f32 %v1169_v23  ;;  %v1094_v40 = vsub.f32 %v3121_v7, %v902_v44  ;;  %v1096_v33 = vsub.f32 %v3139_v49, %v902_v44  ;;  %465 = vmatmul.f32.gmra.mxu1 %v3103_v39  ;;  %578 = vmatmul.f32.gmra.mxu2 %v3103_v39  ;;  %v1826_v5 = vand.u32 2147483647, %v3199_v15  ;;  %v667_v18 = vpop.f32.mrf.mxu3 }
 0x17b   :  { %v1303_v60 = vrot.slane %v1302_v41, 1  ;;  %v1807_v27 = vadd.f32 %v2569_v13, %v1806_v51  ;;  %v1815_v7 = vor.u32 1.1754944e-38, %v1814_v3  ;;  %v1582_v45 = vrot.slane %v1581_v37, 2  ;;  %839 = vmatmul.f32.gmra.mxu0 %v2746_v2  ;;  %v777_v51 = vpop.f32.mrf.mxu0 }
 0x17c   :  { %v1167_v20 = vmul.f32 1.442695, %v1094_v40  ;;  %v1171_v49 = vmul.f32 1.442695, %v1096_v33  ;;  %v1828_v16 = vand.u32 2147483648, %v3199_v15  ;;  %vm1822_vm8 = vweird.f32 %v3199_v15 }
 0x17d   :  { %v3221_v10 = vadd.f32 %v1303_v60, %v1302_v41  ;;  %v1811_v39 = vsel %vm1810_vm6, %v2569_v13, %v1807_v27  ;;  %v3226_v56 = vpop.f32.mrf.mxu2  ;;  %v1583_v53 = vadd.f32 %v1582_v45, %v1581_v37  ;;  %v3236_v12 = vadd.f32 %v3163_v26, %v2237_v50 }
 0x17e   :  { %v3228_v43 = vpop.eup %2570  ;;  %v1816_v52 = vsel %vm1813_vm7, %v1815_v7, %v1811_v39  ;;  %2576 = vpow2.f32 %v1167_v20  ;;  %vm3242_vm9 = vcmp.eq.f32.partialorder %v1826_v5, 8.507059e+37  ;;  %v1586_v62 = vadd.f32 %v3187_v61, %v3181_v47  ;;  %v2747_v20 = vld [vmem:[#allocation3 + $0xd8] sm:$0xff] }
 0x17f   :  { %v2573_v11 = vpop.eup %2572  ;;  %2578 = vrcp.f32 %v3221_v10  ;;  %v3238_v35 = vmul.f32 %v1816_v52, %v1578_v34  ;;  %v1818_v55 = vmul.f32 %v3228_v43, %v3199_v15  ;;  %v1584_v14 = vrot.slane %v1583_v53, 1  ;;  %v3275_v5 = vpop.f32.mrf.mxu1 }
 0x180   :  { %v2575_v13 = vpop.eup %2574  ;;  %2580 = vpow2.f32 %v1171_v49  ;;  %vm1823_vm10 = vweird.f32 %v3228_v43  ;;  %v1829_v21 = vor.u32 1.1754944e-38, %v1828_v16  ;;  %v1587_v3 = vrot.slane %v1586_v62, 4  ;;  %732 = vmatmul.f32.gmra.mxu3 %v2747_v20 }
 0x181   :  { %v1305_v63 = vadd.f32 %v2575_v13, %v2573_v11  ;;  %v1819_v1 = vsub.f32 1.0, %v1818_v55  ;;  %v1840_v22 = vand.u32 2147483647, %v3221_v10  ;;  %v1842_v23 = vand.u32 2147483648, %v3221_v10  ;;  %vm1824_vm13 = vmor %vm1822_vm8, %vm1823_vm10 }
 0x182   :  { %v904_v38 = vrot.slane %v3191_v46, 4  ;;  %468 = vmatmul.f32.gmra.mxu1 %v3115_v57  ;;  %581 = vmatmul.f32.gmra.mxu2 %v3115_v57  ;;  %v1585_v61 = vadd.f32 %v1584_v14, %v1583_v53  ;;  %v1509_v17 = vmul.f32 %v2573_v11, %v664_v19  ;;  %v1588_v6 = vadd.f32 %v1587_v3, %v1586_v62 }
 0x183   :  { %v1306_v47 = vrot.slane %v1305_v63, 4  ;;  %v1820_v32 = vmul.f32 %v3228_v43, %v1819_v1  ;;  %vm1836_vm12 = vweird.f32 %v3221_v10  ;;  %v3256_v44 = vor.u32 1.1754944e-38, %v1842_v23  ;;  %842 = vmatmul.f32.gmra.mxu0 %v3231_v9 }
 0x184   :  { %v2577_v24 = vpop.eup %2576  ;;  %v905_v41 = vmax.f32 %v3191_v46, %v904_v38  ;;  %v910_v50 = vmax.f32 %v3167_v8, %v3197_v4  ;;  %v1511_v19 = vmul.f32 %v2575_v13, %v667_v18  ;;  %v1589_v60 = vrot.slane %v1588_v6, 2 }
 0x185   :  { %v2579_v36 = vpop.eup %2578  ;;  %v1307_v57 = vadd.f32 %v1306_v47, %v1305_v63  ;;  %v1821_v40 = vadd.f32 %v3228_v43, %v1820_v32  ;;  %v3262_v33 = vmul.f32 %v2577_v24, %v777_v51  ;;  %vm3271_vm15 = vcmp.eq.f32.partialorder %v1840_v22, 8.507059e+37  ;;  %v3277_v7 = vpop.f32.mrf.mxu2  ;;  %v2748_v51 = vld [vmem:[#allocation3 + $0xe0] sm:$0xff] }
 0x186   :  { %v3264_v37 = vpop.eup %2580  ;;  %v1832_v46 = vmul.f32 %v2579_v36, %v3221_v10  ;;  %vm1837_vm14 = vweird.f32 %v2579_v36  ;;  %v906_v27 = vrot.slane %v905_v41, 2  ;;  %v911_v39 = vrot.slane %v910_v50, 4 }
 0x187   :  { %v1308_v49 = vrot.slane %v1307_v57, 2  ;;  %v1312_v45 = vadd.f32 %v3264_v37, %v2577_v24  ;;  %v1825_v15 = vsel %vm1824_vm13, %v3228_v43, %v1821_v40  ;;  %v1590_v52 = vadd.f32 %v1589_v60, %v1588_v6  ;;  %vm1838_vm0 = vmor %vm1836_vm12, %vm1837_vm14 }
 0x188   :  { %v1830_v16 = vsel %vm3242_vm9, %v1829_v21, %v1825_v15  ;;  %v1833_v53 = vsub.f32 1.0, %v1832_v46  ;;  %v907_v11 = vmax.f32 %v905_v41, %v906_v27  ;;  %v912_v62 = vmax.f32 %v910_v50, %v911_v39  ;;  %v670_v50 = vpop.f32.mrf.mxu3  ;;  %735 = vmatmul.f32.gmra.mxu3 %v2748_v51 }
 0x189   :  { %v1309_v55 = vadd.f32 %v1308_v49, %v1307_v57  ;;  %v1313_v13 = vrot.slane %v1312_v45, 4  ;;  %v2239_v14 = vmul.f32 %v1830_v16, %v1585_v61  ;;  %v1591_v63 = vrot.slane %v1590_v52, 1 }
 0x18a   :  { %v1834_v1 = vmul.f32 %v2579_v36, %v1833_v53  ;;  %v908_v2 = vrot.slane %v907_v11, 1  ;;  %v1593_v3 = vadd.f32 %v1511_v19, %v1509_v17  ;;  %471 = vmatmul.f32.gmra.mxu1 %v3117_v58  ;;  %584 = vmatmul.f32.gmra.mxu2 %v3117_v58  ;;  %v913_v22 = vrot.slane %v912_v62, 2 }
 0x18b   :  { %v1310_v43 = vrot.slane %v1309_v55, 1  ;;  %v1314_v54 = vadd.f32 %v1313_v13, %v1312_v45  ;;  %v2277_v21 = vadd.f32 %v3163_v26, %v2239_v14  ;;  %v1592_v23 = vadd.f32 %v1591_v63, %v1590_v52  ;;  %845 = vmatmul.f32.gmra.mxu0 %v2747_v20 }
 0x18c   :  { %v1835_v38 = vadd.f32 %v2579_v36, %v1834_v1  ;;  %v909_v18 = vmax.f32 %v907_v11, %v908_v2  ;;  %v1594_v47 = vrot.slane %v1593_v3, 4  ;;  %v914_v17 = vmax.f32 %v912_v62, %v913_v22 }
 0x18d   :  { %v3287_v61 = vadd.f32 %v1310_v43, %v1309_v55  ;;  %v1315_v9 = vrot.slane %v1314_v54, 2  ;;  %v2339_v32 = vrot.slane %v2277_v21, 7  ;;  %v3304_v46 = vpop.f32.mrf.mxu2  ;;  %v2276_v20 = vadd.f32 %v3165_v28, %v3238_v35 }
 0x18e   :  { %v1839_v24 = vsel %vm1838_vm0, %v2579_v36, %v1835_v38  ;;  %v1097_v58 = vsub.f32 %v3147_v42, %v909_v18  ;;  %v1099_v6 = vsub.f32 %v3179_v31, %v909_v18  ;;  %v1595_v41 = vadd.f32 %v1594_v47, %v1593_v3  ;;  %v3302_v31 = vpop.f32.mrf.mxu1 }
 0x18f   :  { %2582 = vrcp.f32 %v3287_v61  ;;  %v1316_v57 = vadd.f32 %v1315_v9, %v1314_v54  ;;  %v3297_v40 = vsel %vm2340_vm11, %v2339_v32, %v3236_v12  ;;  %v1844_v10 = vsel %vm3271_vm15, %v3256_v44, %v1839_v24  ;;  %v780_v44 = vpop.f32.mrf.mxu0 }
 0x190   :  { %v2240_v36 = vmul.f32 %v1844_v10, %v1592_v23  ;;  %v1173_v19 = vmul.f32 1.442695, %v1097_v58  ;;  %v1177_v42 = vmul.f32 1.442695, %v1099_v6  ;;  %v915_v60 = vrot.slane %v914_v17, 1  ;;  %v673_v22 = vpop.f32.mrf.mxu3 }
 0x191   :  { %2584 = vtanh.f32 %v3083_v0  ;;  %v1317_v27 = vrot.slane %v1316_v57, 1  ;;  %v1596_v49 = vrot.slane %v1595_v41, 2  ;;  %v1854_v34 = vand.u32 2147483647, %v3287_v61 }
 0x192   :  { %v2278_v12 = vadd.f32 %v3165_v28, %v2240_v36  ;;  %2586 = vpow2.f32 %v1173_v19  ;;  %v916_v45 = vmax.f32 %v914_v17, %v915_v60  ;;  %474 = vmatmul.f32.gmra.mxu1 %v3129_v29  ;;  %587 = vmatmul.f32.gmra.mxu2 %v3129_v29  ;;  %v1856_v0 = vand.u32 2147483648, %v3287_v61 }
 0x193   :  { %v3311_v15 = vadd.f32 %v1317_v27, %v1316_v57  ;;  %2588 = vpow2.f32 %v1177_v42  ;;  %v1597_v39 = vadd.f32 %v1596_v49, %v1595_v41  ;;  %vm1850_vm1 = vweird.f32 %v3287_v61  ;;  %848 = vmatmul.f32.gmra.mxu0 %v2748_v51 }
 0x194   :  { %v2360_v16 = vrot.slane %v2278_v12, 7  ;;  %v1098_v52 = vsub.f32 %v3167_v8, %v916_v45  ;;  %v1100_v53 = vsub.f32 %v3197_v4, %v916_v45  ;;  %v1512_v29 = vmul.f32 %v3264_v37, %v780_v44  ;;  %v3332_v4 = vld [vmem:[#allocation3 + $0xe8] sm:$0xff] }
 0x195   :  { %v3318_v11 = vpop.eup %2582  ;;  %2590 = vrcp.f32 %v3311_v15  ;;  %v1598_v55 = vrot.slane %v1597_v39, 1  ;;  %vm3328_vm2 = vcmp.eq.f32.partialorder %v1854_v34, 8.507059e+37  ;;  %738 = vmatmul.f32.gmra.mxu3 %v3332_v4  ;;  %v1857_v37 = vor.u32 1.1754944e-38, %v1856_v0  ;;  %v3347_v24 = vpop.f32.mrf.mxu2 }
 0x196   :  { %v3324_v13 = vsel %vm2340_vm11, %v2360_v16, %v2276_v20  ;;  %v1175_v14 = vmul.f32 1.442695, %v1098_v52  ;;  %v1179_v62 = vmul.f32 1.442695, %v1100_v53  ;;  %v1846_v35 = vmul.f32 %v3318_v11, %v3287_v61  ;;  %v3345_v17 = vpop.f32.mrf.mxu1 }
 0x197   :  { %v3335_v63 = vpop.eup %2584  ;;  %v1599_v1 = vadd.f32 %v1598_v55, %v1597_v39  ;;  %vm1851_vm3 = vweird.f32 %v3318_v11  ;;  %v1600_v2 = vadd.f32 %v1512_v29, %v3262_v33  ;;  %v1868_v54 = vand.u32 2147483647, %v3311_v15  ;;  %v2750_v39 = vld [vmem:[#allocation3 + $0xf0] sm:$0xff]  ;;  %v783_v53 = vpop.f32.mrf.mxu0 }
 0x198   :  { %v2587_v3 = vpop.eup %2586  ;;  %2592 = vpow2.f32 %v1175_v14  ;;  %v1847_v43 = vsub.f32 1.0, %v1846_v35  ;;  %v1870_v21 = vand.u32 2147483648, %v3311_v15  ;;  %v917_v18 = vmax.f32 %v3219_v30, %v3275_v5  ;;  %vm1852_vm8 = vmor %vm1850_vm1, %vm1851_vm3 }
 0x199   :  { %v2589_v23 = vpop.eup %2588  ;;  %2594 = vpow2.f32 %v1179_v62  ;;  %v1601_v38 = vrot.slane %v1600_v2, 4  ;;  %v1513_v47 = vmul.f32 %v2587_v3, %v670_v50  ;;  %vm1864_vm4 = vweird.f32 %v3311_v15 }
 0x19a   :  { %v1319_v9 = vadd.f32 %v2589_v23, %v2587_v3  ;;  %v1848_v32 = vmul.f32 %v3318_v11, %v1847_v43  ;;  %v1871_v33 = vor.u32 1.1754944e-38, %v1870_v21  ;;  %477 = vmatmul.f32.gmra.mxu1 %v3135_v59  ;;  %590 = vmatmul.f32.gmra.mxu2 %v3135_v59  ;;  %vm2343_vm5 = vcmask 1042434  }
 0x19b   :  { %v2591_v58 = vpop.eup %2590  ;;  %v1602_v6 = vadd.f32 %v1601_v38, %v1600_v2  ;;  %v918_v41 = vrot.slane %v917_v18, 4  ;;  %v924_v50 = vmax.f32 %v3226_v56, %v3277_v7  ;;  %v1515_v51 = vmul.f32 %v2589_v23, %v673_v22  ;;  %851 = vmatmul.f32.gmra.mxu0 %v3332_v4 }
 0x19c   :  { %v1320_v57 = vrot.slane %v1319_v9, 4  ;;  %v1849_v10 = vadd.f32 %v3318_v11, %v1848_v32  ;;  %v1860_v36 = vmul.f32 %v2591_v58, %v3311_v15  ;;  %vm1865_vm6 = vweird.f32 %v2591_v58 }
 0x19d   :  { %vm3355_vm7 = vcmp.eq.f32.partialorder %v1868_v54, 8.507059e+37  ;;  %v1603_v59 = vrot.slane %v1602_v6, 2  ;;  %v919_v42 = vmax.f32 %v917_v18, %v918_v41  ;;  %v925_v60 = vrot.slane %v924_v50, 4  ;;  %741 = vmatmul.f32.gmra.mxu3 %v2750_v39  ;;  %vm1866_vm9 = vmor %vm1864_vm4, %vm1865_vm6  ;;  %v3384_v32 = vpop.f32.mrf.mxu2 }
 0x19e   :  { %v1607_v27 = vadd.f32 %v1515_v51, %v1513_v47  ;;  %v2593_v49 = vpop.eup %2592  ;;  %v1321_v12 = vadd.f32 %v1320_v57, %v1319_v9  ;;  %v1853_v45 = vsel %vm1852_vm8, %v3318_v11, %v1849_v10  ;;  %v1861_v34 = vsub.f32 1.0, %v1860_v36  ;;  %v3382_v9 = vpop.f32.mrf.mxu1 }
 0x19f   :  { %v3366_v44 = vmax.f32 %v3302_v31, %v3345_v17  ;;  %v3368_v0 = vpop.eup %2594  ;;  %v1858_v61 = vsel %vm3328_vm2, %v1857_v37, %v1853_v45  ;;  %v1604_v20 = vadd.f32 %v1603_v59, %v1602_v6  ;;  %v920_v16 = vrot.slane %v919_v42, 2  ;;  %v676_v36 = vpop.f32.mrf.mxu3 }
 0x1a0   :  { %v926_v52 = vmax.f32 %v924_v50, %v925_v60  ;;  %v1322_v55 = vrot.slane %v1321_v12, 2  ;;  %v1326_v29 = vadd.f32 %v3368_v0, %v2593_v49  ;;  %v2241_v11 = vmul.f32 %v1858_v61, %v1599_v1 }
 0x1a1   :  { %v1862_v14 = vmul.f32 %v2591_v58, %v1861_v34  ;;  %v1605_v62 = vrot.slane %v1604_v20, 1  ;;  %v921_v35 = vmax.f32 %v919_v42, %v920_v16  ;;  %v3373_v3 = vmul.f32 %v2593_v49, %v783_v53  ;;  %v786_v34 = vpop.f32.mrf.mxu0 }
 0x1a2   :  { %v927_v2 = vrot.slane %v926_v52, 2  ;;  %v1323_v43 = vadd.f32 %v1322_v55, %v1321_v12  ;;  %v1327_v54 = vrot.slane %v1326_v29, 4  ;;  %v2279_v8 = vadd.f32 %v3163_v26, %v2241_v11  ;;  %480 = vmatmul.f32.gmra.mxu1 %v3158_v48  ;;  %593 = vmatmul.f32.gmra.mxu2 %v3158_v48 }
 0x1a3   :  { %v1863_v37 = vadd.f32 %v2591_v58, %v1862_v14  ;;  %v1606_v21 = vadd.f32 %v1605_v62, %v1604_v20  ;;  %v922_v1 = vrot.slane %v921_v35, 1  ;;  %v1608_v23 = vrot.slane %v1607_v27, 4  ;;  %854 = vmatmul.f32.gmra.mxu0 %v2750_v39 }
 0x1a4   :  { %v928_v22 = vmax.f32 %v926_v52, %v927_v2  ;;  %v1324_v38 = vrot.slane %v1323_v43, 1  ;;  %v1328_v18 = vadd.f32 %v1327_v54, %v1326_v29  ;;  %v2342_v4 = vrot.slane %v2279_v8, 6 }
 0x1a5   :  { %v1867_v47 = vsel %vm1866_vm9, %v2591_v58, %v1863_v37  ;;  %v923_v48 = vmax.f32 %v921_v35, %v922_v1  ;;  %v1609_v50 = vadd.f32 %v1608_v23, %v1607_v27  ;;  %v2751_v58 = vld [vmem:[#allocation3 + $0xf8] sm:$0xff]  ;;  %v3415_v11 = vpop.f32.mrf.mxu2  ;;  %v932_v54 = vrot.slane %v3366_v44, 4 }
 0x1a6   :  { %v1872_v6 = vsel %vm3355_vm7, %v1871_v33, %v1867_v47  ;;  %v929_v41 = vrot.slane %v928_v22, 1  ;;  %v3388_v51 = vadd.f32 %v1324_v38, %v1323_v43  ;;  %v1329_v15 = vrot.slane %v1328_v18, 2  ;;  %744 = vmatmul.f32.gmra.mxu3 %v2751_v58  ;;  %v3413_v29 = vpop.f32.mrf.mxu1 }
 0x1a7   :  { %v3392_v57 = vsel %vm2343_vm5, %v2342_v4, %v3297_v40  ;;  %v2242_v10 = vmul.f32 %v1872_v6, %v1606_v21  ;;  %v1101_v59 = vsub.f32 %v3219_v30, %v923_v48  ;;  %v1103_v42 = vsub.f32 %v3275_v5, %v923_v48  ;;  %v679_v8 = vpop.f32.mrf.mxu3 }
 0x1a8   :  { %v930_v19 = vmax.f32 %v928_v22, %v929_v41  ;;  %v1610_v33 = vrot.slane %v1609_v50, 2  ;;  %2596 = vrcp.f32 %v3388_v51  ;;  %v1330_v60 = vadd.f32 %v1329_v15, %v1328_v18 }
 0x1a9   :  { %v2280_v27 = vadd.f32 %v3165_v28, %v2242_v10  ;;  %v1181_v49 = vmul.f32 1.442695, %v1101_v59  ;;  %v1185_v12 = vmul.f32 1.442695, %v1103_v42  ;;  %v1882_v5 = vand.u32 2147483647, %v3388_v51 }
 0x1aa   :  { %v1102_v40 = vsub.f32 %v3226_v56, %v930_v19  ;;  %v1104_v45 = vsub.f32 %v3277_v7, %v930_v19  ;;  %v1331_v61 = vrot.slane %v1330_v60, 1  ;;  %v1611_v30 = vadd.f32 %v1610_v33, %v1609_v50  ;;  %483 = vmatmul.f32.gmra.mxu1 %v3184_v25  ;;  %596 = vmatmul.f32.gmra.mxu2 %v3184_v25  ;;  %v789_v50 = vpop.f32.mrf.mxu0 }
 0x1ab   :  { %v2362_v20 = vrot.slane %v2280_v27, 6  ;;  %2598 = vpow2.f32 %v1181_v49  ;;  %v1884_v53 = vand.u32 2147483648, %v3388_v51  ;;  %vm1878_vm10 = vweird.f32 %v3388_v51  ;;  %857 = vmatmul.f32.gmra.mxu0 %v2751_v58 }
 0x1ac   :  { %v1183_v16 = vmul.f32 1.442695, %v1102_v40  ;;  %v1187_v52 = vmul.f32 1.442695, %v1104_v45  ;;  %v3404_v55 = vadd.f32 %v1331_v61, %v1330_v60  ;;  %2600 = vpow2.f32 %v1185_v12 }
 0x1ad   :  { %v3408_v56 = vsel %vm2343_vm5, %v2362_v20, %v3324_v13  ;;  %v1612_v7 = vrot.slane %v1611_v30, 1  ;;  %v1516_v25 = vmul.f32 %v3368_v0, %v786_v34  ;;  %vm3418_vm12 = vcmp.eq.f32.partialorder %v1882_v5, 8.507059e+37 }
 0x1ae   :  { %2602 = vpow2.f32 %v1183_v16  ;;  %v2597_v39 = vpop.eup %2596  ;;  %v1885_v35 = vor.u32 1.1754944e-38, %v1884_v53  ;;  %v1898_v43 = vand.u32 2147483648, %v3404_v55  ;;  %v938_v0 = vmax.f32 %v3304_v46, %v3347_v24 }
 0x1af   :  { %2604 = vrcp.f32 %v3404_v55  ;;  %v1613_v14 = vadd.f32 %v1612_v7, %v1611_v30  ;;  %v1874_v62 = vmul.f32 %v2597_v39, %v3388_v51  ;;  %v1614_v2 = vadd.f32 %v1516_v25, %v3373_v3 }
 0x1b0   :  { %2606 = vpow2.f32 %v1187_v52  ;;  %v1896_v1 = vand.u32 2147483647, %v3404_v55  ;;  %v3430_v22 = vmax.f32 %v3382_v9, %v3413_v29  ;;  %v3434_v23 = vmax.f32 %v3384_v32, %v3415_v11 }
 0x1b1   :  { %v2599_v37 = vpop.eup %2598  ;;  %v1875_v21 = vsub.f32 1.0, %v1874_v62  ;;  %vm1879_vm13 = vweird.f32 %v2597_v39  ;;  %v1615_v38 = vrot.slane %v1614_v2, 4  ;;  %v933_v18 = vmax.f32 %v3366_v44, %v932_v54 }
 0x1b2   :  { %v2601_v3 = vpop.eup %2600  ;;  %v1517_v4 = vmul.f32 %v2599_v37, %v676_v36  ;;  %486 = vmatmul.f32.gmra.mxu1 %v3335_v63  ;;  %599 = vmatmul.f32.gmra.mxu2 %v3335_v63  ;;  %vm1892_vm14 = vweird.f32 %v3404_v55  ;;  %v939_v41 = vrot.slane %v938_v0, 4  ;;  %vm2346_vm15 = vcmask 1043459   ;;  %vm1880_vm2 = vmor %vm1878_vm10, %vm1879_vm13 }
 0x1b3   :  { %v1333_v6 = vadd.f32 %v2601_v3, %v2599_v37  ;;  %v1876_v48 = vmul.f32 %v2597_v39, %v1875_v21  ;;  %v1519_v15 = vmul.f32 %v2601_v3, %v679_v8  ;;  %v1616_v58 = vadd.f32 %v1615_v38, %v1614_v2 }
 0x1b4   :  { %v2603_v47 = vpop.eup %2602  ;;  %v1899_v59 = vor.u32 1.1754944e-38, %v1898_v43  ;;  %v934_v42 = vrot.slane %v933_v18, 2  ;;  %vm3445_vm1 = vcmp.eq.f32.partialorder %v1896_v1, 8.507059e+37  ;;  %v940_v40 = vmax.f32 %v938_v0, %v939_v41 }
 0x1b5   :  { %v2605_v10 = vpop.eup %2604  ;;  %v3440_v19 = vmul.f32 %v2603_v47, %v789_v50  ;;  %v1334_v36 = vrot.slane %v1333_v6, 4  ;;  %v1877_v33 = vadd.f32 %v2597_v39, %v1876_v48  ;;  %v1617_v49 = vrot.slane %v1616_v58, 2  ;;  %v792_v50 = vpop.f32.mrf.mxu0 }
 0x1b6   :  { %v3442_v44 = vpop.eup %2606  ;;  %v1888_v63 = vmul.f32 %v2605_v10, %v3404_v55  ;;  %vm1893_vm0 = vweird.f32 %v2605_v10  ;;  %v935_v12 = vmax.f32 %v933_v18, %v934_v42  ;;  %v1621_v20 = vadd.f32 %v1519_v15, %v1517_v4  ;;  %v682_v4 = vpop.f32.mrf.mxu3 }
 0x1b7   :  { %v1340_v27 = vadd.f32 %v3442_v44, %v2603_v47  ;;  %v1335_v45 = vadd.f32 %v1334_v36, %v1333_v6  ;;  %v1881_v34 = vsel %vm1880_vm2, %v2597_v39, %v1877_v33  ;;  %v1618_v16 = vadd.f32 %v1617_v49, %v1616_v58  ;;  %vm1894_vm3 = vmor %vm1892_vm14, %vm1893_vm0  ;;  %v3469_v42 = vpop.f32.mrf.mxu1 }
 0x1b8   :  { %v1889_v61 = vsub.f32 1.0, %v1888_v63  ;;  %v1886_v5 = vsel %vm3418_vm12, %v1885_v35, %v1881_v34  ;;  %v936_v52 = vrot.slane %v935_v12, 1  ;;  %v941_v62 = vrot.slane %v940_v40, 2  ;;  %v3475_v63 = vpop.f32.mrf.mxu2 }
 0x1b9   :  { %v1341_v30 = vrot.slane %v1340_v27, 4  ;;  %v1336_v53 = vrot.slane %v1335_v45, 2  ;;  %v2243_v7 = vmul.f32 %v1886_v5, %v1613_v14  ;;  %v1619_v51 = vrot.slane %v1618_v16, 1 }
 0x1ba   :  { %v1890_v25 = vmul.f32 %v2605_v10, %v1889_v61  ;;  %v937_v43 = vmax.f32 %v935_v12, %v936_v52  ;;  %v1622_v54 = vrot.slane %v1621_v20, 4  ;;  %v942_v37 = vmax.f32 %v940_v40, %v941_v62 }
 0x1bb   :  { %v1342_v2 = vadd.f32 %v1341_v30, %v1340_v27  ;;  %v1337_v8 = vadd.f32 %v1336_v53, %v1335_v45  ;;  %v2281_v0 = vadd.f32 %v3163_v26, %v2243_v7  ;;  %v1620_v1 = vadd.f32 %v1619_v51, %v1618_v16 }
 0x1bc   :  { %v1891_v39 = vadd.f32 %v2605_v10, %v1890_v25  ;;  %v1105_v13 = vsub.f32 %v3302_v31, %v937_v43  ;;  %v1107_v14 = vsub.f32 %v3345_v17, %v937_v43  ;;  %v943_v18 = vrot.slane %v942_v37, 1 }
 0x1bd   :  { %v1343_v21 = vrot.slane %v1342_v2, 2  ;;  %v1338_v35 = vrot.slane %v1337_v8, 1  ;;  %v2345_v3 = vrot.slane %v2281_v0, 5  ;;  %v946_v27 = vrot.slane %v3430_v22, 4 }
 0x1be   :  { %v1895_v38 = vsel %vm1894_vm3, %v2605_v10, %v1891_v39  ;;  %v1189_v48 = vmul.f32 1.442695, %v1105_v13  ;;  %v1193_v41 = vmul.f32 1.442695, %v1107_v14  ;;  %v944_v17 = vmax.f32 %v942_v37, %v943_v18  ;;  %v685_v62 = vpop.f32.mrf.mxu3 }
 0x1bf   :  { %v1344_v47 = vadd.f32 %v1343_v21, %v1342_v2  ;;  %v1900_v6 = vsel %vm3445_vm1, %v1899_v59, %v1895_v38  ;;  %v3463_v15 = vadd.f32 %v1338_v35, %v1337_v8  ;;  %v3467_v55 = vsel %vm2346_vm15, %v2345_v3, %v3392_v57  ;;  %v795_v8 = vpop.f32.mrf.mxu0  ;;  %v3500_v14 = vpop.f32.mrf.mxu1 }
 0x1c0   :  { %v2244_v31 = vmul.f32 %v1900_v6, %v1620_v1  ;;  %2608 = vpow2.f32 %v1189_v48  ;;  %v1623_v10 = vadd.f32 %v1622_v54, %v1621_v20  ;;  %v1106_v36 = vsub.f32 %v3304_v46, %v944_v17 }
 0x1c1   :  { %v1345_v58 = vrot.slane %v1344_v47, 1  ;;  %2610 = vrcp.f32 %v3463_v15  ;;  %v1108_v33 = vsub.f32 %v3347_v24, %v944_v17  ;;  %v1912_v45 = vand.u32 2147483648, %v3463_v15 }
 0x1c2   :  { %v2282_v59 = vadd.f32 %v3165_v28, %v2244_v31  ;;  %2612 = vpow2.f32 %v1193_v41  ;;  %v1624_v57 = vrot.slane %v1623_v10, 2  ;;  %v1191_v12 = vmul.f32 1.442695, %v1106_v36 }
 0x1c3   :  { %v3477_v60 = vadd.f32 %v1345_v58, %v1344_v47  ;;  %v1195_v40 = vmul.f32 1.442695, %v1108_v33  ;;  %v1910_v46 = vand.u32 2147483647, %v3463_v15  ;;  %v1520_v24 = vmul.f32 %v3442_v44, %v792_v50  ;;  %v3507_v47 = vpop.f32.mrf.mxu2 }
 0x1c4   :  { %v2364_v49 = vrot.slane %v2282_v59, 5  ;;  %v1625_v34 = vadd.f32 %v1624_v57, %v1623_v10  ;;  %vm1906_vm4 = vweird.f32 %v3463_v15  ;;  %v1913_v5 = vor.u32 1.1754944e-38, %v1912_v45 }
 0x1c5   :  { %2614 = vrcp.f32 %v3477_v60  ;;  %v1628_v16 = vadd.f32 %v1520_v24, %v3440_v19  ;;  %v1924_v53 = vand.u32 2147483647, %v3477_v60  ;;  %v1926_v7 = vand.u32 2147483648, %v3477_v60 }
 0x1c6   :  { %v3486_v61 = vsel %vm2346_vm15, %v2364_v49, %v3408_v56  ;;  %2616 = vpow2.f32 %v1191_v12  ;;  %v2609_v20 = vpop.eup %2608  ;;  %v1626_v30 = vrot.slane %v1625_v34, 1  ;;  %v947_v44 = vmax.f32 %v3430_v22, %v946_v27 }
 0x1c7   :  { %2618 = vpow2.f32 %v1195_v40  ;;  %v2611_v52 = vpop.eup %2610  ;;  %v1521_v25 = vmul.f32 %v2609_v20, %v682_v4  ;;  %vm3494_vm6 = vcmp.eq.f32.partialorder %v1910_v46, 8.507059e+37  ;;  %v1629_v54 = vrot.slane %v1628_v16, 4 }
 0x1c8   :  { %v2613_v56 = vpop.eup %2612  ;;  %v1627_v2 = vadd.f32 %v1626_v30, %v1625_v34  ;;  %v1902_v51 = vmul.f32 %v2611_v52, %v3463_v15  ;;  %vm1907_vm7 = vweird.f32 %v2611_v52  ;;  %vm1920_vm8 = vweird.f32 %v3477_v60 }
 0x1c9   :  { %v1347_v19 = vadd.f32 %v2613_v56, %v2609_v20  ;;  %v1927_v0 = vor.u32 1.1754944e-38, %v1926_v7  ;;  %v948_v39 = vrot.slane %v947_v44, 2  ;;  %v1630_v21 = vadd.f32 %v1629_v54, %v1628_v16  ;;  %vm1908_vm13 = vmor %vm1906_vm4, %vm1907_vm7 }
 0x1ca   :  { %v1903_v22 = vsub.f32 1.0, %v1902_v51  ;;  %v953_v1 = vrot.slane %v3434_v23, 4  ;;  %v1523_v13 = vmul.f32 %v2613_v56, %v685_v62  ;;  %vm3503_vm10 = vcmp.eq.f32.partialorder %v1924_v53, 8.507059e+37 }
 0x1cb   :  { %v2615_v37 = vpop.eup %2614  ;;  %v1348_v3 = vrot.slane %v1347_v19, 4  ;;  %v949_v4 = vmax.f32 %v947_v44, %v948_v39  ;;  %v1631_v41 = vrot.slane %v1630_v21, 2  ;;  %vm2349_vm12 = vcmask 1044484   ;;  %v3525_v39 = vpop.f32.mrf.mxu1 }
 0x1cc   :  { %v2617_v35 = vpop.eup %2616  ;;  %v1916_v38 = vmul.f32 %v2615_v37, %v3477_v60  ;;  %vm1921_vm9 = vweird.f32 %v2615_v37  ;;  %v1904_v48 = vmul.f32 %v2611_v52, %v1903_v22  ;;  %v954_v50 = vmax.f32 %v3434_v23, %v953_v1 }
 0x1cd   :  { %v2619_v6 = vpop.eup %2618  ;;  %v3510_v31 = vmul.f32 %v2617_v35, %v795_v8  ;;  %v1349_v17 = vadd.f32 %v1348_v3, %v1347_v19  ;;  %v950_v59 = vrot.slane %v949_v4, 1  ;;  %v1632_v33 = vadd.f32 %v1631_v41, %v1630_v21  ;;  %vm1922_vm14 = vmor %vm1920_vm8, %vm1921_vm9  ;;  %v688_v19 = vpop.f32.mrf.mxu3 }
 0x1ce   :  { %v1354_v58 = vadd.f32 %v2619_v6, %v2617_v35  ;;  %v1917_v10 = vsub.f32 1.0, %v1916_v38  ;;  %v1905_v36 = vadd.f32 %v2611_v52, %v1904_v48  ;;  %v955_v57 = vrot.slane %v954_v50, 2  ;;  %v3529_v21 = vpop.f32.mrf.mxu2 }
 0x1cf   :  { %v1635_v27 = vadd.f32 %v1523_v13, %v1521_v25  ;;  %v1350_v49 = vrot.slane %v1349_v17, 2  ;;  %v951_v45 = vmax.f32 %v949_v4, %v950_v59  ;;  %v1633_v34 = vrot.slane %v1632_v33, 1 }
 0x1d0   :  { %v1355_v12 = vrot.slane %v1354_v58, 4  ;;  %v1918_v40 = vmul.f32 %v2615_v37, %v1917_v10  ;;  %v1909_v23 = vsel %vm1908_vm13, %v2611_v52, %v1905_v36  ;;  %v956_v46 = vmax.f32 %v954_v50, %v955_v57  ;;  %v798_v52 = vpop.f32.mrf.mxu0 }
 0x1d1   :  { %v1636_v24 = vrot.slane %v1635_v27, 4  ;;  %v1351_v20 = vadd.f32 %v1350_v49, %v1349_v17  ;;  %v1914_v16 = vsel %vm3494_vm6, %v1913_v5, %v1909_v23  ;;  %v1634_v44 = vadd.f32 %v1633_v34, %v1632_v33 }
 0x1d2   :  { %v1356_v30 = vadd.f32 %v1355_v12, %v1354_v58  ;;  %v1919_v53 = vadd.f32 %v2615_v37, %v1918_v40  ;;  %v2245_v7 = vmul.f32 %v1914_v16, %v1627_v2  ;;  %v1109_v15 = vsub.f32 %v3382_v9, %v951_v45 }
 0x1d3   :  { %v1111_v25 = vsub.f32 %v3413_v29, %v951_v45  ;;  %v1352_v62 = vrot.slane %v1351_v20, 1  ;;  %v957_v54 = vrot.slane %v956_v46, 1  ;;  %v1524_v13 = vmul.f32 %v2619_v6, %v798_v52  ;;  %v3559_v34 = vpop.f32.mrf.mxu1 }
 0x1d4   :  { %v1357_v56 = vrot.slane %v1356_v30, 2  ;;  %v1923_v51 = vsel %vm1922_vm14, %v2615_v37, %v1919_v53  ;;  %v2283_v8 = vadd.f32 %v3163_v26, %v2245_v7  ;;  %v1197_v2 = vmul.f32 1.442695, %v1109_v15 }
 0x1d5   :  { %v1928_v5 = vsel %vm3503_vm10, %v1927_v0, %v1923_v51  ;;  %v1201_v43 = vmul.f32 1.442695, %v1111_v25  ;;  %v3527_v60 = vadd.f32 %v1352_v62, %v1351_v20  ;;  %v958_v29 = vmax.f32 %v956_v46, %v957_v54  ;;  %v691_v23 = vpop.f32.mrf.mxu3 }
 0x1d6   :  { %v1358_v9 = vadd.f32 %v1357_v56, %v1356_v30  ;;  %v2246_v22 = vmul.f32 %v1928_v5, %v1634_v44  ;;  %v2348_v1 = vrot.slane %v2283_v8, 4  ;;  %2620 = vpow2.f32 %v1197_v2  ;;  %v3561_v30 = vpop.f32.mrf.mxu2 }
 0x1d7   :  { %v1637_v37 = vadd.f32 %v1636_v24, %v1635_v27  ;;  %2622 = vrcp.f32 %v3527_v60  ;;  %v1110_v3 = vsub.f32 %v3384_v32, %v958_v29  ;;  %v1112_v18 = vsub.f32 %v3415_v11, %v958_v29 }
 0x1d8   :  { %v1359_v35 = vrot.slane %v1358_v9, 1  ;;  %v2284_v0 = vadd.f32 %v3165_v28, %v2246_v22  ;;  %v3536_v38 = vsel %vm2349_vm12, %v2348_v1, %v3467_v55  ;;  %2624 = vpow2.f32 %v1201_v43  ;;  %v801_v36 = vpop.f32.mrf.mxu0 }
 0x1d9   :  { %v1638_v4 = vrot.slane %v1637_v37, 2  ;;  %v1199_v50 = vmul.f32 1.442695, %v1110_v3  ;;  %v1203_v6 = vmul.f32 1.442695, %v1112_v18  ;;  %v1940_v10 = vand.u32 2147483648, %v3527_v60 }
 0x1da   :  { %v3539_v48 = vadd.f32 %v1359_v35, %v1358_v9  ;;  %v2366_v41 = vrot.slane %v2284_v0, 4  ;;  %v1938_v58 = vand.u32 2147483647, %v3527_v60  ;;  %v1642_v55 = vadd.f32 %v1524_v13, %v3510_v31 }
 0x1db   :  { %v1639_v17 = vadd.f32 %v1638_v4, %v1637_v37  ;;  %vm1934_vm0 = vweird.f32 %v3527_v60  ;;  %v1941_v57 = vor.u32 1.1754944e-38, %v1940_v10  ;;  %v959_v45 = vmax.f32 %v3469_v42, %v3500_v14 }
 0x1dc   :  { %2626 = vrcp.f32 %v3539_v48  ;;  %v3546_v32 = vsel %vm2349_vm12, %v2366_v41, %v3486_v61  ;;  %v2621_v11 = vpop.eup %2620  ;;  %v1643_v27 = vrot.slane %v1642_v55, 4  ;;  %vm3551_vm1 = vcmp.eq.f32.partialorder %v1938_v58, 8.507059e+37 }
 0x1dd   :  { %2628 = vpow2.f32 %v1199_v50  ;;  %v1640_v59 = vrot.slane %v1639_v17, 1  ;;  %v2623_v33 = vpop.eup %2622  ;;  %v1952_v61 = vand.u32 2147483647, %v3539_v48  ;;  %v1954_v31 = vand.u32 2147483648, %v3539_v48 }
 0x1de   :  { %2630 = vpow2.f32 %v1203_v6  ;;  %v2625_v49 = vpop.eup %2624  ;;  %v1930_v12 = vmul.f32 %v2623_v33, %v3527_v60  ;;  %vm1935_vm2 = vweird.f32 %v2623_v33  ;;  %v1644_v20 = vadd.f32 %v1643_v27, %v1642_v55 }
 0x1df   :  { %v1361_v46 = vadd.f32 %v2625_v49, %v2621_v11  ;;  %v1641_v24 = vadd.f32 %v1640_v59, %v1639_v17  ;;  %vm1948_vm3 = vweird.f32 %v3539_v48  ;;  %v960_v53 = vrot.slane %v959_v45, 4  ;;  %vm1936_vm7 = vmor %vm1934_vm0, %vm1935_vm2 }
 0x1e0   :  { %v1931_v16 = vsub.f32 1.0, %v1930_v12  ;;  %v1525_v7 = vmul.f32 %v2621_v11, %v688_v19  ;;  %v966_v44 = vmax.f32 %v3475_v63, %v3507_v47  ;;  %v1645_v52 = vrot.slane %v1644_v20, 2  ;;  %v804_v58 = vpop.f32.mrf.mxu0 }
 0x1e1   :  { %v1362_v25 = vrot.slane %v1361_v46, 4  ;;  %v1527_v62 = vmul.f32 %v2625_v49, %v691_v23  ;;  %v3568_v56 = vmax.f32 %v3525_v39, %v3559_v34  ;;  %vm3571_vm6 = vcmp.eq.f32.partialorder %v1952_v61, 8.507059e+37  ;;  %v3585_v23 = vpop.f32.mrf.mxu1 }
 0x1e2   :  { %v2627_v15 = vpop.eup %2626  ;;  %v1932_v54 = vmul.f32 %v2623_v33, %v1931_v16  ;;  %v961_v2 = vmax.f32 %v959_v45, %v960_v53  ;;  %v1646_v9 = vadd.f32 %v1645_v52, %v1644_v20  ;;  %v967_v22 = vrot.slane %v966_v44, 4 }
 0x1e3   :  { %v2629_v51 = vpop.eup %2628  ;;  %v1944_v8 = vmul.f32 %v2627_v15, %v3539_v48  ;;  %vm1949_vm4 = vweird.f32 %v2627_v15  ;;  %v1363_v19 = vadd.f32 %v1362_v25, %v1361_v46  ;;  %v1649_v4 = vadd.f32 %v1527_v62, %v1525_v7  ;;  %v3587_v46 = vpop.f32.mrf.mxu2 }
 0x1e4   :  { %v2631_v43 = vpop.eup %2630  ;;  %v1526_v29 = vmul.f32 %v2629_v51, %v801_v36  ;;  %v1933_v37 = vadd.f32 %v2623_v33, %v1932_v54  ;;  %v962_v35 = vrot.slane %v961_v2, 2  ;;  %v1647_v3 = vrot.slane %v1646_v9, 1  ;;  %vm1950_vm8 = vmor %vm1948_vm3, %vm1949_vm4  ;;  %v694_v48 = vpop.f32.mrf.mxu3 }
 0x1e5   :  { %v1368_v1 = vadd.f32 %v2631_v43, %v2629_v51  ;;  %v1945_v13 = vsub.f32 1.0, %v1944_v8  ;;  %v1364_v0 = vrot.slane %v1363_v19, 2  ;;  %v968_v18 = vmax.f32 %v966_v44, %v967_v22 }
 0x1e6   :  { %v1937_v50 = vsel %vm1936_vm7, %v2623_v33, %v1933_v37  ;;  %v963_v17 = vmax.f32 %v961_v2, %v962_v35  ;;  %v1955_v11 = vor.u32 1.1754944e-38, %v1954_v31  ;;  %v1650_v61 = vrot.slane %v1649_v4, 4 }
 0x1e7   :  { %v1369_v41 = vrot.slane %v1368_v1, 4  ;;  %v1946_v6 = vmul.f32 %v2627_v15, %v1945_v13  ;;  %v1365_v10 = vadd.f32 %v1364_v0, %v1363_v19  ;;  %v1942_v55 = vsel %vm3551_vm1, %v1941_v57, %v1937_v50 }
 0x1e8   :  { %v969_v59 = vrot.slane %v968_v18, 2  ;;  %v3580_v27 = vmul.f32 %v1942_v55, %v1641_v24  ;;  %v964_v60 = vrot.slane %v963_v17, 1  ;;  %v1528_v45 = vmul.f32 %v2631_v43, %v804_v58 }
 0x1e9   :  { %v1370_v36 = vadd.f32 %v1369_v41, %v1368_v1  ;;  %v1947_v49 = vadd.f32 %v2627_v15, %v1946_v6  ;;  %v1366_v12 = vrot.slane %v1365_v10, 1  ;;  %v1648_v40 = vadd.f32 %v1647_v3, %v1646_v9  ;;  %v807_v41 = vpop.f32.mrf.mxu0 }
 0x1ea   :  { %v970_v33 = vmax.f32 %v968_v18, %v969_v59  ;;  %v965_v20 = vmax.f32 %v963_v17, %v964_v60  ;;  %v1651_v7 = vadd.f32 %v1650_v61, %v1649_v4  ;;  %v1656_v13 = vadd.f32 %v1528_v45, %v1526_v29 }
 0x1eb   :  { %v1371_v57 = vrot.slane %v1370_v36, 2  ;;  %v1951_v31 = vsel %vm1950_vm8, %v2627_v15, %v1947_v49  ;;  %v3589_v24 = vadd.f32 %v1366_v12, %v1365_v10  ;;  %v974_v6 = vrot.slane %v3568_v56, 4 }
 0x1ec   :  { %v1956_v16 = vsel %vm3571_vm6, %v1955_v11, %v1951_v31  ;;  %v971_v53 = vrot.slane %v970_v33, 1  ;;  %v1113_v52 = vsub.f32 %v3469_v42, %v965_v20  ;;  %v1115_v62 = vsub.f32 %v3500_v14, %v965_v20  ;;  %v697_v17 = vpop.f32.mrf.mxu3 }
 0x1ed   :  { %v1372_v44 = vadd.f32 %v1371_v57, %v1370_v36  ;;  %v3593_v25 = vmul.f32 %v1956_v16, %v1648_v40  ;;  %2632 = vrcp.f32 %v3589_v24  ;;  %v1652_v15 = vrot.slane %v1651_v7, 2 }
 0x1ee   :  { %v972_v51 = vmax.f32 %v970_v33, %v971_v53  ;;  %v1205_v8 = vmul.f32 1.442695, %v1113_v52  ;;  %v1209_v2 = vmul.f32 1.442695, %v1115_v62  ;;  %v1966_v22 = vand.u32 2147483647, %v3589_v24 }
 0x1ef   :  { %v1373_v54 = vrot.slane %v1372_v44, 1  ;;  %v1653_v19 = vadd.f32 %v1652_v15, %v1651_v7  ;;  %v1968_v14 = vand.u32 2147483648, %v3589_v24  ;;  %vm1962_vm9 = vweird.f32 %v3589_v24 }
 0x1f0   :  { %v1114_v5 = vsub.f32 %v3475_v63, %v972_v51  ;;  %v1116_v43 = vsub.f32 %v3507_v47, %v972_v51  ;;  %2634 = vpow2.f32 %v1205_v8  ;;  %v3606_v63 = vpop.f32.mrf.mxu1  ;;  %v3608_v47 = vpop.f32.mrf.mxu2  ;;  %vm3611_vm10 = vcmp.eq.f32.partialorder %v1966_v22, 8.507059e+37 }
 0x1f1   :  { %v3600_v9 = vadd.f32 %v1373_v54, %v1372_v44  ;;  %2636 = vpow2.f32 %v1209_v2  ;;  %v1654_v37 = vrot.slane %v1653_v19, 1  ;;  %v1969_v29 = vor.u32 1.1754944e-38, %v1968_v14 }
 0x1f2   :  { %v1207_v42 = vmul.f32 1.442695, %v1114_v5  ;;  %v1211_v1 = vmul.f32 1.442695, %v1116_v43  ;;  %v1657_v50 = vrot.slane %v1656_v13, 4  ;;  %v980_v55 = vmax.f32 %v3529_v21, %v3561_v30 }
 0x1f3   :  { %2638 = vrcp.f32 %v3600_v9  ;;  %v2633_v35 = vpop.eup %2632  ;;  %v1655_v0 = vadd.f32 %v1654_v37, %v1653_v19  ;;  %v1980_v4 = vand.u32 2147483647, %v3600_v9  ;;  %v3621_v11 = vmax.f32 %v3585_v23, %v3606_v63 }
 0x1f4   :  { %2640 = vpow2.f32 %v1207_v42  ;;  %v1958_v3 = vmul.f32 %v2633_v35, %v3589_v24  ;;  %vm1963_vm13 = vweird.f32 %v2633_v35  ;;  %v3625_v59 = vmax.f32 %v3587_v46, %v3608_v47  ;;  %v810_v24 = vpop.f32.mrf.mxu0 }
 0x1f5   :  { %2642 = vpow2.f32 %v1211_v1  ;;  %v1658_v49 = vadd.f32 %v1657_v50, %v1656_v13  ;;  %vm1976_vm14 = vweird.f32 %v3600_v9  ;;  %v1982_v60 = vand.u32 2147483648, %v3600_v9  ;;  %vm1964_vm2 = vmor %vm1962_vm9, %vm1963_vm13 }
 0x1f6   :  { %v2635_v58 = vpop.eup %2634  ;;  %v1959_v10 = vsub.f32 1.0, %v1958_v3  ;;  %v975_v12 = vmax.f32 %v3568_v56, %v974_v6  ;;  %v981_v40 = vrot.slane %v980_v55, 4  ;;  %vm3631_vm1 = vcmp.eq.f32.partialorder %v1980_v4, 8.507059e+37 }
 0x1f7   :  { %v2637_v36 = vpop.eup %2636  ;;  %v1529_v33 = vmul.f32 %v2635_v58, %v694_v48  ;;  %v1659_v16 = vrot.slane %v1658_v49, 2 }
 0x1f8   :  { %v1375_v45 = vadd.f32 %v2637_v36, %v2635_v58  ;;  %v1960_v57 = vmul.f32 %v2633_v35, %v1959_v10  ;;  %v1531_v31 = vmul.f32 %v2637_v36, %v697_v17  ;;  %v976_v44 = vrot.slane %v975_v12, 2  ;;  %v3642_v10 = vpop.f32.mrf.mxu1 }
 0x1f9   :  { %v2639_v61 = vpop.eup %2638  ;;  %v982_v56 = vmax.f32 %v980_v55, %v981_v40  ;;  %v1660_v54 = vadd.f32 %v1659_v16, %v1658_v49  ;;  %v1983_v17 = vor.u32 1.1754944e-38, %v1982_v60 }
 0x1fa   :  { %v2641_v20 = vpop.eup %2640  ;;  %v1972_v53 = vmul.f32 %v2639_v61, %v3600_v9  ;;  %vm1977_vm0 = vweird.f32 %v2639_v61  ;;  %v1376_v62 = vrot.slane %v1375_v45, 4  ;;  %v1961_v51 = vadd.f32 %v2633_v35, %v1960_v57  ;;  %v700_v57 = vpop.f32.mrf.mxu3 }
 0x1fb   :  { %v2643_v52 = vpop.eup %2642  ;;  %v1530_v48 = vmul.f32 %v2641_v20, %v807_v41  ;;  %v977_v2 = vmax.f32 %v975_v12, %v976_v44  ;;  %v983_v19 = vrot.slane %v982_v56, 2  ;;  %v1663_v22 = vadd.f32 %v1531_v31, %v1529_v33  ;;  %vm1978_vm3 = vmor %vm1976_vm14, %vm1977_vm0 }
 0x1fc   :  { %v1382_v15 = vadd.f32 %v2643_v52, %v2641_v20  ;;  %v1973_v8 = vsub.f32 1.0, %v1972_v53  ;;  %v1377_v5 = vadd.f32 %v1376_v62, %v1375_v45  ;;  %v1965_v43 = vsel %vm1964_vm2, %v2633_v35, %v1961_v51 }
 0x1fd   :  { %v1970_v1 = vsel %vm3611_vm10, %v1969_v29, %v1965_v43  ;;  %v1661_v37 = vrot.slane %v1660_v54, 1  ;;  %v978_v4 = vrot.slane %v977_v2, 1  ;;  %v984_v41 = vmax.f32 %v982_v56, %v983_v19 }
 0x1fe   :  { %v1383_v42 = vrot.slane %v1382_v15, 4  ;;  %v1974_v14 = vmul.f32 %v2639_v61, %v1973_v8  ;;  %v1378_v13 = vrot.slane %v1377_v5, 2  ;;  %v3640_v3 = vmul.f32 %v1970_v1, %v1655_v0  ;;  %v813_v8 = vpop.f32.mrf.mxu0 }
 0x1ff   :  { %v1664_v58 = vrot.slane %v1663_v22, 4  ;;  %v1662_v55 = vadd.f32 %v1661_v37, %v1660_v54  ;;  %v979_v18 = vmax.f32 %v977_v2, %v978_v4  ;;  %v985_v29 = vrot.slane %v984_v41, 1 }
 0x200   :  { %v1384_v50 = vadd.f32 %v1383_v42, %v1382_v15  ;;  %v1975_v6 = vadd.f32 %v2639_v61, %v1974_v14  ;;  %v1379_v35 = vadd.f32 %v1378_v13, %v1377_v5  ;;  %v1532_v12 = vmul.f32 %v2643_v52, %v810_v24  ;;  %v3663_v5 = vpop.f32.mrf.mxu1 }
 0x201   :  { %v1665_v49 = vadd.f32 %v1664_v58, %v1663_v22  ;;  %v1117_v60 = vsub.f32 %v3525_v39, %v979_v18  ;;  %v1119_v20 = vsub.f32 %v3559_v34, %v979_v18  ;;  %v986_v9 = vmax.f32 %v984_v41, %v985_v29 }
 0x202   :  { %v1385_v36 = vrot.slane %v1384_v50, 2  ;;  %v1979_v0 = vsel %vm1978_vm3, %v2639_v61, %v1975_v6  ;;  %v1380_v33 = vrot.slane %v1379_v35, 1  ;;  %v1670_v61 = vadd.f32 %v1532_v12, %v1530_v48  ;;  %v703_v14 = vpop.f32.mrf.mxu3 }
 0x203   :  { %v1984_v45 = vsel %vm3631_vm1, %v1983_v17, %v1979_v0  ;;  %v1213_v53 = vmul.f32 1.442695, %v1117_v60  ;;  %v1666_v44 = vrot.slane %v1665_v49, 2  ;;  %v1217_v52 = vmul.f32 1.442695, %v1119_v20 }
 0x204   :  { %v1386_v40 = vadd.f32 %v1385_v36, %v1384_v50  ;;  %v3650_v31 = vmul.f32 %v1984_v45, %v1662_v55  ;;  %v3653_v16 = vadd.f32 %v1380_v33, %v1379_v35  ;;  %v1118_v51 = vsub.f32 %v3529_v21, %v986_v9 }
 0x205   :  { %v1120_v39 = vsub.f32 %v3561_v30, %v986_v9  ;;  %v1667_v7 = vadd.f32 %v1666_v44, %v1665_v49  ;;  %v1671_v21 = vrot.slane %v1670_v61, 4  ;;  %v988_v1 = vrot.slane %v3621_v11, 4 }
 0x206   :  { %v1387_v62 = vrot.slane %v1386_v40, 1  ;;  %2644 = vrcp.f32 %v3653_v16  ;;  %v1215_v15 = vmul.f32 1.442695, %v1118_v51  ;;  %v1994_v48 = vand.u32 2147483647, %v3653_v16  ;;  %v816_v51 = vpop.f32.mrf.mxu0 }
 0x207   :  { %2646 = vpow2.f32 %v1213_v53  ;;  %v1219_v34 = vmul.f32 1.442695, %v1120_v39  ;;  %v1668_v54 = vrot.slane %v1667_v7, 1  ;;  %v1996_v2 = vand.u32 2147483648, %v3653_v16 }
 0x208   :  { %v3658_v56 = vadd.f32 %v1387_v62, %v1386_v40  ;;  %2648 = vpow2.f32 %v1217_v52  ;;  %vm1990_vm4 = vweird.f32 %v3653_v16  ;;  %v1672_v43 = vadd.f32 %v1671_v21, %v1670_v61 }
 0x209   :  { %v1669_v30 = vadd.f32 %v1668_v54, %v1667_v7  ;;  %v995_v37 = vrot.slane %v3625_v59, 4  ;;  %v3672_v13 = vmax.f32 %v3642_v10, %v3663_v5  ;;  %vm3675_vm7 = vcmp.eq.f32.partialorder %v1994_v48, 8.507059e+37 }
 0x20a   :  { %2650 = vrcp.f32 %v3658_v56  ;;  %v2010_v19 = vand.u32 2147483648, %v3658_v56  ;;  %v2008_v42 = vand.u32 2147483647, %v3658_v56  ;;  %v1997_v50 = vor.u32 1.1754944e-38, %v1996_v2 }
 0x20b   :  { %2652 = vpow2.f32 %v1215_v15  ;;  %v1673_v6 = vrot.slane %v1672_v43, 2  ;;  %vm2004_vm8 = vweird.f32 %v3658_v56  ;;  %v989_v35 = vmax.f32 %v3621_v11, %v988_v1 }
 0x20c   :  { %2654 = vpow2.f32 %v1219_v34  ;;  %v2645_v22 = vpop.eup %2644  ;;  %v2011_v58 = vor.u32 1.1754944e-38, %v2010_v19  ;;  %v996_v18 = vmax.f32 %v3625_v59, %v995_v37  ;;  %vm3683_vm10 = vcmp.eq.f32.partialorder %v2008_v42, 8.507059e+37  ;;  %v3690_v42 = vpop.f32.mrf.mxu2 }
 0x20d   :  { %v2647_v4 = vpop.eup %2646  ;;  %v1986_v41 = vmul.f32 %v2645_v22, %v3653_v16  ;;  %vm1991_vm6 = vweird.f32 %v2645_v22  ;;  %v1674_v49 = vadd.f32 %v1673_v6, %v1672_v43  ;;  %v990_v40 = vrot.slane %v989_v35, 2 }
 0x20e   :  { %v2649_v17 = vpop.eup %2648  ;;  %v1533_v55 = vmul.f32 %v2647_v4, %v700_v57  ;;  %v997_v20 = vrot.slane %v996_v18, 2  ;;  %vm1992_vm13 = vmor %vm1990_vm4, %vm1991_vm6 }
 0x20f   :  { %v1389_v36 = vadd.f32 %v2649_v17, %v2647_v4  ;;  %v1987_v0 = vsub.f32 1.0, %v1986_v41  ;;  %v1535_v12 = vmul.f32 %v2649_v17, %v703_v14  ;;  %v1675_v53 = vrot.slane %v1674_v49, 1 }
 0x210   :  { %v2651_v29 = vpop.eup %2650  ;;  %v991_v62 = vmax.f32 %v989_v35, %v990_v40  ;;  %v998_v52 = vmax.f32 %v996_v18, %v997_v20 }
 0x211   :  { %v2653_v33 = vpop.eup %2652  ;;  %v2000_v45 = vmul.f32 %v2651_v29, %v3658_v56  ;;  %vm2005_vm9 = vweird.f32 %v2651_v29  ;;  %v1390_v11 = vrot.slane %v1389_v36, 4  ;;  %v1988_v57 = vmul.f32 %v2645_v22, %v1987_v0 }
 0x212   :  { %v2655_v9 = vpop.eup %2654  ;;  %v1534_v59 = vmul.f32 %v2653_v33, %v813_v8  ;;  %v1676_v15 = vadd.f32 %v1675_v53, %v1674_v49  ;;  %v1677_v34 = vadd.f32 %v1535_v12, %v1533_v55  ;;  %v992_v2 = vrot.slane %v991_v62, 1  ;;  %vm2006_vm14 = vmor %vm2004_vm8, %vm2005_vm9 }
 0x213   :  { %v1396_v44 = vadd.f32 %v2655_v9, %v2653_v33  ;;  %v2001_v61 = vsub.f32 1.0, %v2000_v45  ;;  %v1391_v39 = vadd.f32 %v1390_v11, %v1389_v36  ;;  %v1989_v7 = vadd.f32 %v2645_v22, %v1988_v57 }
 0x214   :  { %v999_v21 = vrot.slane %v998_v52, 1  ;;  %v1678_v8 = vrot.slane %v1677_v34, 4  ;;  %v1536_v1 = vmul.f32 %v2655_v9, %v816_v51  ;;  %v993_v41 = vmax.f32 %v991_v62, %v992_v2  ;;  %v3716_v53 = vpop.f32.mrf.mxu2 }
 0x215   :  { %v1397_v54 = vrot.slane %v1396_v44, 4  ;;  %v2002_v48 = vmul.f32 %v2651_v29, %v2001_v61  ;;  %v1392_v43 = vrot.slane %v1391_v39, 2  ;;  %v1993_v19 = vsel %vm1992_vm13, %v2645_v22, %v1989_v7  ;;  %v3699_v22 = vpop.f32.mrf.mxu1 }
 0x216   :  { %v1998_v14 = vsel %vm3675_vm7, %v1997_v50, %v1993_v19  ;;  %v1000_v16 = vmax.f32 %v998_v52, %v999_v21  ;;  %v1679_v35 = vadd.f32 %v1678_v8, %v1677_v34  ;;  %v1121_v36 = vsub.f32 %v3585_v23, %v993_v41  ;;  %v706_v50 = vpop.f32.mrf.mxu3 }
 0x217   :  { %v1398_v37 = vadd.f32 %v1397_v54, %v1396_v44  ;;  %v2003_v4 = vadd.f32 %v2651_v29, %v2002_v48  ;;  %v1393_v6 = vadd.f32 %v1392_v43, %v1391_v39  ;;  %v3694_v17 = vmul.f32 %v1998_v14, %v1669_v30 }
 0x218   :  { %v1123_v24 = vsub.f32 %v3606_v63, %v993_v41  ;;  %v1122_v49 = vsub.f32 %v3587_v46, %v1000_v16  ;;  %v1221_v33 = vmul.f32 1.442695, %v1121_v36  ;;  %v1680_v63 = vrot.slane %v1679_v35, 2 }
 0x219   :  { %v1399_v55 = vrot.slane %v1398_v37, 2  ;;  %v2007_v18 = vsel %vm2006_vm14, %v2651_v29, %v2003_v4  ;;  %v1394_v0 = vrot.slane %v1393_v6, 1  ;;  %v1124_v29 = vsub.f32 %v3608_v47, %v1000_v16 }
 0x21a   :  { %v2012_v30 = vsel %vm3683_vm10, %v2011_v58, %v2007_v18  ;;  %v1225_v45 = vmul.f32 1.442695, %v1123_v24  ;;  %v1223_v20 = vmul.f32 1.442695, %v1122_v49  ;;  %2656 = vpow2.f32 %v1221_v33 }
 0x21b   :  { %v1400_v12 = vadd.f32 %v1399_v55, %v1398_v37  ;;  %v3706_v56 = vmul.f32 %v2012_v30, %v1676_v15  ;;  %v3708_v40 = vadd.f32 %v1394_v0, %v1393_v6  ;;  %v1227_v9 = vmul.f32 1.442695, %v1124_v29 }
 0x21c   :  { %v1681_v46 = vadd.f32 %v1680_v63, %v1679_v35  ;;  %v1002_v58 = vrot.slane %v3672_v13, 4  ;;  %v1684_v57 = vadd.f32 %v1536_v1, %v1534_v59  ;;  %v1008_v15 = vmax.f32 %v3690_v42, %v3716_v53 }
 0x21d   :  { %v1401_v23 = vrot.slane %v1400_v12, 1  ;;  %2658 = vrcp.f32 %v3708_v40  ;;  %v2024_v11 = vand.u32 2147483648, %v3708_v40  ;;  %v2022_v44 = vand.u32 2147483647, %v3708_v40  ;;  %v3721_v52 = vpop.f32.mrf.mxu1 }
 0x21e   :  { %2660 = vpow2.f32 %v1225_v45  ;;  %v1682_v47 = vrot.slane %v1681_v46, 1  ;;  %v1685_v61 = vrot.slane %v1684_v57, 4  ;;  %vm2018_vm0 = vweird.f32 %v3708_v40  ;;  %v709_v34 = vpop.f32.mrf.mxu3 }
 0x21f   :  { %v3712_v60 = vadd.f32 %v1401_v23, %v1400_v12  ;;  %2662 = vpow2.f32 %v1223_v20  ;;  %v2025_v39 = vor.u32 1.1754944e-38, %v2024_v11  ;;  %v1003_v59 = vmax.f32 %v3672_v13, %v1002_v58  ;;  %v819_v13 = vpop.f32.mrf.mxu0 }
 0x220   :  { %v2657_v51 = vpop.eup %2656  ;;  %v1683_v48 = vadd.f32 %v1682_v47, %v1681_v46  ;;  %v1686_v2 = vadd.f32 %v1685_v61, %v1684_v57  ;;  %vm3731_vm1 = vcmp.eq.f32.partialorder %v2022_v44, 8.507059e+37  ;;  %v1009_v14 = vrot.slane %v1008_v15, 4 }
 0x221   :  { %2664 = vrcp.f32 %v3712_v60  ;;  %v2038_v62 = vand.u32 2147483648, %v3712_v60  ;;  %v2036_v7 = vand.u32 2147483647, %v3712_v60  ;;  %v1537_v43 = vmul.f32 %v2657_v51, %v706_v50 }
 0x222   :  { %2666 = vpow2.f32 %v1227_v9  ;;  %v1004_v37 = vrot.slane %v1003_v59, 2  ;;  %v3737_v4 = vmax.f32 %v3699_v22, %v3721_v52  ;;  %v1687_v16 = vrot.slane %v1686_v2, 2 }
 0x223   :  { %v2659_v54 = vpop.eup %2658  ;;  %v3728_v21 = vor.u32 1.1754944e-38, %v2038_v62  ;;  %vm2032_vm3 = vweird.f32 %v3712_v60  ;;  %v1010_v24 = vmax.f32 %v1008_v15, %v1009_v14  ;;  %vm3743_vm6 = vcmp.eq.f32.partialorder %v2036_v7, 8.507059e+37 }
 0x224   :  { %v2661_v19 = vpop.eup %2660  ;;  %v2014_v8 = vmul.f32 %v2659_v54, %v3708_v40  ;;  %vm2019_vm2 = vweird.f32 %v2659_v54  ;;  %v1005_v36 = vmax.f32 %v1003_v59, %v1004_v37  ;;  %v1688_v49 = vadd.f32 %v1687_v16, %v1686_v2 }
 0x225   :  { %v2663_v41 = vpop.eup %2662  ;;  %v1403_v6 = vadd.f32 %v2661_v19, %v2657_v51  ;;  %v1539_v35 = vmul.f32 %v2661_v19, %v709_v34  ;;  %v1011_v23 = vrot.slane %v1010_v24, 2  ;;  %vm2020_vm7 = vmor %vm2018_vm0, %vm2019_vm2  ;;  %v3752_v19 = vpop.f32.mrf.mxu2 }
 0x226   :  { %v2015_v18 = vsub.f32 1.0, %v2014_v8  ;;  %v3740_v50 = vmul.f32 %v2663_v41, %v819_v13  ;;  %v1006_v20 = vrot.slane %v1005_v36, 1  ;;  %v1689_v9 = vrot.slane %v1688_v49, 1 }
 0x227   :  { %v2665_v55 = vpop.eup %2664  ;;  %v1404_v30 = vrot.slane %v1403_v6, 4  ;;  %v1691_v58 = vadd.f32 %v1539_v35, %v1537_v43  ;;  %v1012_v44 = vmax.f32 %v1010_v24, %v1011_v23 }
 0x228   :  { %v2667_v0 = vpop.eup %2666  ;;  %v2028_v12 = vmul.f32 %v2665_v55, %v3712_v60  ;;  %vm2033_vm4 = vweird.f32 %v2665_v55  ;;  %v2016_v29 = vmul.f32 %v2659_v54, %v2015_v18  ;;  %v1007_v47 = vmax.f32 %v1005_v36, %v1006_v20 }
 0x229   :  { %v1410_v45 = vadd.f32 %v2667_v0, %v2663_v41  ;;  %v1405_v63 = vadd.f32 %v1404_v30, %v1403_v6  ;;  %v1690_v62 = vadd.f32 %v1689_v9, %v1688_v49  ;;  %v1692_v7 = vrot.slane %v1691_v58, 4  ;;  %vm2034_vm8 = vmor %vm2032_vm3, %vm2033_vm4  ;;  %v712_v6 = vpop.f32.mrf.mxu3 }
 0x22a   :  { %v2029_v46 = vsub.f32 1.0, %v2028_v12  ;;  %v2017_v57 = vadd.f32 %v2659_v54, %v2016_v29  ;;  %v1125_v34 = vsub.f32 %v3642_v10, %v1007_v47  ;;  %v1127_v2 = vsub.f32 %v3663_v5, %v1007_v47  ;;  %v822_v10 = vpop.f32.mrf.mxu0 }
 0x22b   :  { %v1411_v11 = vrot.slane %v1410_v45, 4  ;;  %v1406_v61 = vrot.slane %v1405_v63, 2  ;;  %v1013_v14 = vrot.slane %v1012_v44, 1  ;;  %v1693_v18 = vadd.f32 %v1692_v7, %v1691_v58 }
 0x22c   :  { %v2030_v51 = vmul.f32 %v2665_v55, %v2029_v46  ;;  %v2021_v15 = vsel %vm2020_vm7, %v2659_v54, %v2017_v57  ;;  %v1229_v54 = vmul.f32 1.442695, %v1125_v34  ;;  %v1233_v41 = vmul.f32 1.442695, %v1127_v2 }
 0x22d   :  { %v1412_v59 = vadd.f32 %v1411_v11, %v1410_v45  ;;  %v1407_v43 = vadd.f32 %v1406_v61, %v1405_v63  ;;  %v2026_v8 = vsel %vm3731_vm1, %v2025_v39, %v2021_v15  ;;  %v1014_v35 = vmax.f32 %v1012_v44, %v1013_v14  ;;  %v3779_v9 = vpop.f32.mrf.mxu2 }
 0x22e   :  { %v2031_v37 = vadd.f32 %v2665_v55, %v2030_v51  ;;  %v3756_v40 = vmul.f32 %v2026_v8, %v1683_v48  ;;  %2668 = vpow2.f32 %v1229_v54  ;;  %v1016_v48 = vrot.slane %v3737_v4, 4 }
 0x22f   :  { %v1413_v13 = vrot.slane %v1412_v59, 2  ;;  %v1408_v5 = vrot.slane %v1407_v43, 1  ;;  %2670 = vpow2.f32 %v1233_v41  ;;  %v1126_v24 = vsub.f32 %v3690_v42, %v1014_v35 }
 0x230   :  { %v2035_v16 = vsel %vm2034_vm8, %v2665_v55, %v2031_v37  ;;  %v1128_v55 = vsub.f32 %v3716_v53, %v1014_v35  ;;  %v1694_v49 = vrot.slane %v1693_v18, 2  ;;  %v1540_v12 = vmul.f32 %v2667_v0, %v822_v10 }
 0x231   :  { %v1414_v36 = vadd.f32 %v1413_v13, %v1412_v59  ;;  %v2040_v39 = vsel %vm3743_vm6, %v3728_v21, %v2035_v16  ;;  %v3765_v1 = vadd.f32 %v1408_v5, %v1407_v43  ;;  %v1231_v45 = vmul.f32 1.442695, %v1126_v24 }
 0x232   :  { %v3767_v60 = vmul.f32 %v2040_v39, %v1690_v62  ;;  %v1235_v21 = vmul.f32 1.442695, %v1128_v55  ;;  %v1695_v29 = vadd.f32 %v1694_v49, %v1693_v18  ;;  %v1698_v23 = vadd.f32 %v1540_v12, %v3740_v50  ;;  %v825_v44 = vpop.f32.mrf.mxu0 }
 0x233   :  { %v1415_v30 = vrot.slane %v1414_v36, 1  ;;  %2672 = vrcp.f32 %v3765_v1  ;;  %v2052_v20 = vand.u32 2147483648, %v3765_v1  ;;  %v1017_v63 = vmax.f32 %v3737_v4, %v1016_v48  ;;  %v715_v4 = vpop.f32.mrf.mxu3 }
 0x234   :  { %2674 = vpow2.f32 %v1231_v45  ;;  %v2669_v42 = vpop.eup %2668  ;;  %v1696_v53 = vrot.slane %v1695_v29, 1  ;;  %v2050_v0 = vand.u32 2147483647, %v3765_v1  ;;  %v1699_v58 = vrot.slane %v1698_v23, 4 }
 0x235   :  { %v3772_v33 = vadd.f32 %v1415_v30, %v1414_v36  ;;  %v2671_v46 = vpop.eup %2670  ;;  %vm2046_vm9 = vweird.f32 %v3765_v1  ;;  %v2053_v57 = vor.u32 1.1754944e-38, %v2052_v20  ;;  %v1018_v50 = vrot.slane %v1017_v63, 2 }
 0x236   :  { %v1417_v11 = vadd.f32 %v2671_v46, %v2669_v42  ;;  %v1700_v62 = vadd.f32 %v1699_v58, %v1698_v23  ;;  %v1541_v7 = vmul.f32 %v2669_v42, %v712_v6  ;;  %v1022_v59 = vmax.f32 %v3752_v19, %v3779_v9 }
 0x237   :  { %2676 = vrcp.f32 %v3772_v33  ;;  %v2066_v47 = vand.u32 2147483648, %v3772_v33  ;;  %v2064_v51 = vand.u32 2147483647, %v3772_v33  ;;  %v1697_v34 = vadd.f32 %v1696_v53, %v1695_v29  ;;  %v3799_v29 = vpop.f32.mrf.mxu1 }
 0x238   :  { %2678 = vpow2.f32 %v1235_v21  ;;  %v1418_v15 = vrot.slane %v1417_v11, 4  ;;  %vm3787_vm13 = vcmp.eq.f32.partialorder %v2050_v0, 8.507059e+37  ;;  %v1701_v37 = vrot.slane %v1700_v62, 2 }
 0x239   :  { %v2673_v61 = vpop.eup %2672  ;;  %vm2060_vm14 = vweird.f32 %v3772_v33  ;;  %v1019_v14 = vmax.f32 %v1017_v63, %v1018_v50  ;;  %v1023_v13 = vrot.slane %v1022_v59, 4  ;;  %v1543_v54 = vmul.f32 %v2671_v46, %v715_v4 }
 0x23a   :  { %v2042_v2 = vmul.f32 %v2673_v61, %v3765_v1  ;;  %vm2047_vm10 = vweird.f32 %v2673_v61  ;;  %v2675_v8 = vpop.eup %2674  ;;  %v1419_v10 = vadd.f32 %v1418_v15, %v1417_v11  ;;  %v2067_v5 = vor.u32 1.1754944e-38, %v2066_v47 }
 0x23b   :  { %v3792_v16 = vmul.f32 %v2675_v8, %v825_v44  ;;  %v1702_v18 = vadd.f32 %v1701_v37, %v1700_v62  ;;  %vm3795_vm1 = vcmp.eq.f32.partialorder %v2064_v51, 8.507059e+37  ;;  %v1020_v48 = vrot.slane %v1019_v14, 1  ;;  %vm2048_vm2 = vmor %vm2046_vm9, %vm2047_vm10  ;;  %v828_v62 = vpop.f32.mrf.mxu0  ;;  %v718_v43 = vpop.f32.mrf.mxu3 }
 0x23c   :  { %v2043_v6 = vsub.f32 1.0, %v2042_v2  ;;  %v1420_v24 = vrot.slane %v1419_v10, 2  ;;  %v1024_v49 = vmax.f32 %v1022_v59, %v1023_v13  ;;  %v1705_v20 = vadd.f32 %v1543_v54, %v1541_v7 }
 0x23d   :  { %v2677_v41 = vpop.eup %2676  ;;  %v1703_v12 = vrot.slane %v1702_v18, 1  ;;  %v1021_v21 = vmax.f32 %v1019_v14, %v1020_v48 }
 0x23e   :  { %v2679_v35 = vpop.eup %2678  ;;  %v2056_v36 = vmul.f32 %v2677_v41, %v3772_v33  ;;  %vm2061_vm0 = vweird.f32 %v2677_v41  ;;  %v2044_v55 = vmul.f32 %v2673_v61, %v2043_v6  ;;  %v1421_v23 = vadd.f32 %v1420_v24, %v1419_v10 }
 0x23f   :  { %v1424_v30 = vadd.f32 %v2679_v35, %v2675_v8  ;;  %v1025_v53 = vrot.slane %v1024_v49, 2  ;;  %v1704_v0 = vadd.f32 %v1703_v12, %v1702_v18  ;;  %v1129_v58 = vsub.f32 %v3699_v22, %v1021_v21  ;;  %vm2062_vm3 = vmor %vm2060_vm14, %vm2061_vm0 }
 0x240   :  { %v2057_v45 = vsub.f32 1.0, %v2056_v36  ;;  %v2045_v42 = vadd.f32 %v2673_v61, %v2044_v55  ;;  %v1131_v11 = vsub.f32 %v3721_v52, %v1021_v21  ;;  %v1422_v47 = vrot.slane %v1421_v23, 1  ;;  %v3813_v52 = vpop.f32.mrf.mxu2 }
 0x241   :  { %v1425_v63 = vrot.slane %v1424_v30, 4  ;;  %v1026_v4 = vmax.f32 %v1024_v49, %v1025_v53  ;;  %v1237_v59 = vmul.f32 1.442695, %v1129_v58  ;;  %v1706_v37 = vrot.slane %v1705_v20, 4 }
 0x242   :  { %v2058_v46 = vmul.f32 %v2677_v41, %v2057_v45  ;;  %v2049_v44 = vsel %vm2048_vm2, %v2673_v61, %v2045_v42  ;;  %v1241_v15 = vmul.f32 1.442695, %v1131_v11  ;;  %v3808_v2 = vadd.f32 %v1422_v47, %v1421_v23 }
 0x243   :  { %v1426_v50 = vadd.f32 %v1425_v63, %v1424_v30  ;;  %v2054_v51 = vsel %vm3787_vm13, %v2053_v57, %v2049_v44  ;;  %v1027_v22 = vrot.slane %v1026_v4, 1  ;;  %2680 = vpow2.f32 %v1237_v59 }
 0x244   :  { %v2059_v7 = vadd.f32 %v2677_v41, %v2058_v46  ;;  %v2255_v8 = vmul.f32 %v2054_v51, %v1697_v34  ;;  %v1544_v14 = vmul.f32 %v2679_v35, %v828_v62  ;;  %2682 = vrcp.f32 %v3808_v2 }
 0x245   :  { %v1427_v1 = vrot.slane %v1426_v50, 2  ;;  %2684 = vpow2.f32 %v1241_v15  ;;  %v1028_v33 = vmax.f32 %v1026_v4, %v1027_v22  ;;  %v1707_v10 = vadd.f32 %v1706_v37, %v1705_v20  ;;  %v721_v4 = vpop.f32.mrf.mxu3 }
 0x246   :  { %v2063_v61 = vsel %vm2062_vm3, %v2677_v41, %v2059_v7  ;;  %v2293_v13 = vadd.f32 %v3163_v26, %v2255_v8  ;;  %v2291_v6 = vadd.f32 %v3163_v26, %v3756_v40  ;;  %v2292_v41 = vadd.f32 %v3165_v28, %v3767_v60 }
 0x247   :  { %v1428_v57 = vadd.f32 %v1427_v1, %v1426_v50  ;;  %v2068_v34 = vsel %vm3795_vm1, %v2067_v5, %v2063_v61  ;;  %v1130_v48 = vsub.f32 %v3752_v19, %v1028_v33  ;;  %v1132_v24 = vsub.f32 %v3779_v9, %v1028_v33  ;;  %v3826_v5 = vpop.f32.mrf.mxu1 }
 0x248   :  { %v2256_v54 = vmul.f32 %v2068_v34, %v1704_v0  ;;  %v2374_v18 = vrot.slane %v2293_v13, 7  ;;  %v1708_v39 = vrot.slane %v1707_v10, 2  ;;  %v2078_v40 = vand.u32 2147483647, %v3808_v2  ;;  %v3848_v47 = vpop.f32.mrf.mxu2 }
 0x249   :  { %v1429_v35 = vrot.slane %v1428_v57, 1  ;;  %v2080_v60 = vand.u32 2147483648, %v3808_v2  ;;  %v2681_v49 = vpop.eup %2680  ;;  %v1239_v45 = vmul.f32 1.442695, %v1130_v48  ;;  %v1243_v21 = vmul.f32 1.442695, %v1132_v24 }
 0x24a   :  { %v2294_v36 = vadd.f32 %v3165_v28, %v2256_v54  ;;  %v3831_v55 = vsel %vm2340_vm11, %v2374_v18, %v2291_v6  ;;  %v1709_v20 = vadd.f32 %v1708_v39, %v1707_v10  ;;  %v2683_v19 = vpop.eup %2682  ;;  %vm2074_vm4 = vweird.f32 %v3808_v2  ;;  %v831_v6 = vpop.f32.mrf.mxu0 }
 0x24b   :  { %v3828_v30 = vadd.f32 %v1429_v35, %v1428_v57  ;;  %v1712_v9 = vadd.f32 %v1544_v14, %v3792_v16  ;;  %v1029_v23 = vmax.f32 %v3799_v29, %v3826_v5  ;;  %v2685_v63 = vpop.eup %2684  ;;  %v2070_v0 = vmul.f32 %v2683_v19, %v3808_v2 }
 0x24c   :  { %v2388_v12 = vrot.slane %v2294_v36, 7  ;;  %v1710_v53 = vrot.slane %v1709_v20, 1  ;;  %v1431_v46 = vadd.f32 %v2685_v63, %v2681_v49  ;;  %vm3844_vm6 = vcmp.eq.f32.partialorder %v2078_v40, 8.507059e+37 }
 0x24d   :  { %2686 = vrcp.f32 %v3828_v30  ;;  %v1713_v11 = vrot.slane %v1712_v9, 4  ;;  %v2071_v16 = vsub.f32 1.0, %v2070_v0  ;;  %vm2075_vm7 = vweird.f32 %v2683_v19 }
 0x24e   :  { %v3841_v42 = vsel %vm2340_vm11, %v2388_v12, %v2292_v41  ;;  %2688 = vpow2.f32 %v1239_v45  ;;  %v2081_v50 = vor.u32 1.1754944e-38, %v2080_v60  ;;  %v2092_v44 = vand.u32 2147483647, %v3828_v30  ;;  %vm2076_vm10 = vmor %vm2074_vm4, %vm2075_vm7 }
 0x24f   :  { %2690 = vpow2.f32 %v1243_v21  ;;  %v1432_v62 = vrot.slane %v1431_v46, 4  ;;  %v1714_v51 = vadd.f32 %v1713_v11, %v1712_v9  ;;  %v1030_v7 = vrot.slane %v1029_v23, 4 }
 0x250   :  { %v1545_v59 = vmul.f32 %v2681_v49, %v718_v43  ;;  %v1711_v15 = vadd.f32 %v1710_v53, %v1709_v20  ;;  %v2072_v1 = vmul.f32 %v2683_v19, %v2071_v16  ;;  %vm2088_vm11 = vweird.f32 %v3828_v30 }
 0x251   :  { %v2094_v8 = vand.u32 2147483648, %v3828_v30  ;;  %v1036_v22 = vmax.f32 %v3813_v52, %v3848_v47  ;;  %v1433_v37 = vadd.f32 %v1432_v62, %v1431_v46  ;;  %v1715_v14 = vrot.slane %v1714_v51, 2  ;;  %v3867_v46 = vpop.f32.mrf.mxu1  ;;  %v3870_v62 = vpop.f32.mrf.mxu2 }
 0x252   :  { %v1031_v57 = vmax.f32 %v1029_v23, %v1030_v7  ;;  %v1547_v13 = vmul.f32 %v2685_v63, %v721_v4  ;;  %v2073_v54 = vadd.f32 %v2683_v19, %v2072_v1  ;;  %vm3856_vm9 = vcmp.eq.f32.partialorder %v2092_v44, 8.507059e+37 }
 0x253   :  { %v2687_v61 = vpop.eup %2686  ;;  %v1037_v10 = vrot.slane %v1036_v22, 4  ;;  %v1434_v35 = vrot.slane %v1433_v37, 2  ;;  %v1716_v18 = vadd.f32 %v1715_v14, %v1714_v51  ;;  %v2095_v53 = vor.u32 1.1754944e-38, %v2094_v8 }
 0x254   :  { %v2689_v34 = vpop.eup %2688  ;;  %v2084_v33 = vmul.f32 %v2687_v61, %v3828_v30  ;;  %vm2089_vm8 = vweird.f32 %v2687_v61  ;;  %v1032_v36 = vrot.slane %v1031_v57, 2  ;;  %v2077_v39 = vsel %vm2076_vm10, %v2683_v19, %v2073_v54  ;;  %v834_v54 = vpop.f32.mrf.mxu0 }
 0x255   :  { %v2691_v41 = vpop.eup %2690  ;;  %v3863_v48 = vmul.f32 %v2689_v34, %v831_v6  ;;  %v1038_v60 = vmax.f32 %v1036_v22, %v1037_v10  ;;  %v1435_v49 = vadd.f32 %v1434_v35, %v1433_v37  ;;  %v2082_v12 = vsel %vm3844_vm6, %v2081_v50, %v2077_v39  ;;  %vm2090_vm13 = vmor %vm2088_vm11, %vm2089_vm8 }
 0x256   :  { %v1438_v24 = vadd.f32 %v2691_v41, %v2689_v34  ;;  %v2085_v40 = vsub.f32 1.0, %v2084_v33  ;;  %v1717_v45 = vrot.slane %v1716_v18, 1  ;;  %v1033_v21 = vmax.f32 %v1031_v57, %v1032_v36  ;;  %v724_v33 = vpop.f32.mrf.mxu3 }
 0x257   :  { %v2257_v9 = vmul.f32 %v2082_v12, %v1711_v15  ;;  %v1039_v63 = vrot.slane %v1038_v60, 2  ;;  %v1436_v2 = vrot.slane %v1435_v49, 1  ;;  %v1719_v11 = vadd.f32 %v1547_v13, %v1545_v59 }
 0x258   :  { %v1439_v20 = vrot.slane %v1438_v24, 4  ;;  %v2086_v23 = vmul.f32 %v2687_v61, %v2085_v40  ;;  %v1034_v0 = vrot.slane %v1033_v21, 1  ;;  %v1718_v50 = vadd.f32 %v1717_v45, %v1716_v18 }
 0x259   :  { %v2295_v19 = vadd.f32 %v3163_v26, %v2257_v9  ;;  %v1040_v4 = vmax.f32 %v1038_v60, %v1039_v63  ;;  %v3872_v58 = vadd.f32 %v1436_v2, %v1435_v49  ;;  %v1720_v7 = vrot.slane %v1719_v11, 4  ;;  %v3892_v45 = vpop.f32.mrf.mxu1 }
 0x25a   :  { %v1440_v16 = vadd.f32 %v1439_v20, %v1438_v24  ;;  %v2087_v44 = vadd.f32 %v2687_v61, %v2086_v23  ;;  %v1035_v51 = vmax.f32 %v1033_v21, %v1034_v0  ;;  %v1548_v36 = vmul.f32 %v2691_v41, %v834_v54  ;;  %v3901_v21 = vpop.f32.mrf.mxu2 }
 0x25b   :  { %v2376_v1 = vrot.slane %v2295_v19, 6  ;;  %v1041_v59 = vrot.slane %v1040_v4, 1  ;;  %2692 = vrcp.f32 %v3872_v58  ;;  %v1721_v6 = vadd.f32 %v1720_v7, %v1719_v11 }
 0x25c   :  { %v1441_v15 = vrot.slane %v1440_v16, 2  ;;  %v2091_v8 = vsel %vm2090_vm13, %v2687_v61, %v2087_v44  ;;  %v1133_v37 = vsub.f32 %v3799_v29, %v1035_v51  ;;  %v1135_v14 = vsub.f32 %v3826_v5, %v1035_v51 }
 0x25d   :  { %v2096_v22 = vsel %vm3856_vm9, %v2095_v53, %v2091_v8  ;;  %v3884_v30 = vsel %vm2343_vm5, %v2376_v1, %v3831_v55  ;;  %v1042_v34 = vmax.f32 %v1040_v4, %v1041_v59  ;;  %v1722_v5 = vrot.slane %v1721_v6, 2  ;;  %v837_v1 = vpop.f32.mrf.mxu0 }
 0x25e   :  { %v1442_v57 = vadd.f32 %v1441_v15, %v1440_v16  ;;  %v2258_v13 = vmul.f32 %v2096_v22, %v1718_v50  ;;  %v1245_v61 = vmul.f32 1.442695, %v1133_v37  ;;  %v1249_v10 = vmul.f32 1.442695, %v1135_v14  ;;  %v727_v4 = vpop.f32.mrf.mxu3 }
 0x25f   :  { %v1134_v18 = vsub.f32 %v3813_v52, %v1042_v34  ;;  %v1136_v29 = vsub.f32 %v3848_v47, %v1042_v34  ;;  %v1723_v49 = vadd.f32 %v1722_v5, %v1721_v6  ;;  %v2106_v12 = vand.u32 2147483647, %v3872_v58 }
 0x260   :  { %v1443_v35 = vrot.slane %v1442_v57, 1  ;;  %v2296_v43 = vadd.f32 %v3165_v28, %v2258_v13  ;;  %2694 = vpow2.f32 %v1245_v61  ;;  %v2108_v41 = vand.u32 2147483648, %v3872_v58 }
 0x261   :  { %2696 = vpow2.f32 %v1249_v10  ;;  %v1247_v39 = vmul.f32 1.442695, %v1134_v18  ;;  %v2693_v40 = vpop.eup %2692  ;;  %v1251_v60 = vmul.f32 1.442695, %v1136_v29  ;;  %vm2102_vm14 = vweird.f32 %v3872_v58 }
 0x262   :  { %v3889_v24 = vadd.f32 %v1443_v35, %v1442_v57  ;;  %v2390_v55 = vrot.slane %v2296_v43, 6  ;;  %v2098_v47 = vmul.f32 %v2693_v40, %v3872_v58  ;;  %v1726_v20 = vadd.f32 %v1548_v36, %v3863_v48  ;;  %v3926_v36 = vpop.f32.mrf.mxu1 }
 0x263   :  { %v1724_v9 = vrot.slane %v1723_v49, 1  ;;  %vm3906_vm0 = vcmp.eq.f32.partialorder %v2106_v12, 8.507059e+37  ;;  %v1043_v0 = vmax.f32 %v3867_v46, %v3892_v45  ;;  %v1050_v11 = vmax.f32 %v3870_v62, %v3901_v21 }
 0x264   :  { %2698 = vrcp.f32 %v3889_v24  ;;  %v3897_v52 = vsel %vm2343_vm5, %v2390_v55, %v3841_v42  ;;  %v2099_v23 = vsub.f32 1.0, %v2098_v47  ;;  %v2122_v63 = vand.u32 2147483648, %v3889_v24 }
 0x265   :  { %2700 = vpow2.f32 %v1247_v39  ;;  %v1727_v53 = vrot.slane %v1726_v20, 4  ;;  %vm2103_vm5 = vweird.f32 %v2693_v40  ;;  %v2109_v48 = vor.u32 1.1754944e-38, %v2108_v41 }
 0x266   :  { %2702 = vpow2.f32 %v1251_v60  ;;  %v2695_v2 = vpop.eup %2694  ;;  %v2100_v19 = vmul.f32 %v2693_v40, %v2099_v23  ;;  %v2120_v44 = vand.u32 2147483647, %v3889_v24  ;;  %v1044_v7 = vrot.slane %v1043_v0, 4  ;;  %vm2104_vm2 = vmor %vm2102_vm14, %vm2103_vm5 }
 0x267   :  { %v2697_v16 = vpop.eup %2696  ;;  %v1728_v51 = vadd.f32 %v1727_v53, %v1726_v20  ;;  %v1051_v15 = vrot.slane %v1050_v11, 4  ;;  %v1725_v59 = vadd.f32 %v1724_v9, %v1723_v49  ;;  %vm2116_vm1 = vweird.f32 %v3889_v24 }
 0x268   :  { %v1445_v50 = vadd.f32 %v2697_v16, %v2695_v2  ;;  %v2101_v22 = vadd.f32 %v2693_v40, %v2100_v19  ;;  %v2123_v37 = vor.u32 1.1754944e-38, %v2122_v63  ;;  %v1549_v14 = vmul.f32 %v2695_v2, %v724_v33 }
 0x269   :  { %v1729_v34 = vrot.slane %v1728_v51, 2  ;;  %v1551_v61 = vmul.f32 %v2697_v16, %v727_v4  ;;  %vm3920_vm4 = vcmp.eq.f32.partialorder %v2120_v44, 8.507059e+37  ;;  %v1045_v43 = vmax.f32 %v1043_v0, %v1044_v7 }
 0x26a   :  { %v2699_v8 = vpop.eup %2698  ;;  %v1446_v13 = vrot.slane %v1445_v50, 4  ;;  %v2105_v6 = vsel %vm2104_vm2, %v2693_v40, %v2101_v22  ;;  %v1052_v18 = vmax.f32 %v1050_v11, %v1051_v15  ;;  %v3928_v40 = vpop.f32.mrf.mxu2  ;;  %vm2358_vm5 = vcmask 1047559  }
 0x26b   :  { %v2701_v57 = vpop.eup %2700  ;;  %v2112_v54 = vmul.f32 %v2699_v8, %v3889_v24  ;;  %vm2117_vm3 = vweird.f32 %v2699_v8  ;;  %v2110_v5 = vsel %vm3906_vm0, %v2109_v48, %v2105_v6  ;;  %v1730_v58 = vadd.f32 %v1729_v34, %v1728_v51  ;;  %v840_v15 = vpop.f32.mrf.mxu0 }
 0x26c   :  { %v2703_v10 = vpop.eup %2702  ;;  %v1447_v33 = vadd.f32 %v1446_v13, %v1445_v50  ;;  %v2259_v55 = vmul.f32 %v2110_v5, %v1725_v59  ;;  %v1046_v60 = vrot.slane %v1045_v43, 2  ;;  %v1053_v49 = vrot.slane %v1052_v18, 2  ;;  %vm2118_vm6 = vmor %vm2116_vm1, %vm2117_vm3 }
 0x26d   :  { %v1452_v29 = vadd.f32 %v2703_v10, %v2701_v57  ;;  %v2113_v39 = vsub.f32 1.0, %v2112_v54  ;;  %v1731_v41 = vrot.slane %v1730_v58, 1  ;;  %v1733_v20 = vadd.f32 %v1551_v61, %v1549_v14 }
 0x26e   :  { %v1448_v12 = vrot.slane %v1447_v33, 2  ;;  %v2297_v9 = vadd.f32 %v3163_v26, %v2259_v55  ;;  %v1047_v63 = vmax.f32 %v1045_v43, %v1046_v60  ;;  %v1054_v2 = vmax.f32 %v1052_v18, %v1053_v49  ;;  %v3954_v55 = vpop.f32.mrf.mxu3 }
 0x26f   :  { %v1453_v47 = vrot.slane %v1452_v29, 4  ;;  %v2114_v23 = vmul.f32 %v2699_v8, %v2113_v39  ;;  %v1550_v0 = vmul.f32 %v2701_v57, %v837_v1  ;;  %v1734_v11 = vrot.slane %v1733_v20, 4 }
 0x270   :  { %v1449_v42 = vadd.f32 %v1448_v12, %v1447_v33  ;;  %v2378_v16 = vrot.slane %v2297_v9, 5  ;;  %v1048_v48 = vrot.slane %v1047_v63, 1  ;;  %v1055_v44 = vrot.slane %v1054_v2, 1  ;;  %v3947_v33 = vpop.f32.mrf.mxu1 }
 0x271   :  { %v1454_v53 = vadd.f32 %v1453_v47, %v1452_v29  ;;  %v2115_v19 = vadd.f32 %v2699_v8, %v2114_v23  ;;  %v1732_v51 = vadd.f32 %v1731_v41, %v1730_v58  ;;  %v1735_v7 = vadd.f32 %v1734_v11, %v1733_v20 }
 0x272   :  { %v1450_v4 = vrot.slane %v1449_v42, 1  ;;  %v3936_v59 = vsel %vm2346_vm15, %v2378_v16, %v3884_v30  ;;  %v1049_v1 = vmax.f32 %v1047_v63, %v1048_v48  ;;  %v1056_v14 = vmax.f32 %v1054_v2, %v1055_v44  ;;  %v3950_v5 = vpop.f32.mrf.mxu2 }
 0x273   :  { %v1455_v50 = vrot.slane %v1454_v53, 2  ;;  %v2119_v22 = vsel %vm2118_vm6, %v2699_v8, %v2115_v19  ;;  %v1736_v54 = vrot.slane %v1735_v7, 2  ;;  %v1552_v18 = vmul.f32 %v2703_v10, %v840_v15  ;;  %v3966_v9 = vpop.f32.mrf.mxu0 }
 0x274   :  { %v3938_v57 = vadd.f32 %v1450_v4, %v1449_v42  ;;  %v2124_v34 = vsel %vm3920_vm4, %v2123_v37, %v2119_v22  ;;  %v1137_v24 = vsub.f32 %v3867_v46, %v1049_v1  ;;  %v1139_v6 = vsub.f32 %v3892_v45, %v1049_v1 }
 0x275   :  { %v1456_v13 = vadd.f32 %v1455_v50, %v1454_v53  ;;  %v2260_v61 = vmul.f32 %v2124_v34, %v1732_v51  ;;  %v1138_v43 = vsub.f32 %v3870_v62, %v1056_v14  ;;  %v1140_v8 = vsub.f32 %v3901_v21, %v1056_v14 }
 0x276   :  { %2704 = vrcp.f32 %v3938_v57  ;;  %v1253_v35 = vmul.f32 1.442695, %v1137_v24  ;;  %v1257_v37 = vmul.f32 1.442695, %v1139_v6  ;;  %v1737_v45 = vadd.f32 %v1736_v54, %v1735_v7  ;;  %v733_v54 = vpop.f32.mrf.mxu3 }
 0x277   :  { %v1457_v30 = vrot.slane %v1456_v13, 1  ;;  %v2298_v29 = vadd.f32 %v3165_v28, %v2260_v61  ;;  %v1255_v46 = vmul.f32 1.442695, %v1138_v43  ;;  %v1259_v39 = vmul.f32 1.442695, %v1140_v8 }
 0x278   :  { %2706 = vpow2.f32 %v1253_v35  ;;  %v1057_v21 = vmax.f32 %v3926_v36, %v3947_v33  ;;  %v1740_v10 = vadd.f32 %v1552_v18, %v1550_v0  ;;  %v1064_v60 = vmax.f32 %v3928_v40, %v3950_v5  ;;  %v3987_v8 = vpop.f32.mrf.mxu1 }
 0x279   :  { %v3952_v58 = vadd.f32 %v1457_v30, %v1456_v13  ;;  %v2392_v62 = vrot.slane %v2298_v29, 5  ;;  %v1738_v47 = vrot.slane %v1737_v45, 1  ;;  %v2134_v41 = vand.u32 2147483647, %v3938_v57 }
 0x27a   :  { %v1741_v20 = vrot.slane %v1740_v10, 4  ;;  %v1058_v63 = vrot.slane %v1057_v21, 4  ;;  %v2136_v2 = vand.u32 2147483648, %v3938_v57  ;;  %v1065_v53 = vrot.slane %v1064_v60, 4 }
 0x27b   :  { %2708 = vrcp.f32 %v3952_v58  ;;  %v3963_v49 = vsel %vm2346_vm15, %v2392_v62, %v3897_v52  ;;  %vm2130_vm15 = vweird.f32 %v3938_v57  ;;  %v1739_v19 = vadd.f32 %v1738_v47, %v1737_v45 }
 0x27c   :  { %2710 = vpow2.f32 %v1257_v37  ;;  %v2705_v12 = vpop.eup %2704  ;;  %v1742_v42 = vadd.f32 %v1741_v20, %v1740_v10  ;;  %v1059_v11 = vmax.f32 %v1057_v21, %v1058_v63  ;;  %vm3973_vm7 = vcmp.eq.f32.partialorder %v2134_v41, 8.507059e+37 }
 0x27d   :  { %2712 = vpow2.f32 %v1255_v46  ;;  %v2126_v23 = vmul.f32 %v2705_v12, %v3938_v57  ;;  %v1066_v4 = vmax.f32 %v1064_v60, %v1065_v53  ;;  %vm2131_vm11 = vweird.f32 %v2705_v12  ;;  %v3995_v46 = vpop.f32.mrf.mxu2  ;;  %v4000_v60 = vpop.f32.mrf.mxu0 }
 0x27e   :  { %2714 = vpow2.f32 %v1259_v39  ;;  %v3970_v0 = vpop.eup %2706  ;;  %v1743_v44 = vrot.slane %v1742_v42, 2  ;;  %v1060_v15 = vrot.slane %v1059_v11, 2  ;;  %v2137_v14 = vor.u32 1.1754944e-38, %v2136_v2  ;;  %vm2132_vm8 = vmor %vm2130_vm15, %vm2131_vm11 }
 0x27f   :  { %v2127_v52 = vsub.f32 1.0, %v2126_v23  ;;  %v1067_v34 = vrot.slane %v1066_v4, 2  ;;  %v2148_v43 = vand.u32 2147483647, %v3952_v58  ;;  %v2150_v35 = vand.u32 2147483648, %v3952_v58 }
 0x280   :  { %v1744_v13 = vadd.f32 %v1743_v44, %v1742_v42  ;;  %v1061_v30 = vmax.f32 %v1059_v11, %v1060_v15  ;;  %vm2144_vm10 = vweird.f32 %v3952_v58  ;;  %vm2355_vm0 = vcmask 1046534  }
 0x281   :  { %v2709_v16 = vpop.eup %2708  ;;  %v2128_v51 = vmul.f32 %v2705_v12, %v2127_v52  ;;  %v1068_v37 = vmax.f32 %v1066_v4, %v1067_v34  ;;  %vm2149_vm14 = vcmp.eq.f32.partialorder %v2148_v43, 8.507059e+37 }
 0x282   :  { %v3977_v50 = vpop.eup %2710  ;;  %v2140_v7 = vmul.f32 %v2709_v16, %v3952_v58  ;;  %v1745_v29 = vrot.slane %v1744_v13, 1  ;;  %vm2145_vm9 = vweird.f32 %v2709_v16  ;;  %v1062_v39 = vrot.slane %v1061_v30, 1 }
 0x283   :  { %v3980_v22 = vpop.eup %2712  ;;  %v1459_v1 = vadd.f32 %v3977_v50, %v3970_v0  ;;  %v2129_v24 = vadd.f32 %v2705_v12, %v2128_v51  ;;  %v1069_v20 = vrot.slane %v1068_v37, 1  ;;  %vm2146_vm13 = vmor %vm2144_vm10, %vm2145_vm9  ;;  %v1555_v43 = vmul.f32 %v3977_v50, %v733_v54 }
 0x284   :  { %v3984_v61 = vpop.eup %2714  ;;  %v2141_v6 = vsub.f32 1.0, %v2140_v7  ;;  %v1063_v41 = vmax.f32 %v1061_v30, %v1062_v39  ;;  %v1746_v63 = vadd.f32 %v1745_v29, %v1744_v13 }
 0x285   :  { %v1466_v18 = vadd.f32 %v3984_v61, %v3980_v22  ;;  %v2133_v45 = vsel %vm2132_vm8, %v2705_v12, %v2129_v24  ;;  %v1460_v21 = vrot.slane %v1459_v1, 4  ;;  %v2151_v12 = vor.u32 1.1754944e-38, %v2150_v35  ;;  %v4016_v34 = vpop.f32.mrf.mxu2  ;;  %v4023_v30 = vpop.f32.mrf.mxu0 }
 0x286   :  { %v2142_v62 = vmul.f32 %v2709_v16, %v2141_v6  ;;  %v2138_v10 = vsel %vm3973_vm7, %v2137_v14, %v2133_v45  ;;  %v1141_v53 = vsub.f32 %v3926_v36, %v1063_v41  ;;  %v1143_v52 = vsub.f32 %v3947_v33, %v1063_v41  ;;  %v4007_v14 = vpop.f32.mrf.mxu3  ;;  %v4014_v33 = vpop.f32.mrf.mxu1 }
 0x287   :  { %v2261_v57 = vmul.f32 %v2138_v10, %v1739_v19  ;;  %v1467_v23 = vrot.slane %v1466_v18, 4  ;;  %v1461_v11 = vadd.f32 %v1460_v21, %v1459_v1  ;;  %v1070_v48 = vmax.f32 %v1068_v37, %v1069_v20 }
 0x288   :  { %v2143_v47 = vadd.f32 %v2709_v16, %v2142_v62  ;;  %v1261_v4 = vmul.f32 1.442695, %v1141_v53  ;;  %v1265_v51 = vmul.f32 1.442695, %v1143_v52  ;;  %v1078_v35 = vmax.f32 %v3995_v46, %v4016_v34 }
 0x289   :  { %v2299_v2 = vadd.f32 %v3163_v26, %v2261_v57  ;;  %v1142_v7 = vsub.f32 %v3928_v40, %v1070_v48  ;;  %v1144_v15 = vsub.f32 %v3950_v5, %v1070_v48  ;;  %v1468_v13 = vadd.f32 %v1467_v23, %v1466_v18 }
 0x28a   :  { %v2147_v42 = vsel %vm2146_vm13, %v2709_v16, %v2143_v47  ;;  %2716 = vpow2.f32 %v1261_v4  ;;  %v1462_v24 = vrot.slane %v1461_v11, 2  ;;  %v1553_v5 = vmul.f32 %v3970_v0, %v3954_v55 }
 0x28b   :  { %v2152_v58 = vsel %vm2149_vm14, %v2151_v12, %v2147_v42  ;;  %v2380_v44 = vrot.slane %v2299_v2, 4  ;;  %2718 = vpow2.f32 %v1265_v51  ;;  %v1263_v1 = vmul.f32 1.442695, %v1142_v7 }
 0x28c   :  { %v2262_v19 = vmul.f32 %v2152_v58, %v1746_v63  ;;  %v1267_v6 = vmul.f32 1.442695, %v1144_v15  ;;  %v1469_v18 = vrot.slane %v1468_v13, 2  ;;  %v1463_v45 = vadd.f32 %v1462_v24, %v1461_v11 }
 0x28d   :  { %v4011_v16 = vsel %vm2349_vm12, %v2380_v44, %v3936_v59  ;;  %v1071_v59 = vmax.f32 %v3987_v8, %v4014_v33  ;;  %2720 = vpow2.f32 %v1263_v1  ;;  %v1747_v0 = vadd.f32 %v1555_v43, %v1553_v5  ;;  %v852_v58 = vpop.f32.mrf.mxu0 }
 0x28e   :  { %v2300_v36 = vadd.f32 %v3165_v28, %v2262_v19  ;;  %2722 = vpow2.f32 %v1267_v6  ;;  %v1470_v54 = vadd.f32 %v1469_v18, %v1468_v13  ;;  %v1079_v39 = vrot.slane %v1078_v35, 4  ;;  %v739_v10 = vpop.f32.mrf.mxu3 }
 0x28f   :  { %v1072_v50 = vrot.slane %v1071_v59, 4  ;;  %v1464_v47 = vrot.slane %v1463_v45, 1  ;;  %v1748_v23 = vrot.slane %v1747_v0, 4  ;;  %v4040_v15 = vadd.f32 %v3165_v28, %v3593_v25 }
 0x290   :  { %v2394_v40 = vrot.slane %v2300_v36, 4  ;;  %v2717_v37 = vpop.eup %2716  ;;  %v1080_v20 = vmax.f32 %v1078_v35, %v1079_v39  ;;  %v1471_v2 = vrot.slane %v1470_v54, 1  ;;  %v4044_v13 = vadd.f32 %v3163_v26, %v3640_v3 }
 0x291   :  { %v2719_v55 = vpop.eup %2718  ;;  %v1073_v21 = vmax.f32 %v1071_v59, %v1072_v50  ;;  %v4036_v44 = vadd.f32 %v1464_v47, %v1463_v45  ;;  %v4050_v24 = vadd.f32 %v3165_v28, %v3650_v31  ;;  %v1554_v25 = vmul.f32 %v3980_v22, %v3966_v9 }
 0x292   :  { %v4027_v29 = vsel %vm2349_vm12, %v2394_v40, %v3963_v49  ;;  %v1473_v62 = vadd.f32 %v2719_v55, %v2717_v37  ;;  %v4033_v49 = vadd.f32 %v3163_v26, %v3580_v27  ;;  %v1081_v11 = vrot.slane %v1080_v20, 2 }
 0x293   :  { %v2721_v57 = vpop.eup %2720  ;;  %v1074_v63 = vrot.slane %v1073_v21, 2  ;;  %v1749_v27 = vadd.f32 %v1748_v23, %v1747_v0  ;;  %v4046_v36 = vadd.f32 %v1471_v2, %v1470_v54  ;;  %2724 = vrcp.f32 %v4036_v44 }
 0x294   :  { %v1474_v41 = vrot.slane %v1473_v62, 4  ;;  %v2723_v12 = vpop.eup %2722  ;;  %v2351_v48 = vrot.slane %v4033_v49, 3  ;;  %v1082_v7 = vmax.f32 %v1080_v20, %v1081_v11  ;;  %v1556_v3 = vmul.f32 %v3984_v61, %v4000_v60 }
 0x295   :  { %v1480_v53 = vadd.f32 %v2723_v12, %v2721_v57  ;;  %v1075_v52 = vmax.f32 %v1073_v21, %v1074_v63  ;;  %v1750_v18 = vrot.slane %v1749_v27, 2  ;;  %2726 = vrcp.f32 %v4046_v36 }
 0x296   :  { %v1475_v42 = vadd.f32 %v1474_v41, %v1473_v62  ;;  %v1083_v5 = vrot.slane %v1082_v7, 1  ;;  %v742_v31 = vpop.f32.mrf.mxu3  ;;  %v1557_v50 = vmul.f32 %v2717_v37, %v4007_v14  ;;  %v1559_v22 = vmul.f32 %v2719_v55, %v739_v10  ;;  %v855_v37 = vpop.f32.mrf.mxu0 }
 0x297   :  { %v1481_v4 = vrot.slane %v1480_v53, 4  ;;  %v1076_v51 = vrot.slane %v1075_v52, 1  ;;  %v4065_v61 = vadd.f32 %v3163_v26, %v3694_v17  ;;  %v1754_v21 = vadd.f32 %v1556_v3, %v1554_v25 }
 0x298   :  { %v1476_v19 = vrot.slane %v1475_v42, 2  ;;  %v1084_v54 = vmax.f32 %v1082_v7, %v1083_v5  ;;  %v4076_v55 = vadd.f32 %v1750_v18, %v1749_v27  ;;  %v1558_v10 = vmul.f32 %v2721_v57, %v4023_v30 }
 0x299   :  { %v1482_v40 = vadd.f32 %v1481_v4, %v1480_v53  ;;  %v1077_v6 = vmax.f32 %v1075_v52, %v1076_v51  ;;  %v4074_v47 = vpop.eup %2724  ;;  %v1761_v20 = vadd.f32 %v1559_v22, %v1557_v50  ;;  %v1560_v23 = vmul.f32 %v2723_v12, %v852_v58 }
 0x29a   :  { %v1477_v1 = vadd.f32 %v1476_v19, %v1475_v42  ;;  %v1146_v60 = vsub.f32 %v3995_v46, %v1084_v54  ;;  %v1148_v14 = vsub.f32 %v4016_v34, %v1084_v54  ;;  %v2368_v63 = vrot.slane %v4040_v15, 3 }
 0x29b   :  { %v1483_v59 = vrot.slane %v1482_v40, 2  ;;  %v1145_v35 = vsub.f32 %v3987_v8, %v1077_v6  ;;  %v1147_v45 = vsub.f32 %v4014_v33, %v1077_v6  ;;  %v4069_v8 = vadd.f32 %v3165_v28, %v3706_v56  ;;  %v4081_v46 = vpop.eup %2726 }
 0x29c   :  { %v1478_v43 = vrot.slane %v1477_v1, 1  ;;  %v1271_v17 = vmul.f32 1.442695, %v1146_v60  ;;  %v1275_v41 = vmul.f32 1.442695, %v1148_v14  ;;  %v2354_v34 = vrot.slane %v4044_v13, 2 }
 0x29d   :  { %v1484_v62 = vadd.f32 %v1483_v59, %v1482_v40  ;;  %v1269_v39 = vmul.f32 1.442695, %v1145_v35  ;;  %v1273_v9 = vmul.f32 1.442695, %v1147_v45  ;;  %v2370_v2 = vrot.slane %v4050_v24, 2 }
 0x29e   :  { %v4060_v0 = vadd.f32 %v1478_v43, %v1477_v1  ;;  %v2154_v42 = vmul.f32 %v4074_v47, %v4036_v44  ;;  %v2164_v30 = vand.u32 2147483648, %v4036_v44  ;;  %vm2352_vm12 = vcmask 1045509   ;;  %v745_v51 = vpop.f32.mrf.mxu3  ;;  %v858_v45 = vpop.f32.mrf.mxu0 }
 0x29f   :  { %v1485_v33 = vrot.slane %v1484_v62, 1  ;;  %v2357_v12 = vrot.slane %v4065_v61, 1  ;;  %v2372_v53 = vrot.slane %v4069_v8, 1  ;;  %v2162_v52 = vand.u32 2147483647, %v4036_v44 }
 0x2a0   :  { %2728 = vrcp.f32 %v4060_v0  ;;  %v1752_v58 = vrot.slane %v4076_v55, 1  ;;  %v1755_v19 = vrot.slane %v1754_v21, 4  ;;  %v1762_v4 = vrot.slane %v1761_v20, 4 }
 0x2a1   :  { %2730 = vpow2.f32 %v1269_v39  ;;  %v4079_v56 = vadd.f32 %v1485_v33, %v1484_v62  ;;  %v1768_v27 = vadd.f32 %v1560_v23, %v1558_v10  ;;  %v2353_v1 = vsel %vm2352_vm12, %v2351_v48, %v3536_v38 }
 0x2a2   :  { %2732 = vpow2.f32 %v1273_v9  ;;  %v2155_v24 = vsub.f32 1.0, %v2154_v42  ;;  %v4102_v40 = vor.u32 1.1754944e-38, %v2164_v30  ;;  %v2168_v6 = vmul.f32 %v4081_v46, %v4046_v36 }
 0x2a3   :  { %2734 = vpow2.f32 %v1271_v17  ;;  %v2356_v3 = vsel %vm2355_vm0, %v2354_v34, %v2353_v1  ;;  %v2369_v59 = vsel %vm2352_vm12, %v2368_v63, %v3546_v32  ;;  %v1756_v49 = vadd.f32 %v1755_v19, %v1754_v21 }
 0x2a4   :  { %2736 = vrcp.f32 %v4079_v56  ;;  %v2176_v38 = vand.u32 2147483647, %v4046_v36  ;;  %v1763_v35 = vadd.f32 %v1762_v4, %v1761_v20  ;;  %vm2158_vm1 = vweird.f32 %v4036_v44 }
 0x2a5   :  { %2738 = vpow2.f32 %v1275_v41  ;;  %v1769_v54 = vrot.slane %v1768_v27, 4  ;;  %v2359_v39 = vsel %vm2358_vm5, %v2357_v12, %v2356_v3  ;;  %v2156_v8 = vmul.f32 %v4074_v47, %v2155_v24 }
 0x2a6   :  { %v4090_v57 = vpop.eup %2728  ;;  %2406 = vst [vmem:[#allocation11] sm:$0xff] %v2359_v39  ;;  %v2169_v60 = vsub.f32 1.0, %v2168_v6  ;;  %v2371_v21 = vsel %vm2355_vm0, %v2370_v2, %v2369_v59  ;;  %v1757_v14 = vrot.slane %v1756_v49, 2  ;;  %v1764_v41 = vrot.slane %v1763_v35, 2 }
 0x2a7   :  { %v2731_v11 = vpop.eup %2730  ;;  %v2182_v15 = vmul.f32 %v4090_v57, %v4060_v0  ;;  %v2178_v20 = vand.u32 2147483648, %v4046_v36  ;;  %v1770_v63 = vadd.f32 %v1769_v54, %v1768_v27  ;;  %vm2159_vm2 = vweird.f32 %v4074_v47 }
 0x2a8   :  { %v2733_v7 = vpop.eup %2732  ;;  %v1561_v13 = vmul.f32 %v2731_v11, %v742_v31  ;;  %v2170_v2 = vmul.f32 %v4081_v46, %v2169_v60  ;;  %vm2172_vm3 = vweird.f32 %v4046_v36  ;;  %v2373_v19 = vsel %vm2358_vm5, %v2372_v53, %v2371_v21  ;;  %vm4133_vm15 = vmor %vm2158_vm1, %vm2159_vm2 }
 0x2a9   :  { %v1487_v5 = vadd.f32 %v2733_v7, %v2731_v11  ;;  %v2735_v43 = vpop.eup %2734  ;;  %v1563_v25 = vmul.f32 %v2733_v7, %v745_v51  ;;  %v2183_v50 = vsub.f32 1.0, %v2182_v15  ;;  %v2157_v11 = vadd.f32 %v4074_v47, %v2156_v8  ;;  %2407 = vst [vmem:[#allocation11 + $0x8] sm:$0xff] %v2373_v19 }
 0x2aa   :  { %v4109_v18 = vpop.eup %2736  ;;  %v1562_v61 = vmul.f32 %v2735_v43, %v855_v37  ;;  %vm4125_vm4 = vcmp.eq.f32.partialorder %v2162_v52, 8.507059e+37  ;;  %v1758_v27 = vadd.f32 %v1757_v14, %v1756_v49  ;;  %v1765_v15 = vadd.f32 %v1764_v41, %v1763_v35 }
 0x2ab   :  { %v1488_v48 = vrot.slane %v1487_v5, 4  ;;  %v2739_v31 = vpop.eup %2738  ;;  %v1775_v62 = vadd.f32 %v1563_v25, %v1561_v13  ;;  %v2196_v32 = vmul.f32 %v4109_v18, %v4079_v56  ;;  %v2184_v23 = vmul.f32 %v4090_v57, %v2183_v50 }
 0x2ac   :  { %v1494_v22 = vadd.f32 %v2739_v31, %v2735_v43  ;;  %v1564_v33 = vmul.f32 %v2739_v31, %v858_v45  ;;  %vm2187_vm6 = vweird.f32 %v4090_v57  ;;  %v1771_v1 = vrot.slane %v1770_v63, 2 }
 0x2ad   :  { %v1489_v9 = vadd.f32 %v1488_v48, %v1487_v5  ;;  %v1776_v34 = vrot.slane %v1775_v62, 4  ;;  %v2197_v37 = vsub.f32 1.0, %v2196_v32  ;;  %v2185_v13 = vadd.f32 %v4090_v57, %v2184_v23 }
 0x2ae   :  { %v1495_v10 = vrot.slane %v1494_v22, 4  ;;  %v1782_v12 = vadd.f32 %v1564_v33, %v1562_v61  ;;  %v2161_v25 = vsel %vm4133_vm15, %v4074_v47, %v2157_v11  ;;  %v2171_v3 = vadd.f32 %v4081_v46, %v2170_v2 }
 0x2af   :  { %v1490_v17 = vrot.slane %v1489_v9, 2  ;;  %v1777_v24 = vadd.f32 %v1776_v34, %v1775_v62  ;;  %v2198_v5 = vmul.f32 %v4109_v18, %v2197_v37  ;;  %vm2173_vm7 = vweird.f32 %v4081_v46 }
 0x2b0   :  { %v1496_v30 = vadd.f32 %v1495_v10, %v1494_v22  ;;  %v1783_v43 = vrot.slane %v1782_v12, 4  ;;  %v2192_v44 = vand.u32 2147483648, %v4060_v0  ;;  %vm2186_vm11 = vweird.f32 %v4060_v0  ;;  %vm4170_vm10 = vmor %vm2172_vm3, %vm2173_vm7 }
 0x2b1   :  { %v1491_v42 = vadd.f32 %v1490_v17, %v1489_v9  ;;  %v2190_v49 = vand.u32 2147483647, %v4060_v0  ;;  %v1766_v48 = vrot.slane %v1765_v15, 1  ;;  %vm4151_vm8 = vmor %vm2186_vm11, %vm2187_vm6  ;;  %v1772_v47 = vadd.f32 %v1771_v1, %v1770_v63 }
 0x2b2   :  { %v1497_v7 = vrot.slane %v1496_v30, 2  ;;  %vm2201_vm9 = vweird.f32 %v4109_v18  ;;  %v1778_v45 = vrot.slane %v1777_v24, 2  ;;  %v2189_v50 = vsel %vm4151_vm8, %v4090_v57, %v2185_v13 }
 0x2b3   :  { %v1492_v51 = vrot.slane %v1491_v42, 1  ;;  %v2199_v54 = vadd.f32 %v4109_v18, %v2198_v5  ;;  %v1784_v0 = vadd.f32 %v1783_v43, %v1782_v12  ;;  %v1753_v62 = vadd.f32 %v1752_v58, %v4076_v55 }
 0x2b4   :  { %v1498_v52 = vadd.f32 %v1497_v7, %v1496_v30  ;;  %v1759_v39 = vrot.slane %v1758_v27, 1  ;;  %v2193_v9 = vor.u32 1.1754944e-38, %v2192_v44  ;;  %v2206_v22 = vand.u32 2147483648, %v4079_v56 }
 0x2b5   :  { %v4137_v53 = vadd.f32 %v1492_v51, %v1491_v42  ;;  %vm2191_vm13 = vcmp.eq.f32.partialorder %v2190_v49, 8.507059e+37  ;;  %vm2200_vm14 = vweird.f32 %v4079_v56  ;;  %v2204_v57 = vand.u32 2147483647, %v4079_v56 }
 0x2b6   :  { %v1499_v59 = vrot.slane %v1498_v52, 1  ;;  %v2166_v55 = vsel %vm4125_vm4, %v4102_v40, %v2161_v25  ;;  %v2175_v58 = vsel %vm4170_vm10, %v4081_v46, %v2171_v3  ;;  %v2194_v61 = vsel %vm2191_vm13, %v2193_v9, %v2189_v50  ;;  %vm4185_vm1 = vmor %vm2200_vm14, %vm2201_vm9 }
 0x2b7   :  { %2740 = vrcp.f32 %v4137_v53  ;;  %v1779_v60 = vadd.f32 %v1778_v45, %v1777_v24  ;;  %v1767_v21 = vadd.f32 %v1766_v48, %v1765_v15  ;;  %v1773_v14 = vrot.slane %v1772_v47, 1 }
 0x2b8   :  { %v4156_v31 = vadd.f32 %v1499_v59, %v1498_v52  ;;  %v2203_v56 = vsel %vm4185_vm1, %v4109_v18, %v2199_v54  ;;  %v1785_v40 = vrot.slane %v1784_v0, 2  ;;  %vm2177_vm2 = vcmp.eq.f32.partialorder %v2176_v38, 8.507059e+37 }
 0x2b9   :  { %v2179_v46 = vor.u32 1.1754944e-38, %v2178_v20  ;;  %v2207_v17 = vor.u32 1.1754944e-38, %v2206_v22  ;;  %v2263_v41 = vmul.f32 %v2166_v55, %v1753_v62  ;;  %v1760_v23 = vadd.f32 %v1759_v39, %v1758_v27 }
 0x2ba   :  { %2742 = vrcp.f32 %v4156_v31  ;;  %v2265_v63 = vmul.f32 %v2194_v61, %v1767_v21  ;;  %vm2205_vm3 = vcmp.eq.f32.partialorder %v2204_v57, 8.507059e+37  ;;  %v1780_v30 = vrot.slane %v1779_v60, 1 }
 0x2bb   :  { %v2180_v34 = vsel %vm2177_vm2, %v2179_v46, %v2175_v58  ;;  %v2208_v42 = vsel %vm2205_vm3, %v2207_v17, %v2203_v56  ;;  %v1774_v18 = vadd.f32 %v1773_v14, %v1772_v47  ;;  %v2218_v11 = vand.u32 2147483647, %v4137_v53 }
 0x2bc   :  { %v2220_v38 = vand.u32 2147483648, %v4137_v53  ;;  %v1786_v2 = vadd.f32 %v1785_v40, %v1784_v0  ;;  %v2301_v19 = vadd.f32 %v3163_v26, %v2263_v41  ;;  %v2264_v4 = vmul.f32 %v2180_v34, %v1760_v23 }
 0x2bd   :  { %v2741_v33 = vpop.eup %2740  ;;  %v2303_v27 = vadd.f32 %v3163_v26, %v2265_v63  ;;  %v2266_v51 = vmul.f32 %v2208_v42, %v1774_v18  ;;  %v1781_v7 = vadd.f32 %v1780_v30, %v1779_v60  ;;  %vm2214_vm6 = vweird.f32 %v4137_v53 }
 0x2be   :  { %v2210_v10 = vmul.f32 %v2741_v33, %v4137_v53  ;;  %vm2215_vm4 = vweird.f32 %v2741_v33  ;;  %vm2219_vm7 = vcmp.eq.f32.partialorder %v2218_v11, 8.507059e+37  ;;  %v2221_v1 = vor.u32 1.1754944e-38, %v2220_v38 }
 0x2bf   :  { %vm2216_vm15 = vmor %vm2214_vm6, %vm2215_vm4  ;;  %v1787_v24 = vrot.slane %v1786_v2, 1  ;;  %v2234_v6 = vand.u32 2147483648, %v4156_v31  ;;  %v2232_v43 = vand.u32 2147483647, %v4156_v31  ;;  %v2382_v25 = vrot.slane %v2301_v19, 3 }
 0x2c0   :  { %v2211_v37 = vsub.f32 1.0, %v2210_v10  ;;  %v2743_v12 = vpop.eup %2742  ;;  %v2302_v44 = vadd.f32 %v3165_v28, %v2264_v4  ;;  %vm2228_vm8 = vweird.f32 %v4156_v31  ;;  %v2384_v53 = vrot.slane %v2303_v27, 2 }
 0x2c1   :  { %v2224_v20 = vmul.f32 %v2743_v12, %v4156_v31  ;;  %vm2229_vm11 = vweird.f32 %v2743_v12  ;;  %v2304_v48 = vadd.f32 %v3165_v28, %v2266_v51  ;;  %v2235_v35 = vor.u32 1.1754944e-38, %v2234_v6 }
 0x2c2   :  { %v2212_v36 = vmul.f32 %v2741_v33, %v2211_v37  ;;  %vm2230_vm9 = vmor %vm2228_vm8, %vm2229_vm11  ;;  %v1788_v45 = vadd.f32 %v1787_v24, %v1786_v2  ;;  %vm2233_vm10 = vcmp.eq.f32.partialorder %v2232_v43, 8.507059e+37  ;;  %v2396_v0 = vrot.slane %v2302_v44, 3 }
 0x2c3   :  { %v2225_v13 = vsub.f32 1.0, %v2224_v20  ;;  %v2383_v9 = vsel %vm2352_vm12, %v2382_v25, %v4011_v16  ;;  %v2398_v22 = vrot.slane %v2304_v48, 2 }
 0x2c4   :  { %v2213_v15 = vadd.f32 %v2741_v33, %v2212_v36  ;;  %v2385_v31 = vsel %vm2355_vm0, %v2384_v53, %v2383_v9  ;;  %v2397_v55 = vsel %vm2352_vm12, %v2396_v0, %v4027_v29 }
 0x2c5   :  { %v2226_v5 = vmul.f32 %v2743_v12, %v2225_v13  ;;  %v2399_v16 = vsel %vm2355_vm0, %v2398_v22, %v2397_v55 }
 0x2c6   :  { %v2217_v52 = vsel %vm2216_vm15, %v2741_v33, %v2213_v15 }
 0x2c7   :  { %v2222_v3 = vsel %vm2219_vm7, %v2221_v1, %v2217_v52  ;;  %v2227_v49 = vadd.f32 %v2743_v12, %v2226_v5 }
 0x2c8   :  { %v2267_v59 = vmul.f32 %v2222_v3, %v1781_v7 }
 0x2c9   :  { %v2231_v50 = vsel %vm2230_vm9, %v2743_v12, %v2227_v49 }
 0x2ca   :  { %v2305_v47 = vadd.f32 %v3163_v26, %v2267_v59  ;;  %v2236_v54 = vsel %vm2233_vm10, %v2235_v35, %v2231_v50 }
 0x2cb   :  { %v2268_v39 = vmul.f32 %v2236_v54, %v1788_v45 }
 0x2cc   :  { %v2386_v62 = vrot.slane %v2305_v47, 1 }
 0x2cd   :  { %v2306_v32 = vadd.f32 %v3165_v28, %v2268_v39 }
 0x2ce   :  { %v2387_v57 = vsel %vm2358_vm5, %v2386_v62, %v2385_v31 }
 0x2cf   :  { %2408 = vst [vmem:[#allocation11 + $0x10] sm:$0xff] %v2387_v57  ;;  %v2400_v26 = vrot.slane %v2306_v32, 1 }
 0x2d1   :  { %v2401_v58 = vsel %vm2358_vm5, %v2400_v26, %v2399_v16 }
 0x2d2   :  { %2409 = vst [vmem:[#allocation11 + $0x18] sm:$0xff] %v2401_v58 }
 0x2d3   :  { %2422 = dma.vmem_to_hbm [thread:$0]  %s2415_s15, 512, %s2417_s18, [#allocation5], %s2885_s11, %s2885_s11, %s2886_s12  }
 0x2d4   :  { %2878 = dma.done.wait [#allocation5], 512  }
 0x2d5   :  { %2879 = vsyncadd [#allocation5], 4294966784 }
 0x2d6   :  { %2427 = vsyncpa [#allocation4], 1 }
 0x2d7   :  { %2428 = vsyncpa [#allocation7], 1 }
 0x2d8   :  { %2429 = vsyncpa [#allocation10], 1 }
 0x2d9   :  { %2430 = vsyncpa [#allocation5], 1 }

</bundles_post_ra>
